<compile_context>
chip_gen: v5e
topology: v5e:2x2
jax: 0.10.0
libtpu: 0.0.40
codegen_flags: <defaults>
</compile_context>

<pallas_src>
import jax
import jax.numpy as jnp
import numpy as np
from jax.experimental import pallas as pl
from jax.experimental.pallas import tpu as pltpu


def _upsample_conv_lrelu_kernel(x_ref, w_ref, b_ref, o_ref, xp_ref, cols_ref):
    """One batch element per grid step.

    x_ref   : (H, W, C)        original-resolution input tile (NHWC)
    w_ref   : (2, 9*C, 2*C)    phase-combined conv weights  [py, (di, dj, ci), (px, co)]
    b_ref   : (1, 2*C)         bias, tiled once per column phase
    o_ref   : (H, 2, W, 2*C)   phase-packed output  [r, py, s, (px, co)]
    xp_ref  : VMEM (H+2, W+2, C)  zero-halo scratch (original resolution)
    cols_ref: VMEM (H, W, 9*C)    im2col scratch (original resolution)
    """
    H, W, C = x_ref.shape

    # 1-px zero halo built in VMEM (no HBM-side pad).  Re-zeroed every step so the kernel
    # stays correct even if the batch axis is sharded across TensorCores.
    xp_ref[...] = jnp.zeros_like(xp_ref)
    xp_ref[1:H + 1, 1:W + 1, :] = x_ref[...]

    # im2col at ORIGINAL resolution: 9 shifted (H, W, C) views packed along the lane axis.
    for di in range(3):
        for dj in range(3):
            k = di * 3 + dj
            cols_ref[:, :, k * C:(k + 1) * C] = xp_ref[di:di + H, dj:dj + W, :]

    cols = cols_ref[...].reshape(H * W, 9 * C)
    bias = b_ref[...].astype(jnp.float32)             # (1, 2*C)

    # One fused MXU contraction (K = 9*C) per output row-phase.  The nearest-2x upsample is
    # folded into w_ref, so each result column block (px, co) is already the final output
    # pixel column x = 2*s + px -> the store below is a contiguous 2*C-lane store.
    for py in range(2):
        r = jnp.dot(cols, w_ref[py], preferred_element_type=jnp.float32)
        r = r + bias
        r = jnp.where(r >= 0, r, 0.2 * r)              # LeakyReLU(negative_slope=0.2)
        o_ref[:, py, :, :] = r.reshape(H, W, 2 * C).astype(o_ref.dtype)


def _phase_weights(weight_oihw, bias):
    """Fold the nearest-2x upsample into the 3x3 conv weights.

    For output phase (py, px) (output parity along H, W) the three conv taps along each
    axis collapse onto two source offsets of the ORIGINAL image; M[p, k, d] maps tap k to
    source offset d (0..2 inside the 1-px-padded original tile) for phase p.

    Returns Wp: (2, 9*Cin, 2*Cout) ordered [py, (di, dj, ci), (px, co)] and b2: (1, 2*Cout).
    """
    C_out, C_in, _, _ = weight_oihw.shape
    M = jnp.array(
        [[[1, 0, 0], [0, 1, 0], [0, 1, 0]],    # phase 0: taps hit original offsets {-1, 0, 0}
         [[0, 1, 0], [0, 1, 0], [0, 0, 1]]],   # phase 1: taps hit original offsets {0, 0, +1}
        dtype=weight_oihw.dtype)
    # w_eff[py, px, di, dj, ci, co] = sum_{kh,kw} M[py,kh,di] * M[px,kw,dj] * w[co,ci,kh,kw]
    w_eff = jnp.einsum('phd,qwe,oihw->pqdeio', M, M, weight_oihw)
    w_p = jnp.transpose(w_eff, (0, 2, 3, 4, 1, 5)).reshape(2, 9 * C_in, 2 * C_out)
    b2 = jnp.tile(bias, 2).reshape(1, 2 * C_out)
    return w_p, b2


@jax.jit
def upsample_a_forward(x_nchw, weight_oihw, bias):
    """Equivalent of UpSample_A.forward.  x_nchw: (N, C, H, W) -> (N, C, 2H, 2W)."""
    N, C, H, W = x_nchw.shape
    H2, W2 = 2 * H, 2 * W

    # Only the small original-resolution tensor is re-laid-out; no upsample/pad in HBM.
    x = jnp.transpose(x_nchw, (0, 2, 3, 1)).reshape(N * H, W, C)   # (N*H, W, C), NHWC rows
    w_p, b2 = _phase_weights(weight_oihw, bias)

    out = pl.pallas_call(
        _upsample_conv_lrelu_kernel,
        out_shape=jax.ShapeDtypeStruct((N * H, 2, W, 2 * C), x_nchw.dtype),
        grid_spec=pltpu.PrefetchScalarGridSpec(
            num_scalar_prefetch=0,
            grid=(N,),
            in_specs=[
                pl.BlockSpec((H, W, C), lambda n: (n, 0, 0)),
                pl.BlockSpec((2, 9 * C, 2 * C), lambda n: (0, 0, 0)),
                pl.BlockSpec((1, 2 * C), lambda n: (0, 0)),
            ],
            out_specs=pl.BlockSpec((H, 2, W, 2 * C), lambda n: (n, 0, 0, 0)),
            scratch_shapes=[
                pltpu.VMEM((H + 2, W + 2, C), x_nchw.dtype),
                pltpu.VMEM((H, W, 9 * C), x_nchw.dtype),
            ],
        ),
        compiler_params=pltpu.CompilerParams(
            dimension_semantics=("parallel",),
            vmem_limit_bytes=32 * 1024 * 1024,
        ),
    )(x, w_p, b2)

    # (N*H, 2, W, 2C) -> (N, 2H, 2W, C) is a contiguity-preserving reshape (free bitcast).
    out_nhwc = out.reshape(N, H2, W2, C)
    return jnp.transpose(out_nhwc, (0, 3, 1, 2))                    # back to NCHW


def _reference_forward(x_nchw, weight_oihw, bias):
    """Pure-JAX reference (same semantics as the PyTorch module)."""
    xu = jnp.repeat(jnp.repeat(x_nchw, 2, axis=2), 2, axis=3)
    y = jax.lax.conv_general_dilated(
        xu, weight_oihw, window_strides=(1, 1), padding=((1, 1), (1, 1)),
        dimension_numbers=("NCHW", "OIHW", "NCHW"))
    y = y + bias[None, :, None, None]
    return jnp.where(y >= 0, y, 0.2 * y)


if __name__ == "__main__":
    # Two small configs: the small-channel case and the module default nf=64
    # (the latter exercises the fully lane-dense 2*C = 128 output store).
    for (N, nf, H, W) in [(2, 8, 16, 16), (1, 64, 8, 8)]:
        key = jax.random.PRNGKey(0)
        kx, kw, kb = jax.random.split(key, 3)

        x = jax.random.normal(kx, (N, nf, H, W), dtype=jnp.float32)
        fan_in = nf * 3 * 3
        weight = jax.random.normal(kw, (nf, nf, 3, 3), dtype=jnp.float32) / np.sqrt(fan_in)
        bias = jax.random.normal(kb, (nf,), dtype=jnp.float32) * 0.1

        out = jax.block_until_ready(upsample_a_forward(x, weight, bias))
        ref = _reference_forward(x, weight, bias)

        assert out.shape == (N, nf, 2 * H, 2 * W)
        np.testing.assert_allclose(np.asarray(out), np.asarray(ref), rtol=1e-4, atol=1e-5)

    print("KERNEL_OK")
</pallas_src>

<mosaic_0001>
module attributes {stable_mosaic.version = 11 : i64} {
  func.func @_upsample_conv_lrelu_kernel(%arg0: i32, %arg1: memref<16x16x8xf32, #tpu.memory_space<vmem>>, %arg2: memref<2x72x16xf32, #tpu.memory_space<vmem>>, %arg3: memref<1x16xf32, #tpu.memory_space<vmem>>, %arg4: memref<16x2x16x16xf32, #tpu.memory_space<vmem>>, %arg5: memref<18x18x8xf32, #tpu.memory_space<vmem>>, %arg6: memref<16x16x72xf32, #tpu.memory_space<vmem>>) attributes {dimension_semantics = [#tpu.dimension_semantics<parallel>], iteration_bounds = array<i64: 2>, scalar_prefetch = 0 : i64, scratch_operands = 2 : i64, tpu.core_type = #tpu.core_type<tc>, window_params = [{transform_indices = @transform_0, window_bounds = array<i64: 16, 16, 8>}, {pipeline_mode = #tpu.pipeline_mode<synchronous>, transform_indices = @transform_1, window_bounds = array<i64: 2, 72, 16>}, {pipeline_mode = #tpu.pipeline_mode<synchronous>, transform_indices = @transform_2, window_bounds = array<i64: 1, 16>}, {transform_indices = @transform_3, window_bounds = array<i64: 16, 2, 16, 16>}]} {
    %cst = arith.constant 0.000000e+00 : f32
    %0 = vector.broadcast %cst : f32 to vector<18x18x8xf32>
    %c0 = arith.constant 0 : index
    %c0_0 = arith.constant 0 : index
    %c0_1 = arith.constant 0 : index
    %1 = vector.load %arg5[%c0, %c0_0, %c0_1] : memref<18x18x8xf32, #tpu.memory_space<vmem>>, vector<18x18x8xf32>
    tpu.vector_store %arg5[%c0, %c0_0, %c0_1], %0 {strides = array<i32>} : memref<18x18x8xf32, #tpu.memory_space<vmem>>, vector<18x18x8xf32>,
    %c0_2 = arith.constant 0 : index
    %c0_3 = arith.constant 0 : index
    %c0_4 = arith.constant 0 : index
    %2 = vector.load %arg1[%c0_2, %c0_3, %c0_4] : memref<16x16x8xf32, #tpu.memory_space<vmem>>, vector<16x16x8xf32>
    %c1 = arith.constant 1 : index
    %c1_5 = arith.constant 1 : index
    %c0_6 = arith.constant 0 : index
    %3 = vector.load %arg5[%c1, %c1_5, %c0_6] : memref<18x18x8xf32, #tpu.memory_space<vmem>>, vector<16x16x8xf32>
    tpu.vector_store %arg5[%c1, %c1_5, %c0_6], %2 {strides = array<i32>} : memref<18x18x8xf32, #tpu.memory_space<vmem>>, vector<16x16x8xf32>,
    %c0_7 = arith.constant 0 : index
    %c0_8 = arith.constant 0 : index
    %c0_9 = arith.constant 0 : index
    %4 = vector.load %arg5[%c0_7, %c0_8, %c0_9] : memref<18x18x8xf32, #tpu.memory_space<vmem>>, vector<16x16x8xf32>
    %c0_10 = arith.constant 0 : index
    %c0_11 = arith.constant 0 : index
    %c0_12 = arith.constant 0 : index
    %5 = vector.load %arg6[%c0_10, %c0_11, %c0_12] : memref<16x16x72xf32, #tpu.memory_space<vmem>>, vector<16x16x8xf32>
    tpu.vector_store %arg6[%c0_10, %c0_11, %c0_12], %4 {strides = array<i32>} : memref<16x16x72xf32, #tpu.memory_space<vmem>>, vector<16x16x8xf32>,
    %c0_13 = arith.constant 0 : index
    %c1_14 = arith.constant 1 : index
    %c0_15 = arith.constant 0 : index
    %6 = vector.load %arg5[%c0_13, %c1_14, %c0_15] : memref<18x18x8xf32, #tpu.memory_space<vmem>>, vector<16x16x8xf32>
    %c0_16 = arith.constant 0 : index
    %c0_17 = arith.constant 0 : index
    %c8 = arith.constant 8 : index
    %7 = vector.load %arg6[%c0_16, %c0_17, %c8] : memref<16x16x72xf32, #tpu.memory_space<vmem>>, vector<16x16x8xf32>
    tpu.vector_store %arg6[%c0_16, %c0_17, %c8], %6 {strides = array<i32>} : memref<16x16x72xf32, #tpu.memory_space<vmem>>, vector<16x16x8xf32>,
    %c0_18 = arith.constant 0 : index
    %c2 = arith.constant 2 : index
    %c0_19 = arith.constant 0 : index
    %8 = vector.load %arg5[%c0_18, %c2, %c0_19] : memref<18x18x8xf32, #tpu.memory_space<vmem>>, vector<16x16x8xf32>
    %c0_20 = arith.constant 0 : index
    %c0_21 = arith.constant 0 : index
    %c16 = arith.constant 16 : index
    %9 = vector.load %arg6[%c0_20, %c0_21, %c16] : memref<16x16x72xf32, #tpu.memory_space<vmem>>, vector<16x16x8xf32>
    tpu.vector_store %arg6[%c0_20, %c0_21, %c16], %8 {strides = array<i32>} : memref<16x16x72xf32, #tpu.memory_space<vmem>>, vector<16x16x8xf32>,
    %c1_22 = arith.constant 1 : index
    %c0_23 = arith.constant 0 : index
    %c0_24 = arith.constant 0 : index
    %10 = vector.load %arg5[%c1_22, %c0_23, %c0_24] : memref<18x18x8xf32, #tpu.memory_space<vmem>>, vector<16x16x8xf32>
    %c0_25 = arith.constant 0 : index
    %c0_26 = arith.constant 0 : index
    %c24 = arith.constant 24 : index
    %11 = vector.load %arg6[%c0_25, %c0_26, %c24] : memref<16x16x72xf32, #tpu.memory_space<vmem>>, vector<16x16x8xf32>
    tpu.vector_store %arg6[%c0_25, %c0_26, %c24], %10 {strides = array<i32>} : memref<16x16x72xf32, #tpu.memory_space<vmem>>, vector<16x16x8xf32>,
    %c1_27 = arith.constant 1 : index
    %c1_28 = arith.constant 1 : index
    %c0_29 = arith.constant 0 : index
    %12 = vector.load %arg5[%c1_27, %c1_28, %c0_29] : memref<18x18x8xf32, #tpu.memory_space<vmem>>, vector<16x16x8xf32>
    %c0_30 = arith.constant 0 : index
    %c0_31 = arith.constant 0 : index
    %c32 = arith.constant 32 : index
    %13 = vector.load %arg6[%c0_30, %c0_31, %c32] : memref<16x16x72xf32, #tpu.memory_space<vmem>>, vector<16x16x8xf32>
    tpu.vector_store %arg6[%c0_30, %c0_31, %c32], %12 {strides = array<i32>} : memref<16x16x72xf32, #tpu.memory_space<vmem>>, vector<16x16x8xf32>,
    %c1_32 = arith.constant 1 : index
    %c2_33 = arith.constant 2 : index
    %c0_34 = arith.constant 0 : index
    %14 = vector.load %arg5[%c1_32, %c2_33, %c0_34] : memref<18x18x8xf32, #tpu.memory_space<vmem>>, vector<16x16x8xf32>
    %c0_35 = arith.constant 0 : index
    %c0_36 = arith.constant 0 : index
    %c40 = arith.constant 40 : index
    %15 = vector.load %arg6[%c0_35, %c0_36, %c40] : memref<16x16x72xf32, #tpu.memory_space<vmem>>, vector<16x16x8xf32>
    tpu.vector_store %arg6[%c0_35, %c0_36, %c40], %14 {strides = array<i32>} : memref<16x16x72xf32, #tpu.memory_space<vmem>>, vector<16x16x8xf32>,
    %c2_37 = arith.constant 2 : index
    %c0_38 = arith.constant 0 : index
    %c0_39 = arith.constant 0 : index
    %16 = vector.load %arg5[%c2_37, %c0_38, %c0_39] : memref<18x18x8xf32, #tpu.memory_space<vmem>>, vector<16x16x8xf32>
    %c0_40 = arith.constant 0 : index
    %c0_41 = arith.constant 0 : index
    %c48 = arith.constant 48 : index
    %17 = vector.load %arg6[%c0_40, %c0_41, %c48] : memref<16x16x72xf32, #tpu.memory_space<vmem>>, vector<16x16x8xf32>
    tpu.vector_store %arg6[%c0_40, %c0_41, %c48], %16 {strides = array<i32>} : memref<16x16x72xf32, #tpu.memory_space<vmem>>, vector<16x16x8xf32>,
    %c2_42 = arith.constant 2 : index
    %c1_43 = arith.constant 1 : index
    %c0_44 = arith.constant 0 : index
    %18 = vector.load %arg5[%c2_42, %c1_43, %c0_44] : memref<18x18x8xf32, #tpu.memory_space<vmem>>, vector<16x16x8xf32>
    %c0_45 = arith.constant 0 : index
    %c0_46 = arith.constant 0 : index
    %c56 = arith.constant 56 : index
    %19 = vector.load %arg6[%c0_45, %c0_46, %c56] : memref<16x16x72xf32, #tpu.memory_space<vmem>>, vector<16x16x8xf32>
    tpu.vector_store %arg6[%c0_45, %c0_46, %c56], %18 {strides = array<i32>} : memref<16x16x72xf32, #tpu.memory_space<vmem>>, vector<16x16x8xf32>,
    %c2_47 = arith.constant 2 : index
    %c2_48 = arith.constant 2 : index
    %c0_49 = arith.constant 0 : index
    %20 = vector.load %arg5[%c2_47, %c2_48, %c0_49] : memref<18x18x8xf32, #tpu.memory_space<vmem>>, vector<16x16x8xf32>
    %c0_50 = arith.constant 0 : index
    %c0_51 = arith.constant 0 : index
    %c64 = arith.constant 64 : index
    %21 = vector.load %arg6[%c0_50, %c0_51, %c64] : memref<16x16x72xf32, #tpu.memory_space<vmem>>, vector<16x16x8xf32>
    tpu.vector_store %arg6[%c0_50, %c0_51, %c64], %20 {strides = array<i32>} : memref<16x16x72xf32, #tpu.memory_space<vmem>>, vector<16x16x8xf32>,
    %c0_52 = arith.constant 0 : index
    %c0_53 = arith.constant 0 : index
    %c0_54 = arith.constant 0 : index
    %22 = vector.load %arg6[%c0_52, %c0_53, %c0_54] : memref<16x16x72xf32, #tpu.memory_space<vmem>>, vector<16x16x72xf32>
    %23 = vector.shape_cast %22 : vector<16x16x72xf32> to vector<256x72xf32>
    %c0_55 = arith.constant 0 : index
    %c0_56 = arith.constant 0 : index
    %24 = vector.load %arg3[%c0_55, %c0_56] : memref<1x16xf32, #tpu.memory_space<vmem>>, vector<1x16xf32>
    %c0_57 = arith.constant 0 : index
    %c0_58 = arith.constant 0 : index
    %c0_59 = arith.constant 0 : index
    %25 = vector.load %arg2[%c0_57, %c0_58, %c0_59] : memref<2x72x16xf32, #tpu.memory_space<vmem>>, vector<1x72x16xf32>
    %26 = vector.shape_cast %25 : vector<1x72x16xf32> to vector<72x16xf32>
    %cst_60 = arith.constant dense<0.000000e+00> : vector<256x16xf32>
    %27 = tpu.matmul %23, %26, %cst_60 {dimension_numbers = #tpu.dot_dimension_numbers<[1], [0], [0], [1], [0, 0, 1, 1], [], []>} : vector<256x72xf32>, vector<72x16xf32>, vector<256x16xf32> -> vector<256x16xf32>
    %28 = vector.broadcast %24 : vector<1x16xf32> to vector<256x16xf32>
    %29 = arith.addf %27, %28 : vector<256x16xf32>
    %cst_61 = arith.constant 0.000000e+00 : f32
    %30 = vector.broadcast %cst_61 : f32 to vector<256x16xf32>
    %31 = arith.cmpf oge, %29, %30 : vector<256x16xf32>
    %cst_62 = arith.constant 2.000000e-01 : f32
    %32 = vector.broadcast %cst_62 : f32 to vector<256x16xf32>
    %33 = arith.mulf %32, %29 : vector<256x16xf32>
    %34 = arith.select %31, %29, %33 : vector<256x16xi1>, vector<256x16xf32>
    %35 = vector.shape_cast %34 : vector<256x16xf32> to vector<16x16x16xf32>
    %c0_63 = arith.constant 0 : index
    %c0_64 = arith.constant 0 : index
    %c0_65 = arith.constant 0 : index
    %c0_66 = arith.constant 0 : index
    %36 = vector.load %arg4[%c0_63, %c0_64, %c0_65, %c0_66] : memref<16x2x16x16xf32, #tpu.memory_space<vmem>>, vector<16x1x16x16xf32>
    %37 = vector.shape_cast %36 : vector<16x1x16x16xf32> to vector<16x16x16xf32>
    %38 = vector.shape_cast %35 : vector<16x16x16xf32> to vector<16x1x16x16xf32>
    tpu.vector_store %arg4[%c0_63, %c0_64, %c0_65, %c0_66], %38 {strides = array<i32>} : memref<16x2x16x16xf32, #tpu.memory_space<vmem>>, vector<16x1x16x16xf32>,
    %c1_67 = arith.constant 1 : index
    %c0_68 = arith.constant 0 : index
    %c0_69 = arith.constant 0 : index
    %39 = vector.load %arg2[%c1_67, %c0_68, %c0_69] : memref<2x72x16xf32, #tpu.memory_space<vmem>>, vector<1x72x16xf32>
    %40 = vector.shape_cast %39 : vector<1x72x16xf32> to vector<72x16xf32>
    %cst_70 = arith.constant dense<0.000000e+00> : vector<256x16xf32>
    %41 = tpu.matmul %23, %40, %cst_70 {dimension_numbers = #tpu.dot_dimension_numbers<[1], [0], [0], [1], [0, 0, 1, 1], [], []>} : vector<256x72xf32>, vector<72x16xf32>, vector<256x16xf32> -> vector<256x16xf32>
    %42 = vector.broadcast %24 : vector<1x16xf32> to vector<256x16xf32>
    %43 = arith.addf %41, %42 : vector<256x16xf32>
    %cst_71 = arith.constant 0.000000e+00 : f32
    %44 = vector.broadcast %cst_71 : f32 to vector<256x16xf32>
    %45 = arith.cmpf oge, %43, %44 : vector<256x16xf32>
    %cst_72 = arith.constant 2.000000e-01 : f32
    %46 = vector.broadcast %cst_72 : f32 to vector<256x16xf32>
    %47 = arith.mulf %46, %43 : vector<256x16xf32>
    %48 = arith.select %45, %43, %47 : vector<256x16xi1>, vector<256x16xf32>
    %49 = vector.shape_cast %48 : vector<256x16xf32> to vector<16x16x16xf32>
    %c0_73 = arith.constant 0 : index
    %c1_74 = arith.constant 1 : index
    %c0_75 = arith.constant 0 : index
    %c0_76 = arith.constant 0 : index
    %50 = vector.load %arg4[%c0_73, %c1_74, %c0_75, %c0_76] : memref<16x2x16x16xf32, #tpu.memory_space<vmem>>, vector<16x1x16x16xf32>
    %51 = vector.shape_cast %50 : vector<16x1x16x16xf32> to vector<16x16x16xf32>
    %52 = vector.shape_cast %49 : vector<16x16x16xf32> to vector<16x1x16x16xf32>
    tpu.vector_store %arg4[%c0_73, %c1_74, %c0_75, %c0_76], %52 {strides = array<i32>} : memref<16x2x16x16xf32, #tpu.memory_space<vmem>>, vector<16x1x16x16xf32>,
    return
  }
  func.func @transform_0(%arg0: i32) -> (i32, i32, i32) {
    %c0_i32 = arith.constant 0 : i32
    %c0_i32_0 = arith.constant 0 : i32
    %c0_i32_1 = arith.constant 0 : i32
    return %arg0, %c0_i32, %c0_i32_0 : i32, i32, i32
  }
  func.func @transform_1(%arg0: i32) -> (i32, i32, i32) {
    %c0_i32 = arith.constant 0 : i32
    %c0_i32_0 = arith.constant 0 : i32
    %c0_i32_1 = arith.constant 0 : i32
    %c0_i32_2 = arith.constant 0 : i32
    return %c0_i32, %c0_i32_0, %c0_i32_1 : i32, i32, i32
  }
  func.func @transform_2(%arg0: i32) -> (i32, i32) {
    %c0_i32 = arith.constant 0 : i32
    %c0_i32_0 = arith.constant 0 : i32
    %c0_i32_1 = arith.constant 0 : i32
    return %c0_i32, %c0_i32_0 : i32, i32
  }
  func.func @transform_3(%arg0: i32) -> (i32, i32, i32, i32) {
    %c0_i32 = arith.constant 0 : i32
    %c0_i32_0 = arith.constant 0 : i32
    %c0_i32_1 = arith.constant 0 : i32
    %c0_i32_2 = arith.constant 0 : i32
    return %arg0, %c0_i32, %c0_i32_0, %c0_i32_1 : i32, i32, i32, i32
  }
}

</mosaic_0001>

<bundles_post_ra>
// kernel: tile.8
= control target key start
LH: loop header
LB: loop body
LE: loop exit
PB: predicated region body
PF: predicated region fallthrough
CT: control target
= control target key end

     0   :  { %s22_s0 = inlined_call_operand.vmem [shape: f32[8], index: 0, kind: input, shape index: {}]   ;;  %s23_s1 = inlined_call_operand.vmem [shape: f32[2,8], index: 1, kind: output, shape index: {}]  }
   0x1   :  { %v4_v0 = vld [vmem:[%s22_s0] ss:$0 sm:$0xff] }
   0x2   :  { %5 = vst [vmem:[%s23_s1] sm:$0x3] %v4_v0 }

// kernel: tile.9
= control target key start
LH: loop header
LB: loop body
LE: loop exit
PB: predicated region body
PF: predicated region fallthrough
CT: control target
= control target key end

     0   :  { %vm7_vm0 = vcmask 64512   ;;  %vm13_vm1 = vcmask 130112   ;;  %s39_s0 = inlined_call_operand.vmem [shape: f32[2,8], index: 0, kind: input, shape index: {}]   ;;  %s40_s1 = inlined_call_operand.vmem [shape: f32[1,16], index: 1, kind: output, shape index: {}]  }
   0x1   :  { %v4_v0 = vld [vmem:[%s39_s0] sm:$0x3]  ;;  %s22_s0 = smov 8  }
   0x2   :  { %5 = vst [vmem:[#allocation1] sm:$0x3] %v4_v0 }
   0x9   :  { %v10_v1 = vld [vmem:[#allocation1 + $0x1] sm:$0x1]   ;;  %v6_v2 = vld [vmem:[#allocation1] sm:$0x1]  }
   0xa   :  { %11 = vrot.lane.b32.xlu0 %v10_v1, %s22_s0  ;;  %8 = vst.msk [vmem:[#allocation0] sm:$0x1] %vm7_vm0, %v6_v2  }
  0x7c   :  { %v12_v3 = vpop.permute.xlu0 %11  }
  0x7d   :  { %14 = vst.msk [vmem:[#allocation0] sm:$0x1] %vm13_vm1, %v12_v3  }
  0x84   :  { %v17_v4 = vld [vmem:[#allocation0] sm:$0x1] }
  0x85   :  { %20 = vst [vmem:[%s40_s1] sm:$0x1] %v17_v4 }

// kernel: upsample_a_forward.1
= control target key start
LH: loop header
LB: loop body
LE: loop exit
PB: predicated region body
PF: predicated region fallthrough
CT: control target
= control target key end

     0   :  { %s2797_s12 = smov 0   ;;  %s4210_s0 = inlined_call_operand.vmem [shape: f32[32,16,8], index: 0, kind: input, shape index: {}]   ;;  %s4211_s1 = inlined_call_operand.vmem [shape: f32[2,72,16], index: 1, kind: input, shape index: {}]   ;;  %s4212_s2 = inlined_call_operand.vmem [shape: f32[1,16], index: 2, kind: input, shape index: {}]   ;;  %s4213_s3 = inlined_call_operand.vmem [shape: f32[32,2,16,16], index: 3, kind: output, shape index: {}]  }
   0x1 LB: > { %s2603_s13 = sadd.s32 4294967295, %s2766_s12   ;;  %p2607_p0 = scmp.ge.s32.totalorder %s2766_s12, 1  ;;  %s2766_s12 = sphi %s2797_s12, %s13_s12  }
   0x2   : > { %p139_p1 = scmp.lt.s32.totalorder %s2766_s12, 3 }
   0x4   : > { %p140_p2 = pnand %p2607_p0, %p139_p1 }
   0x6   : > { %143 = sbr.rel (%p140_p2) target bundleno = 1000 (0x3e8), region = 32 }
   0xb   : > { %vm179_vm0 = vcmask 64512   ;;  %v2768_v0 = vmov 0.0   ;;  %s2769_s14 = smov 8   ;;  %s2608_s15 = sshll.u32 %s2603_s13, 4  ;;  %vm182_vm1 = vcmask 58368   ;;  %vm524_vm2 = vcmask 130112  }
   0xc   : > { %180 = vst.msk [vmem:[#allocation2] sm:$0xff] %vm179_vm0, %v2768_v0  ;;  %p166_p3 = scmp.lt.s32.totalorder %s2608_s15, 31  ;;  %s2770_s20 = smov 16   ;;  %vm717_vm3 = vcmask 195712   ;;  %vm910_vm4 = vcmask 261312   ;;  %vm1103_vm5 = vcmask 326912  }
   0xd   : > { %181 = vst.msk [vmem:[#allocation2 + $0x8] sm:$0xff] %vm179_vm0, %v2768_v0  ;;  %s2771_s21 = smov 24   ;;  %s2772_s22 = smov 32   ;;  %vm1296_vm6 = vcmask 392512   ;;  %vm1490_vm7 = vcmask 458112   ;;  %vm1683_vm8 = vcmask 523712  }
   0xe   : > { %184 = vst.msk [vmem:[#allocation2 + $0x18] sm:$0xff] %vm179_vm0, %v2768_v0  ;;  %s4299_s15 = smov (!%p166_p3, %s2608_s15), 31  ;;  %s2773_s23 = smov 40   ;;  %vm1876_vm9 = vcmask 589312   ;;  %vm1954_vm10 = vcmask 588800   ;;  %vm2260_vm11 = vcmask 130048  }
   0xf   : > { %185 = vst.msk [vmem:[#allocation2 + $0x20] sm:$0xff] %vm179_vm0, %v2768_v0  ;;  %s2721_s16 = sshll.u32 %s4299_s15, 4  ;;  %s2774_s24 = smov 48  }
  0x10   : > { %187 = vst.msk [vmem:[#allocation2 + $0x30] sm:$0xff] %vm179_vm0, %v2768_v0  ;;  %s2874_s19 = scalar_lea.vmem %s4210_s0, %s2721_s16  ;;  %s2775_s25 = smov 64  }
  0x11   : > { %188 = vst.msk [vmem:[#allocation2 + $0x38] sm:$0xff] %vm179_vm0, %v2768_v0  ;;  %v235_v2 = vld [vmem:[%s2874_s19] sm:$0xff]  ;;  %v236_v5 = vld [vmem:[%s2874_s19 + $0x8] sm:$0xff]  ;;  %v242_v8 = vld [vmem:[%s2874_s19 + $0x38] sm:$0xff]  ;;  %s2776_s26 = smov 56   ;;  %s2722_s18 = sshll.u32 %s4299_s15, 5 }
  0x12   : > { %190 = vst.msk [vmem:[#allocation2 + $0x48] sm:$0xff] %vm179_vm0, %v2768_v0  ;;  %v239_v6 = vld [vmem:[%s2874_s19 + $0x20] sm:$0xff]  ;;  %v240_v7 = vld [vmem:[%s2874_s19 + $0x28] sm:$0xff]  ;;  %v237_v9 = vld [vmem:[%s2874_s19 + $0x10] sm:$0xff] }
  0x13   : > { %191 = vst.msk [vmem:[#allocation2 + $0x50] sm:$0xff] %vm179_vm0, %v2768_v0  ;;  %v243_v10 = vld [vmem:[%s2874_s19 + $0x40] sm:$0xff]  ;;  %v245_v11 = vld [vmem:[%s2874_s19 + $0x50] sm:$0xff]  ;;  %v238_v12 = vld [vmem:[%s2874_s19 + $0x18] sm:$0xff] }
  0x14   : > { %v364_v1 = vld [vmem:[#allocation2 + $0x1] sm:$0xff]  ;;  %193 = vst.msk [vmem:[#allocation2 + $0x60] sm:$0xff] %vm179_vm0, %v2768_v0  ;;  %v246_v13 = vld [vmem:[%s2874_s19 + $0x58] sm:$0xff]  ;;  %v241_v16 = vld [vmem:[%s2874_s19 + $0x30] sm:$0xff] }
  0x15   : > { %428 = vrot.lane.b32.xlu0 %v364_v1, %s2769_s14  ;;  %194 = vst.msk [vmem:[#allocation2 + $0x68] sm:$0xff] %vm179_vm0, %v2768_v0  ;;  %v248_v14 = vld [vmem:[%s2874_s19 + $0x68] sm:$0xff]  ;;  %v249_v18 = vld [vmem:[%s2874_s19 + $0x70] sm:$0xff]  ;;  %v251_v19 = vld [vmem:[%s2874_s19 + $0x80] sm:$0xff] }
  0x16   : > { %196 = vst.msk [vmem:[#allocation2 + $0x78] sm:$0xff] %vm179_vm0, %v2768_v0  ;;  %v244_v20 = vld [vmem:[%s2874_s19 + $0x48] sm:$0xff]  ;;  %v254_v23 = vld [vmem:[%s2874_s19 + $0x98] sm:$0xff]  ;;  %v247_v26 = vld [vmem:[%s2874_s19 + $0x60] sm:$0xff] }
  0x17   : > { %197 = vst.msk [vmem:[#allocation2 + $0x80] sm:$0xff] %vm179_vm0, %v2768_v0  ;;  %v252_v22 = vld [vmem:[%s2874_s19 + $0x88] sm:$0xff]  ;;  %v255_v27 = vld [vmem:[%s2874_s19 + $0xa0] sm:$0xff]  ;;  %v257_v28 = vld [vmem:[%s2874_s19 + $0xb0] sm:$0xff] }
  0x18   : > { %199 = vst.msk [vmem:[#allocation2 + $0x90] sm:$0xff] %vm179_vm0, %v2768_v0  ;;  %v250_v32 = vld [vmem:[%s2874_s19 + $0x78] sm:$0xff]  ;;  %v260_v34 = vld [vmem:[%s2874_s19 + $0xc8] sm:$0xff]  ;;  %v253_v38 = vld [vmem:[%s2874_s19 + $0x90] sm:$0xff] }
  0x19   : > { %200 = vst.msk [vmem:[#allocation2 + $0x98] sm:$0xff] %vm179_vm0, %v2768_v0  ;;  %v258_v33 = vld [vmem:[%s2874_s19 + $0xb8] sm:$0xff]  ;;  %v261_v39 = vld [vmem:[%s2874_s19 + $0xd0] sm:$0xff]  ;;  %v263_v40 = vld [vmem:[%s2874_s19 + $0xe0] sm:$0xff] }
  0x1a   : > { %202 = vst.msk [vmem:[#allocation2 + $0xa8] sm:$0xff] %vm179_vm0, %v2768_v0  ;;  %v256_v44 = vld [vmem:[%s2874_s19 + $0xa8] sm:$0xff]  ;;  %v259_v49 = vld [vmem:[%s2874_s19 + $0xc0] sm:$0xff]  ;;  %v262_v53 = vld [vmem:[%s2874_s19 + $0xd8] sm:$0xff] }
  0x1b   : > { %203 = vst.msk [vmem:[#allocation2 + $0xb0] sm:$0xff] %vm179_vm0, %v2768_v0  ;;  %v264_v45 = vld [vmem:[%s2874_s19 + $0xe8] sm:$0xff]  ;;  %v300_v62 = vld [vmem:[#allocation2] sm:$0xff] }
  0x1c   : > { %205 = vst.msk [vmem:[#allocation2 + $0xc0] sm:$0xff] %vm179_vm0, %v2768_v0 }
  0x1d   : > { %206 = vst.msk [vmem:[#allocation2 + $0xc8] sm:$0xff] %vm179_vm0, %v2768_v0 }
  0x1e   : > { %208 = vst.msk [vmem:[#allocation2 + $0xd8] sm:$0xff] %vm179_vm0, %v2768_v0 }
  0x1f   : > { %209 = vst.msk [vmem:[#allocation2 + $0xe0] sm:$0xff] %vm179_vm0, %v2768_v0 }
  0x20   : > { %211 = vst.msk [vmem:[#allocation2 + $0xf0] sm:$0xff] %vm179_vm0, %v2768_v0 }
  0x21   : > { %212 = vst.msk [vmem:[#allocation2 + $0xf8] sm:$0xff] %vm179_vm0, %v2768_v0 }
  0x22   : > { %214 = vst.msk [vmem:[#allocation2 + $0x108] sm:$0xff] %vm179_vm0, %v2768_v0 }
  0x23   : > { %215 = vst.msk [vmem:[#allocation2 + $0x110] sm:$0xff] %vm179_vm0, %v2768_v0 }
  0x24   : > { %217 = vst.msk [vmem:[#allocation2 + $0x120] sm:$0xff] %vm179_vm0, %v2768_v0 }
  0x25   : > { %218 = vst.msk [vmem:[#allocation2 + $0x128] sm:$0xff] %vm179_vm0, %v2768_v0 }
  0x26   : > { %220 = vst.msk [vmem:[#allocation2 + $0x138] sm:$0xff] %vm179_vm0, %v2768_v0 }
  0x27   : > { %221 = vst.msk [vmem:[#allocation2 + $0x140] sm:$0xff] %vm179_vm0, %v2768_v0 }
  0x28   : > { %223 = vst.msk [vmem:[#allocation2 + $0x150] sm:$0xff] %vm179_vm0, %v2768_v0 }
  0x29   : > { %224 = vst.msk [vmem:[#allocation2 + $0x158] sm:$0xff] %vm179_vm0, %v2768_v0 }
  0x2a   : > { %226 = vst.msk [vmem:[#allocation2 + $0x168] sm:$0xff] %vm179_vm0, %v2768_v0 }
  0x2b   : > { %227 = vst.msk [vmem:[#allocation2 + $0x170] sm:$0xff] %vm179_vm0, %v2768_v0 }
  0x2c   : > { %229 = vst.msk [vmem:[#allocation2 + $0x180] sm:$0xff] %vm179_vm0, %v2768_v0 }
  0x2d   : > { %230 = vst.msk [vmem:[#allocation2 + $0x188] sm:$0xff] %vm179_vm0, %v2768_v0 }
  0x2e   : > { %232 = vst.msk [vmem:[#allocation2 + $0x198] sm:$0xff] %vm179_vm0, %v2768_v0 }
  0x2f   : > { %233 = vst.msk [vmem:[#allocation2 + $0x1a0] sm:$0xff] %vm179_vm0, %v2768_v0 }
  0x30   : > { %268 = vst.msk [vmem:[#allocation2 + $0x19] sm:$0xff] %vm179_vm0, %v235_v2 }
  0x31   : > { %183 = vst.msk [vmem:[#allocation2 + $0x10] sm:$0x3] %vm182_vm1, %v2768_v0 }
  0x32   : > { %186 = vst.msk [vmem:[#allocation2 + $0x28] sm:$0x3] %vm182_vm1, %v2768_v0 }
  0x33   : > { %189 = vst.msk [vmem:[#allocation2 + $0x40] sm:$0x3] %vm182_vm1, %v2768_v0 }
  0x34   : > { %192 = vst.msk [vmem:[#allocation2 + $0x58] sm:$0x3] %vm182_vm1, %v2768_v0 }
  0x35   : > { %195 = vst.msk [vmem:[#allocation2 + $0x70] sm:$0x3] %vm182_vm1, %v2768_v0 }
  0x36   : > { %198 = vst.msk [vmem:[#allocation2 + $0x88] sm:$0x3] %vm182_vm1, %v2768_v0 }
  0x37   : > { %v2900_v3 = vld [vmem:[#allocation2 + $0x19] sm:$0xff]  ;;  %201 = vst.msk [vmem:[#allocation2 + $0xa0] sm:$0x3] %vm182_vm1, %v2768_v0 }
  0x38   : > { %432 = vrot.lane.b32.xlu1 %v2900_v3, %s2769_s14  ;;  %v365_v4 = vld [vmem:[#allocation2 + $0x9] sm:$0xff]  ;;  %204 = vst.msk [vmem:[#allocation2 + $0xb8] sm:$0x3] %vm182_vm1, %v2768_v0 }
  0x39   : > { %430 = vrot.lane.b32.xlu0 %v365_v4, %s2769_s14  ;;  %207 = vst.msk [vmem:[#allocation2 + $0xd0] sm:$0x3] %vm182_vm1, %v2768_v0  ;;  %v3106_v4 = vld [vmem:[#allocation2 + $0x18] sm:$0xff] }
  0x3a   : > { %210 = vst.msk [vmem:[#allocation2 + $0xe8] sm:$0x3] %vm182_vm1, %v2768_v0 }
  0x3b   : > { %213 = vst.msk [vmem:[#allocation2 + $0x100] sm:$0x3] %vm182_vm1, %v2768_v0 }
  0x3c   : > { %216 = vst.msk [vmem:[#allocation2 + $0x118] sm:$0x3] %vm182_vm1, %v2768_v0 }
  0x3d   : > { %219 = vst.msk [vmem:[#allocation2 + $0x130] sm:$0x3] %vm182_vm1, %v2768_v0 }
  0x3e   : > { %222 = vst.msk [vmem:[#allocation2 + $0x148] sm:$0x3] %vm182_vm1, %v2768_v0 }
  0x3f   : > { %225 = vst.msk [vmem:[#allocation2 + $0x160] sm:$0x3] %vm182_vm1, %v2768_v0 }
  0x40   : > { %228 = vst.msk [vmem:[#allocation2 + $0x178] sm:$0x3] %vm182_vm1, %v2768_v0 }
  0x41   : > { %231 = vst.msk [vmem:[#allocation2 + $0x190] sm:$0x3] %vm182_vm1, %v2768_v0 }
  0x42   : > { %234 = vst.msk [vmem:[#allocation2 + $0x1a8] sm:$0x3] %vm182_vm1, %v2768_v0  ;;  %v558_v0 = vld [vmem:[#allocation2 + $0xa] sm:$0xff] }
  0x43   : > { %269 = vst.msk [vmem:[#allocation2 + $0x21] sm:$0xff] %vm179_vm0, %v236_v5  ;;  %v301_v5 = vld [vmem:[#allocation2 + $0x8] sm:$0xff] }
  0x44   : > { %272 = vst.msk [vmem:[#allocation2 + $0x49] sm:$0xff] %vm179_vm0, %v239_v6 }
  0x45   : > { %273 = vst.msk [vmem:[#allocation2 + $0x51] sm:$0xff] %vm179_vm0, %v240_v7 }
  0x46   : > { %275 = vst.msk [vmem:[#allocation2 + $0x69] sm:$0xff] %vm179_vm0, %v242_v8  ;;  %v557_v8 = vld [vmem:[#allocation2 + $0x2] sm:$0xff] }
  0x47   : > { %270 = vst.msk [vmem:[#allocation2 + $0x31] sm:$0xff] %vm179_vm0, %v237_v9 }
  0x48   : > { %276 = vst.msk [vmem:[#allocation2 + $0x79] sm:$0xff] %vm179_vm0, %v243_v10 }
  0x49   : > { %278 = vst.msk [vmem:[#allocation2 + $0x91] sm:$0xff] %vm179_vm0, %v245_v11 }
  0x4a   : > { %v2946_v15 = vld [vmem:[#allocation2 + $0x21] sm:$0xff]  ;;  %271 = vst.msk [vmem:[#allocation2 + $0x39] sm:$0xff] %vm179_vm0, %v238_v12 }
  0x4b   : > { %434 = vrot.lane.b32.xlu1 %v2946_v15, %s2769_s14  ;;  %v2952_v17 = vld [vmem:[#allocation2 + $0x49] sm:$0xff]  ;;  %279 = vst.msk [vmem:[#allocation2 + $0x99] sm:$0xff] %vm179_vm0, %v246_v13  ;;  %v3115_v6 = vld [vmem:[#allocation2 + $0x1a] sm:$0xff] }
  0x4c   : > { %440 = vrot.lane.b32.xlu0 %v2952_v17, %s2769_s14  ;;  %281 = vst.msk [vmem:[#allocation2 + $0xb1] sm:$0xff] %vm179_vm0, %v248_v14  ;;  %v2970_v24 = vld [vmem:[#allocation2 + $0x51] sm:$0xff]  ;;  %v3125_v10 = vld [vmem:[#allocation2 + $0x20] sm:$0xff]  ;;  %v3131_v11 = vld [vmem:[#allocation2 + $0x48] sm:$0xff] }
  0x4d   : > { %274 = vst.msk [vmem:[#allocation2 + $0x61] sm:$0xff] %vm179_vm0, %v241_v16  ;;  %v2973_v25 = vld [vmem:[#allocation2 + $0x69] sm:$0xff]  ;;  %v3138_v13 = vld [vmem:[#allocation2 + $0x52] sm:$0xff] }
  0x4e   : > { %v2962_v21 = vld [vmem:[#allocation2 + $0x31] sm:$0xff]  ;;  %282 = vst.msk [vmem:[#allocation2 + $0xc1] sm:$0xff] %vm179_vm0, %v249_v18  ;;  %v3144_v14 = vld [vmem:[#allocation2 + $0x22] sm:$0xff] }
  0x4f   : > { %436 = vrot.lane.b32.xlu2 %v2962_v21, %s2769_s14  ;;  %284 = vst.msk [vmem:[#allocation2 + $0xd9] sm:$0xff] %vm179_vm0, %v251_v19  ;;  %v2991_v30 = vld [vmem:[#allocation2 + $0x79] sm:$0xff]  ;;  %v3104_v2 = vld [vmem:[#allocation2 + $0x30] sm:$0xff] }
  0x50   : > { %277 = vst.msk [vmem:[#allocation2 + $0x81] sm:$0xff] %vm179_vm0, %v244_v20  ;;  %v2993_v31 = vld [vmem:[#allocation2 + $0x91] sm:$0xff] }
  0x51   : > { %285 = vst.msk [vmem:[#allocation2 + $0xe1] sm:$0xff] %vm179_vm0, %v252_v22  ;;  %v2985_v29 = vld [vmem:[#allocation2 + $0x39] sm:$0xff]  ;;  %v3148_v18 = vld [vmem:[#allocation2 + $0x50] sm:$0xff] }
  0x52   : > { %287 = vst.msk [vmem:[#allocation2 + $0xf9] sm:$0xff] %vm179_vm0, %v254_v23  ;;  %v3009_v36 = vld [vmem:[#allocation2 + $0x99] sm:$0xff] }
  0x53   : > { %442 = vrot.lane.b32.xlu1 %v2970_v24, %s2769_s14  ;;  %280 = vst.msk [vmem:[#allocation2 + $0xa9] sm:$0xff] %vm179_vm0, %v247_v26  ;;  %v3011_v37 = vld [vmem:[#allocation2 + $0xb1] sm:$0xff]  ;;  %v3136_v12 = vld [vmem:[#allocation2 + $0x3a] sm:$0xff] }
  0x54   : > { %446 = vrot.lane.b32.xlu0 %v2973_v25, %s2769_s14  ;;  %288 = vst.msk [vmem:[#allocation2 + $0x109] sm:$0xff] %vm179_vm0, %v255_v27  ;;  %v3004_v35 = vld [vmem:[#allocation2 + $0x61] sm:$0xff]  ;;  %v3117_v7 = vld [vmem:[#allocation2 + $0x32] sm:$0xff] }
  0x55   : > { %290 = vst.msk [vmem:[#allocation2 + $0x121] sm:$0xff] %vm179_vm0, %v257_v28  ;;  %v3027_v42 = vld [vmem:[#allocation2 + $0xc1] sm:$0xff]  ;;  %v3123_v9 = vld [vmem:[#allocation2 + $0x38] sm:$0xff]  ;;  %v3171_v28 = vld [vmem:[#allocation2 + $0x4a] sm:$0xff] }
  0x56   : > { %283 = vst.msk [vmem:[#allocation2 + $0xc9] sm:$0xff] %vm179_vm0, %v250_v32  ;;  %v3029_v43 = vld [vmem:[#allocation2 + $0xd9] sm:$0xff]  ;;  %v3154_v19 = vld [vmem:[#allocation2 + $0x68] sm:$0xff] }
  0x57   : > { %438 = vrot.lane.b32.xlu2 %v2985_v29, %s2769_s14  ;;  %291 = vst.msk [vmem:[#allocation2 + $0x129] sm:$0xff] %vm179_vm0, %v258_v33  ;;  %v3022_v41 = vld [vmem:[#allocation2 + $0x81] sm:$0xff]  ;;  %v3175_v33 = vld [vmem:[#allocation2 + $0x78] sm:$0xff] }
  0x58   : > { %293 = vst.msk [vmem:[#allocation2 + $0x141] sm:$0xff] %vm179_vm0, %v260_v34  ;;  %v3043_v47 = vld [vmem:[#allocation2 + $0xe1] sm:$0xff]  ;;  %v3181_v34 = vld [vmem:[#allocation2 + $0x90] sm:$0xff] }
  0x59   : > { %286 = vst.msk [vmem:[#allocation2 + $0xf1] sm:$0xff] %vm179_vm0, %v253_v38  ;;  %v3045_v48 = vld [vmem:[#allocation2 + $0xf9] sm:$0xff]  ;;  %v3160_v20 = vld [vmem:[#allocation2 + $0x62] sm:$0xff] }
  0x5a   : > { %294 = vst.msk [vmem:[#allocation2 + $0x151] sm:$0xff] %vm179_vm0, %v261_v39  ;;  %v3039_v46 = vld [vmem:[#allocation2 + $0xa9] sm:$0xff]  ;;  %v3146_v16 = vld [vmem:[#allocation2 + $0x60] sm:$0xff] }
  0x5b   : > { %448 = vrot.lane.b32.xlu1 %v2991_v30, %s2769_s14  ;;  %296 = vst.msk [vmem:[#allocation2 + $0x169] sm:$0xff] %vm179_vm0, %v263_v40  ;;  %v3057_v51 = vld [vmem:[#allocation2 + $0x109] sm:$0xff]  ;;  %v3162_v22 = vld [vmem:[#allocation2 + $0x7a] sm:$0xff] }
  0x5c   : > { %452 = vrot.lane.b32.xlu0 %v2993_v31, %s2769_s14  ;;  %289 = vst.msk [vmem:[#allocation2 + $0x111] sm:$0xff] %vm179_vm0, %v256_v44  ;;  %v3059_v52 = vld [vmem:[#allocation2 + $0x121] sm:$0xff]  ;;  %v3196_v44 = vld [vmem:[#allocation2 + $0x6a] sm:$0xff] }
  0x5d   : > { %297 = vst.msk [vmem:[#allocation2 + $0x171] sm:$0xff] %vm179_vm0, %v264_v45  ;;  %v3053_v50 = vld [vmem:[#allocation2 + $0xc9] sm:$0xff]  ;;  %v3173_v32 = vld [vmem:[#allocation2 + $0x80] sm:$0xff] }
  0x5e   : > { %292 = vst.msk [vmem:[#allocation2 + $0x139] sm:$0xff] %vm179_vm0, %v259_v49  ;;  %v3071_v55 = vld [vmem:[#allocation2 + $0x129] sm:$0xff]  ;;  %v3189_v39 = vld [vmem:[#allocation2 + $0x9a] sm:$0xff] }
  0x5f   : > { %444 = vrot.lane.b32.xlu2 %v3004_v35, %s2769_s14  ;;  %295 = vst.msk [vmem:[#allocation2 + $0x159] sm:$0xff] %vm179_vm0, %v262_v53  ;;  %v3073_v56 = vld [vmem:[#allocation2 + $0x141] sm:$0xff]  ;;  %v3200_v49 = vld [vmem:[#allocation2 + $0x98] sm:$0xff]  ;;  %v3206_v53 = vld [vmem:[#allocation2 + $0xb0] sm:$0xff] }
  0x60   : > { %v3067_v54 = vld [vmem:[#allocation2 + $0xf1] sm:$0xff]  ;;  %332 = vst.msk [vmem:[#allocation3] sm:$0xff] %vm179_vm0, %v300_v62  ;;  %v3187_v38 = vld [vmem:[#allocation2 + $0x82] sm:$0xff] }
  0x61   : > { %v3083_v58 = vld [vmem:[#allocation2 + $0x151] sm:$0xff]  ;;  %336 = vst.msk [vmem:[#allocation3 + $0x20] sm:$0xff] %vm179_vm0, %v3104_v2  ;;  %v3198_v45 = vld [vmem:[#allocation2 + $0xa8] sm:$0xff] }
  0x62   : > { %4244 = vst [vmem:[#allocation4_spill] sm:$0xff] %v3083_v58  ;;  %v3085_v59 = vld [vmem:[#allocation2 + $0x169] sm:$0xff] }
  0x63   : > { %454 = vrot.lane.b32.xlu1 %v3009_v36, %s2769_s14  ;;  %v3079_v57 = vld [vmem:[#allocation2 + $0x111] sm:$0xff]  ;;  %334 = vst.msk [vmem:[#allocation3 + $0x10] sm:$0xff] %vm179_vm0, %v3106_v4  ;;  %v3214_v62 = vld [vmem:[#allocation2 + $0xc2] sm:$0xff] }
  0x64   : > { %458 = vrot.lane.b32.xlu0 %v3011_v37, %s2769_s14  ;;  %v3097_v63 = vld [vmem:[#allocation2 + $0x171] sm:$0xff]  ;;  %333 = vst.msk [vmem:[#allocation3 + $0x8] sm:$0xff] %vm179_vm0, %v301_v5 }
  0x65   : > { %v3091_v60 = vld [vmem:[#allocation2 + $0x139] sm:$0xff]  ;;  %4245 = vst [vmem:[#allocation5_spill] sm:$0xff] %v3097_v63 }
  0x66   : > { %v3101_v1 = vld [vmem:[#allocation2 + $0x159] sm:$0xff]  ;;  %4246 = vst [vmem:[#allocation6_spill] sm:$0xff] %v3115_v6 }
  0x67   : > { %450 = vrot.lane.b32.xlu2 %v3022_v41, %s2769_s14  ;;  %4247 = vst [vmem:[#allocation7_spill] sm:$0xff] %v3117_v7  ;;  %v3221_v5 = vld [vmem:[#allocation2 + $0x92] sm:$0xff] }
  0x68   : > { %337 = vst.msk [vmem:[#allocation3 + $0x28] sm:$0xff] %vm179_vm0, %v3123_v9 }
  0x69   : > { %335 = vst.msk [vmem:[#allocation3 + $0x18] sm:$0xff] %vm179_vm0, %v3125_v10 }
  0x6a   : > { %338 = vst.msk [vmem:[#allocation3 + $0x30] sm:$0xff] %vm179_vm0, %v3131_v11 }
  0x6b   : > { %460 = vrot.lane.b32.xlu1 %v3027_v42, %s2769_s14  ;;  %4248 = vst [vmem:[#allocation8_spill] sm:$0xff] %v3136_v12 }
  0x6c   : > { %464 = vrot.lane.b32.xlu0 %v3029_v43, %s2769_s14  ;;  %4249 = vst [vmem:[#allocation9_spill] sm:$0xff] %v3138_v13 }
  0x6d   : > { %4250 = vst [vmem:[#allocation10_spill] sm:$0xff] %v3144_v14 }
  0x6e   : > { %340 = vst.msk [vmem:[#allocation3 + $0x40] sm:$0xff] %vm179_vm0, %v3146_v16 }
  0x6f   : > { %456 = vrot.lane.b32.xlu2 %v3039_v46, %s2769_s14  ;;  %339 = vst.msk [vmem:[#allocation3 + $0x38] sm:$0xff] %vm179_vm0, %v3148_v18 }
  0x70   : > { %341 = vst.msk [vmem:[#allocation3 + $0x48] sm:$0xff] %vm179_vm0, %v3154_v19 }
  0x71   : > { %4251 = vst [vmem:[#allocation11_spill] sm:$0xff] %v3160_v20 }
  0x72   : > { %4252 = vst [vmem:[#allocation12_spill] sm:$0xff] %v3162_v22 }
  0x73   : > { %466 = vrot.lane.b32.xlu1 %v3043_v47, %s2769_s14  ;;  %4253 = vst [vmem:[#allocation13_spill] sm:$0xff] %v3171_v28 }
  0x74   : > { %470 = vrot.lane.b32.xlu0 %v3045_v48, %s2769_s14  ;;  %343 = vst.msk [vmem:[#allocation3 + $0x58] sm:$0xff] %vm179_vm0, %v3173_v32 }
  0x75   : > { %342 = vst.msk [vmem:[#allocation3 + $0x50] sm:$0xff] %vm179_vm0, %v3175_v33 }
  0x76   : > { %344 = vst.msk [vmem:[#allocation3 + $0x60] sm:$0xff] %vm179_vm0, %v3181_v34 }
  0x77   : > { %462 = vrot.lane.b32.xlu2 %v3053_v50, %s2769_s14  ;;  %4254 = vst [vmem:[#allocation14_spill] sm:$0xff] %v3187_v38 }
  0x78   : > { %4255 = vst [vmem:[#allocation15_spill] sm:$0xff] %v3189_v39 }
  0x79   : > { %4256 = vst [vmem:[#allocation16_spill] sm:$0xff] %v3196_v44 }
  0x7a   : > { %346 = vst.msk [vmem:[#allocation3 + $0x70] sm:$0xff] %vm179_vm0, %v3198_v45 }
  0x7b   : > { %472 = vrot.lane.b32.xlu1 %v3057_v51, %s2769_s14  ;;  %345 = vst.msk [vmem:[#allocation3 + $0x68] sm:$0xff] %vm179_vm0, %v3200_v49 }
  0x7c   : > { %476 = vrot.lane.b32.xlu0 %v3059_v52, %s2769_s14  ;;  %347 = vst.msk [vmem:[#allocation3 + $0x78] sm:$0xff] %vm179_vm0, %v3206_v53 }
  0x7d   : > { %4258 = vst [vmem:[#allocation18_spill] sm:$0xff] %v3214_v62 }
  0x7e   : > { %4259 = vst [vmem:[#allocation19_spill] sm:$0xff] %v3221_v5 }
  0x7f   : > { %468 = vrot.lane.b32.xlu2 %v3067_v54, %s2769_s14 }
  0x83   : > { %478 = vrot.lane.b32.xlu1 %v3071_v55, %s2769_s14 }
  0x84   : > { %482 = vrot.lane.b32.xlu0 %v3073_v56, %s2769_s14 }
  0x87   : > { %474 = vrot.lane.b32.xlu2 %v3079_v57, %s2769_s14  ;;  %v429_v61 = vpop.permute.xlu0 %428 }
  0x88   : > { %525 = vst.msk [vmem:[#allocation3] sm:$0xff] %vm524_vm2, %v429_v61  ;;  %v3212_v61 = vld [vmem:[#allocation2 + $0xaa] sm:$0xff] }
  0x89   : > { %4257 = vst [vmem:[#allocation17_spill] sm:$0xff] %v3212_v61 }
  0x8b   : > { %484 = vrot.lane.b32.xlu1 %v3083_v58, %s2769_s14 }
  0x8c   : > { %488 = vrot.lane.b32.xlu0 %v3085_v59, %s2769_s14 }
  0x8f   : > { %480 = vrot.lane.b32.xlu2 %v3091_v60, %s2769_s14 }
  0x93   : > { %490 = vrot.lane.b32.xlu1 %v3097_v63, %s2769_s14 }
  0x94   : > { %623 = vrot.lane.b32.xlu0 %v558_v0, %s2770_s20 }
  0x97   : > { %486 = vrot.lane.b32.xlu2 %v3101_v1, %s2769_s14 }
  0x9b   : > { %625 = vrot.lane.b32.xlu1 %v3115_v6, %s2770_s20 }
  0x9c   : > { %629 = vrot.lane.b32.xlu0 %v3117_v7, %s2770_s20  ;;  %v3332_v7 = vld [vmem:[#allocation2 + $0x150] sm:$0xff] }
  0x9d   : > { %360 = vst.msk [vmem:[#allocation3 + $0xe0] sm:$0xff] %vm179_vm0, %v3332_v7 }
  0x9f   : > { %621 = vrot.lane.b32.xlu2 %v557_v8, %s2770_s20  ;;  %v3223_v8 = vld [vmem:[#allocation2 + $0xc8] sm:$0xff] }
  0xa0   : > { %349 = vst.msk [vmem:[#allocation3 + $0x88] sm:$0xff] %vm179_vm0, %v3223_v8 }
  0xa3   : > { %631 = vrot.lane.b32.xlu1 %v3136_v12, %s2770_s20 }
  0xa4   : > { %635 = vrot.lane.b32.xlu0 %v3138_v13, %s2770_s20  ;;  %v3308_v13 = vld [vmem:[#allocation2 + $0x128] sm:$0xff] }
  0xa5   : > { %357 = vst.msk [vmem:[#allocation3 + $0xc8] sm:$0xff] %vm179_vm0, %v3308_v13 }
  0xa7   : > { %627 = vrot.lane.b32.xlu2 %v3144_v14, %s2770_s20  ;;  %v3335_v14 = vld [vmem:[#allocation2 + $0x168] sm:$0xff] }
  0xa8   : > { %362 = vst.msk [vmem:[#allocation3 + $0xf0] sm:$0xff] %vm179_vm0, %v3335_v14 }
  0xa9   : > { %v437_v23 = vpop.permute.xlu2 %436 }
  0xaa   : > { %529 = vst.msk [vmem:[#allocation3 + $0x20] sm:$0xff] %vm524_vm2, %v437_v23  ;;  %v433_v26 = vpop.permute.xlu1 %432 }
  0xab   : > { %637 = vrot.lane.b32.xlu1 %v3160_v20, %s2770_s20  ;;  %527 = vst.msk [vmem:[#allocation3 + $0x10] sm:$0xff] %vm524_vm2, %v433_v26  ;;  %v431_v27 = vpop.permute.xlu0 %430  ;;  %v3227_v26 = vld [vmem:[#allocation2 + $0xc0] sm:$0xff] }
  0xac   : > { %641 = vrot.lane.b32.xlu0 %v3162_v22, %s2770_s20  ;;  %526 = vst.msk [vmem:[#allocation3 + $0x8] sm:$0xff] %vm524_vm2, %v431_v27  ;;  %v3281_v22 = vld [vmem:[#allocation2 + $0x108] sm:$0xff] }
  0xad   : > { %348 = vst.msk [vmem:[#allocation3 + $0x80] sm:$0xff] %vm179_vm0, %v3227_v26 }
  0xae   : > { %354 = vst.msk [vmem:[#allocation3 + $0xb0] sm:$0xff] %vm179_vm0, %v3281_v22 }
  0xaf   : > { %633 = vrot.lane.b32.xlu2 %v3171_v28, %s2770_s20 }
  0xb1   : > { %v439_v40 = vpop.permute.xlu2 %438 }
  0xb2   : > { %530 = vst.msk [vmem:[#allocation3 + $0x28] sm:$0xff] %vm524_vm2, %v439_v40  ;;  %v3230_v40 = vld [vmem:[#allocation2 + $0xd8] sm:$0xff] }
  0xb3   : > { %643 = vrot.lane.b32.xlu1 %v3187_v38, %s2770_s20  ;;  %350 = vst.msk [vmem:[#allocation3 + $0x90] sm:$0xff] %vm179_vm0, %v3230_v40 }
  0xb4   : > { %647 = vrot.lane.b32.xlu0 %v3189_v39, %s2770_s20  ;;  %v3254_v39 = vld [vmem:[#allocation2 + $0xe0] sm:$0xff] }
  0xb5   : > { %351 = vst.msk [vmem:[#allocation3 + $0x98] sm:$0xff] %vm179_vm0, %v3254_v39 }
  0xb7   : > { %639 = vrot.lane.b32.xlu2 %v3196_v44, %s2770_s20 }
  0xb9   : > { %v445_v0 = vpop.permute.xlu2 %444 }
  0xba   : > { %533 = vst.msk [vmem:[#allocation3 + $0x40] sm:$0xff] %vm524_vm2, %v445_v0  ;;  %v3235_v0 = vld [vmem:[#allocation2 + $0xca] sm:$0xff] }
  0xbb   : > { %649 = vrot.lane.b32.xlu1 %v3212_v61, %s2770_s20  ;;  %4260 = vst [vmem:[#allocation20_spill] sm:$0xff] %v3235_v0  ;;  %v3239_v61 = vld [vmem:[#allocation2 + $0xe2] sm:$0xff] }
  0xbc   : > { %653 = vrot.lane.b32.xlu0 %v3214_v62, %s2770_s20  ;;  %4261 = vst [vmem:[#allocation21_spill] sm:$0xff] %v3239_v61 }
  0xbd   : > { %v435_v23 = vpop.permute.xlu1 %434 }
  0xbe   : > { %528 = vst.msk [vmem:[#allocation3 + $0x18] sm:$0xff] %vm524_vm2, %v435_v23  ;;  %v441_v27 = vpop.permute.xlu0 %440  ;;  %v3248_v23 = vld [vmem:[#allocation2 + $0xb2] sm:$0xff] }
  0xbf   : > { %531 = vst.msk [vmem:[#allocation3 + $0x30] sm:$0xff] %vm524_vm2, %v441_v27  ;;  %645 = vrot.lane.b32.xlu2 %v3221_v5, %s2770_s20  ;;  %v3250_v27 = vld [vmem:[#allocation2 + $0xf0] sm:$0xff] }
  0xc0   : > { %4262 = vst [vmem:[#allocation22_spill] sm:$0xff] %v3248_v23 }
  0xc1   : > { %v451_v62 = vpop.permute.xlu2 %450  ;;  %352 = vst.msk [vmem:[#allocation3 + $0xa0] sm:$0xff] %vm179_vm0, %v3250_v27 }
  0xc2   : > { %536 = vst.msk [vmem:[#allocation3 + $0x58] sm:$0xff] %vm524_vm2, %v451_v62  ;;  %v3257_v62 = vld [vmem:[#allocation2 + $0xf8] sm:$0xff] }
  0xc3   : > { %655 = vrot.lane.b32.xlu1 %v3235_v0, %s2770_s20  ;;  %v3262_v0 = vld [vmem:[#allocation2 + $0xf2] sm:$0xff]  ;;  %353 = vst.msk [vmem:[#allocation3 + $0xa8] sm:$0xff] %vm179_vm0, %v3257_v62 }
  0xc4   : > { %659 = vrot.lane.b32.xlu0 %v3239_v61, %s2770_s20  ;;  %4263 = vst [vmem:[#allocation23_spill] sm:$0xff] %v3262_v0  ;;  %v3266_v61 = vld [vmem:[#allocation2 + $0x10a] sm:$0xff] }
  0xc5   : > { %v443_v38 = vpop.permute.xlu1 %442  ;;  %4264 = vst [vmem:[#allocation24_spill] sm:$0xff] %v3266_v61 }
  0xc6   : > { %532 = vst.msk [vmem:[#allocation3 + $0x38] sm:$0xff] %vm524_vm2, %v443_v38  ;;  %v447_v20 = vpop.permute.xlu0 %446  ;;  %v3277_v38 = vld [vmem:[#allocation2 + $0x110] sm:$0xff] }
  0xc7   : > { %534 = vst.msk [vmem:[#allocation3 + $0x48] sm:$0xff] %vm524_vm2, %v447_v20  ;;  %651 = vrot.lane.b32.xlu2 %v3248_v23, %s2770_s20  ;;  %v3275_v20 = vld [vmem:[#allocation2 + $0xda] sm:$0xff] }
  0xc8   : > { %4265 = vst [vmem:[#allocation25_spill] sm:$0xff] %v3275_v20 }
  0xc9   : > { %v457_v5 = vpop.permute.xlu2 %456  ;;  %355 = vst.msk [vmem:[#allocation3 + $0xb8] sm:$0xff] %vm179_vm0, %v3277_v38 }
  0xca   : > { %539 = vst.msk [vmem:[#allocation3 + $0x70] sm:$0xff] %vm524_vm2, %v457_v5  ;;  %v3284_v5 = vld [vmem:[#allocation2 + $0x120] sm:$0xff] }
  0xcb   : > { %661 = vrot.lane.b32.xlu1 %v3262_v0, %s2770_s20  ;;  %v3289_v0 = vld [vmem:[#allocation2 + $0x112] sm:$0xff]  ;;  %356 = vst.msk [vmem:[#allocation3 + $0xc0] sm:$0xff] %vm179_vm0, %v3284_v5 }
  0xcc   : > { %665 = vrot.lane.b32.xlu0 %v3266_v61, %s2770_s20  ;;  %4266 = vst [vmem:[#allocation26_spill] sm:$0xff] %v3289_v0  ;;  %v3293_v61 = vld [vmem:[#allocation2 + $0x12a] sm:$0xff] }
  0xcd   : > { %v449_v23 = vpop.permute.xlu1 %448  ;;  %4267 = vst [vmem:[#allocation27_spill] sm:$0xff] %v3293_v61 }
  0xce   : > { %535 = vst.msk [vmem:[#allocation3 + $0x50] sm:$0xff] %vm524_vm2, %v449_v23  ;;  %v453_v12 = vpop.permute.xlu0 %452  ;;  %v3304_v23 = vld [vmem:[#allocation2 + $0x138] sm:$0xff] }
  0xcf   : > { %537 = vst.msk [vmem:[#allocation3 + $0x60] sm:$0xff] %vm524_vm2, %v453_v12  ;;  %657 = vrot.lane.b32.xlu2 %v3275_v20, %s2770_s20  ;;  %v3302_v12 = vld [vmem:[#allocation2 + $0xfa] sm:$0xff] }
  0xd0   : > { %4268 = vst [vmem:[#allocation28_spill] sm:$0xff] %v3302_v12 }
  0xd1   : > { %v463_v44 = vpop.permute.xlu2 %462  ;;  %358 = vst.msk [vmem:[#allocation3 + $0xd0] sm:$0xff] %vm179_vm0, %v3304_v23 }
  0xd2   : > { %542 = vst.msk [vmem:[#allocation3 + $0x88] sm:$0xff] %vm524_vm2, %v463_v44  ;;  %v3311_v44 = vld [vmem:[#allocation2 + $0x140] sm:$0xff] }
  0xd3   : > { %667 = vrot.lane.b32.xlu1 %v3289_v0, %s2770_s20  ;;  %v3316_v0 = vld [vmem:[#allocation2 + $0x13a] sm:$0xff]  ;;  %359 = vst.msk [vmem:[#allocation3 + $0xd8] sm:$0xff] %vm179_vm0, %v3311_v44 }
  0xd4   : > { %671 = vrot.lane.b32.xlu0 %v3293_v61, %s2770_s20  ;;  %4269 = vst [vmem:[#allocation29_spill] sm:$0xff] %v3316_v0  ;;  %v585_v61 = vld [vmem:[#allocation2 + $0x152] sm:$0xff] }
  0xd5   : > { %v455_v20 = vpop.permute.xlu1 %454 }
  0xd6   : > { %538 = vst.msk [vmem:[#allocation3 + $0x68] sm:$0xff] %vm524_vm2, %v455_v20  ;;  %v459_v6 = vpop.permute.xlu0 %458  ;;  %v3328_v20 = vld [vmem:[#allocation2 + $0x158] sm:$0xff] }
  0xd7   : > { %540 = vst.msk [vmem:[#allocation3 + $0x78] sm:$0xff] %vm524_vm2, %v459_v6  ;;  %663 = vrot.lane.b32.xlu2 %v3302_v12, %s2770_s20  ;;  %v3326_v6 = vld [vmem:[#allocation2 + $0x122] sm:$0xff] }
  0xd8   : > { %4270 = vst [vmem:[#allocation30_spill] sm:$0xff] %v3326_v6 }
  0xd9   : > { %v469_v28 = vpop.permute.xlu2 %468  ;;  %361 = vst.msk [vmem:[#allocation3 + $0xe8] sm:$0xff] %vm179_vm0, %v3328_v20 }
  0xda   : > { %545 = vst.msk [vmem:[#allocation3 + $0xa0] sm:$0xff] %vm524_vm2, %v469_v28  ;;  %v586_v28 = vld [vmem:[#allocation2 + $0x15a] sm:$0xff] }
  0xdb   : > { %673 = vrot.lane.b32.xlu1 %v3316_v0, %s2770_s20 }
  0xdc   : > { %677 = vrot.lane.b32.xlu0 %v585_v61, %s2770_s20  ;;  %v588_v61 = vld [vmem:[#allocation2 + $0x172] sm:$0xff] }
  0xdd   : > { %v461_v12 = vpop.permute.xlu1 %460 }
  0xde   : > { %541 = vst.msk [vmem:[#allocation3 + $0x80] sm:$0xff] %vm524_vm2, %v461_v12  ;;  %v465_v63 = vpop.permute.xlu0 %464  ;;  %v3347_v12 = vld [vmem:[#allocation2 + $0x142] sm:$0xff] }
  0xdf   : > { %543 = vst.msk [vmem:[#allocation3 + $0x90] sm:$0xff] %vm524_vm2, %v465_v63  ;;  %669 = vrot.lane.b32.xlu2 %v3326_v6, %s2770_s20  ;;  %v3349_v63 = vld [vmem:[#allocation2 + $0x170] sm:$0xff] }
  0xe0   : > { %363 = vst.msk [vmem:[#allocation3 + $0xf8] sm:$0xff] %vm179_vm0, %v3349_v63 }
  0xe1   : > { %v475_v0 = vpop.permute.xlu2 %474 }
  0xe2   : > { %548 = vst.msk [vmem:[#allocation3 + $0xb8] sm:$0xff] %vm524_vm2, %v475_v0 }
  0xe3   : > { %679 = vrot.lane.b32.xlu1 %v586_v28, %s2770_s20  ;;  %v587_v28 = vld [vmem:[#allocation2 + $0x16a] sm:$0xff] }
  0xe4   : > { %683 = vrot.lane.b32.xlu0 %v588_v61, %s2770_s20 }
  0xe5   : > { %v467_v6 = vpop.permute.xlu1 %466 }
  0xe6   : > { %544 = vst.msk [vmem:[#allocation3 + $0x98] sm:$0xff] %vm524_vm2, %v467_v6  ;;  %v471_v58 = vpop.permute.xlu0 %470 }
  0xe7   : > { %546 = vst.msk [vmem:[#allocation3 + $0xa8] sm:$0xff] %vm524_vm2, %v471_v58  ;;  %675 = vrot.lane.b32.xlu2 %v3347_v12, %s2770_s20 }
  0xe9   : > { %v481_v0 = vpop.permute.xlu2 %480 }
  0xea   : > { %551 = vst.msk [vmem:[#allocation3 + $0xd0] sm:$0xff] %vm524_vm2, %v481_v0 }
  0xeb   : > { %814 = vrot.lane.b32.xlu1 %v3106_v4, %s2771_s21 }
  0xec   : > { %818 = vrot.lane.b32.xlu0 %v3104_v2, %s2771_s21 }
  0xed   : > { %v473_v61 = vpop.permute.xlu1 %472 }
  0xee   : > { %547 = vst.msk [vmem:[#allocation3 + $0xb0] sm:$0xff] %vm524_vm2, %v473_v61  ;;  %v477_v6 = vpop.permute.xlu0 %476 }
  0xef   : > { %549 = vst.msk [vmem:[#allocation3 + $0xc0] sm:$0xff] %vm524_vm2, %v477_v6  ;;  %681 = vrot.lane.b32.xlu2 %v587_v28, %s2770_s20 }
  0xf1   : > { %v487_v58 = vpop.permute.xlu2 %486 }
  0xf2   : > { %554 = vst.msk [vmem:[#allocation3 + $0xe8] sm:$0xff] %vm524_vm2, %v487_v58 }
  0xf3   : > { %820 = vrot.lane.b32.xlu1 %v3123_v9, %s2771_s21 }
  0xf4   : > { %824 = vrot.lane.b32.xlu0 %v3148_v18, %s2771_s21 }
  0xf5   : > { %v479_v4 = vpop.permute.xlu1 %478 }
  0xf6   : > { %550 = vst.msk [vmem:[#allocation3 + $0xc8] sm:$0xff] %vm524_vm2, %v479_v4  ;;  %v483_v2 = vpop.permute.xlu0 %482 }
  0xf7   : > { %552 = vst.msk [vmem:[#allocation3 + $0xd8] sm:$0xff] %vm524_vm2, %v483_v2  ;;  %816 = vrot.lane.b32.xlu2 %v3125_v10, %s2771_s21 }
  0xf9   : > { %v622_v0 = vpop.permute.xlu2 %621 }
  0xfa   : > { %718 = vst.msk [vmem:[#allocation3] sm:$0xff] %vm717_vm3, %v622_v0 }
  0xfb   : > { %826 = vrot.lane.b32.xlu1 %v3146_v16, %s2771_s21 }
  0xfc   : > { %830 = vrot.lane.b32.xlu0 %v3175_v33, %s2771_s21 }
  0xfd   : > { %v485_v9 = vpop.permute.xlu1 %484 }
  0xfe   : > { %553 = vst.msk [vmem:[#allocation3 + $0xe0] sm:$0xff] %vm524_vm2, %v485_v9  ;;  %v489_v18 = vpop.permute.xlu0 %488 }
  0xff   : > { %555 = vst.msk [vmem:[#allocation3 + $0xf0] sm:$0xff] %vm524_vm2, %v489_v18  ;;  %822 = vrot.lane.b32.xlu2 %v3131_v11, %s2771_s21 }
 0x101   : > { %v628_v10 = vpop.permute.xlu2 %627 }
 0x102   : > { %721 = vst.msk [vmem:[#allocation3 + $0x18] sm:$0xff] %vm717_vm3, %v628_v10 }
 0x103   : > { %832 = vrot.lane.b32.xlu1 %v3173_v32, %s2771_s21 }
 0x104   : > { %836 = vrot.lane.b32.xlu0 %v3200_v49, %s2771_s21 }
 0x105   : > { %v491_v16 = vpop.permute.xlu1 %490 }
 0x106   : > { %556 = vst.msk [vmem:[#allocation3 + $0xf8] sm:$0xff] %vm524_vm2, %v491_v16  ;;  %v624_v33 = vpop.permute.xlu0 %623 }
 0x107   : > { %719 = vst.msk [vmem:[#allocation3 + $0x8] sm:$0xff] %vm717_vm3, %v624_v33  ;;  %828 = vrot.lane.b32.xlu2 %v3154_v19, %s2771_s21  ;;  %v265_v19 = vld [vmem:[%s2874_s19 + $0xf0] sm:$0xff] }
 0x108   : > { %298 = vst.msk [vmem:[#allocation2 + $0x181] sm:$0xff] %vm179_vm0, %v265_v19 }
 0x109   : > { %v634_v11 = vpop.permute.xlu2 %633 }
 0x10a   : > { %724 = vst.msk [vmem:[#allocation3 + $0x30] sm:$0xff] %vm717_vm3, %v634_v11 }
 0x10b   : > { %838 = vrot.lane.b32.xlu1 %v3198_v45, %s2771_s21 }
 0x10c   : > { %842 = vrot.lane.b32.xlu0 %v3227_v26, %s2771_s21 }
 0x10d   : > { %v626_v32 = vpop.permute.xlu1 %625 }
 0x10e   : > { %720 = vst.msk [vmem:[#allocation3 + $0x10] sm:$0xff] %vm717_vm3, %v626_v32  ;;  %v630_v49 = vpop.permute.xlu0 %629 }
 0x10f   : > { %722 = vst.msk [vmem:[#allocation3 + $0x20] sm:$0xff] %vm717_vm3, %v630_v49  ;;  %834 = vrot.lane.b32.xlu2 %v3181_v34, %s2771_s21  ;;  %v780_v18 = vld [vmem:[#allocation2 + $0x180] sm:$0xff]  ;;  %v4271_v49 = vld [vmem:[#allocation4_spill] sm:$0xff] }
 0x111   : > { %v640_v28 = vpop.permute.xlu2 %639 }
 0x112   : > { %727 = vst.msk [vmem:[#allocation3 + $0x48] sm:$0xff] %vm717_vm3, %v640_v28 }
 0x113   : > { %844 = vrot.lane.b32.xlu1 %v3223_v8, %s2771_s21 }
 0x114   : > { %848 = vrot.lane.b32.xlu0 %v3254_v39, %s2771_s21 }
 0x115   : > { %v632_v45 = vpop.permute.xlu1 %631 }
 0x116   : > { %723 = vst.msk [vmem:[#allocation3 + $0x28] sm:$0xff] %vm717_vm3, %v632_v45  ;;  %v636_v26 = vpop.permute.xlu0 %635 }
 0x117   : > { %725 = vst.msk [vmem:[#allocation3 + $0x38] sm:$0xff] %vm717_vm3, %v636_v26  ;;  %840 = vrot.lane.b32.xlu2 %v3206_v53, %s2771_s21  ;;  %v4273_v26 = vld [vmem:[#allocation5_spill] sm:$0xff] }
 0x119   : > { %v646_v34 = vpop.permute.xlu2 %645 }
 0x11a   : > { %730 = vst.msk [vmem:[#allocation3 + $0x60] sm:$0xff] %vm717_vm3, %v646_v34 }
 0x11b   : > { %850 = vrot.lane.b32.xlu1 %v3250_v27, %s2771_s21 }
 0x11c   : > { %854 = vrot.lane.b32.xlu0 %v3281_v22, %s2771_s21 }
 0x11d   : > { %v638_v39 = vpop.permute.xlu1 %637 }
 0x11e   : > { %726 = vst.msk [vmem:[#allocation3 + $0x40] sm:$0xff] %vm717_vm3, %v638_v39  ;;  %v642_v8 = vpop.permute.xlu0 %641  ;;  %v4274_v39 = vld [vmem:[#allocation7_spill] sm:$0xff] }
 0x11f   : > { %728 = vst.msk [vmem:[#allocation3 + $0x50] sm:$0xff] %vm717_vm3, %v642_v8  ;;  %846 = vrot.lane.b32.xlu2 %v3230_v40, %s2771_s21  ;;  %v266_v40 = vld [vmem:[%s2874_s19 + $0xf8] sm:$0xff] }
 0x120   : > { %299 = vst.msk [vmem:[#allocation2 + $0x189] sm:$0xff] %vm179_vm0, %v266_v40  ;;  %v4275_v8 = vld [vmem:[#allocation13_spill] sm:$0xff] }
 0x121   : > { %v652_v53 = vpop.permute.xlu2 %651  ;;  %v4277_v40 = vld [vmem:[#allocation9_spill] sm:$0xff] }
 0x122   : > { %733 = vst.msk [vmem:[#allocation3 + $0x78] sm:$0xff] %vm717_vm3, %v652_v53 }
 0x123   : > { %856 = vrot.lane.b32.xlu1 %v3277_v38, %s2771_s21 }
 0x124   : > { %860 = vrot.lane.b32.xlu0 %v3308_v13, %s2771_s21 }
 0x125   : > { %v644_v61 = vpop.permute.xlu1 %643 }
 0x126   : > { %729 = vst.msk [vmem:[#allocation3 + $0x58] sm:$0xff] %vm717_vm3, %v644_v61  ;;  %v648_v6 = vpop.permute.xlu0 %647 }
 0x127   : > { %731 = vst.msk [vmem:[#allocation3 + $0x68] sm:$0xff] %vm717_vm3, %v648_v6  ;;  %852 = vrot.lane.b32.xlu2 %v3257_v62, %s2771_s21  ;;  %v781_v16 = vld [vmem:[#allocation2 + $0x188] sm:$0xff]  ;;  %v4276_v6 = vld [vmem:[#allocation6_spill] sm:$0xff] }
 0x128   : > { %v974_v28 = vld [vmem:[#allocation2 + $0x189] sm:$0xff] }
 0x129   : > { %v658_v58 = vpop.permute.xlu2 %657 }
 0x12a   : > { %736 = vst.msk [vmem:[#allocation3 + $0x90] sm:$0xff] %vm717_vm3, %v658_v58 }
 0x12b   : > { %862 = vrot.lane.b32.xlu1 %v3304_v23, %s2771_s21 }
 0x12c   : > { %866 = vrot.lane.b32.xlu0 %v3332_v7, %s2771_s21 }
 0x12d   : > { %v650_v4 = vpop.permute.xlu1 %649 }
 0x12e   : > { %732 = vst.msk [vmem:[#allocation3 + $0x70] sm:$0xff] %vm717_vm3, %v650_v4  ;;  %v654_v2 = vpop.permute.xlu0 %653  ;;  %v4278_v4 = vld [vmem:[#allocation16_spill] sm:$0xff] }
 0x12f   : > { %734 = vst.msk [vmem:[#allocation3 + $0x80] sm:$0xff] %vm717_vm3, %v654_v2  ;;  %858 = vrot.lane.b32.xlu2 %v3284_v5, %s2771_s21 }
 0x131   : > { %v664_v0 = vpop.permute.xlu2 %663 }
 0x132   : > { %739 = vst.msk [vmem:[#allocation3 + $0xa8] sm:$0xff] %vm717_vm3, %v664_v0 }
 0x133   : > { %868 = vrot.lane.b32.xlu1 %v3328_v20, %s2771_s21 }
 0x134   : > { %872 = vrot.lane.b32.xlu0 %v3349_v63, %s2771_s21 }
 0x135   : > { %v656_v9 = vpop.permute.xlu1 %655 }
 0x136   : > { %735 = vst.msk [vmem:[#allocation3 + $0x88] sm:$0xff] %vm717_vm3, %v656_v9  ;;  %v660_v7 = vpop.permute.xlu0 %659  ;;  %v4279_v9 = vld [vmem:[#allocation8_spill] sm:$0xff] }
 0x137   : > { %737 = vst.msk [vmem:[#allocation3 + $0x98] sm:$0xff] %vm717_vm3, %v660_v7  ;;  %864 = vrot.lane.b32.xlu2 %v3311_v44, %s2771_s21 }
 0x139   : > { %v670_v10 = vpop.permute.xlu2 %669 }
 0x13a   : > { %742 = vst.msk [vmem:[#allocation3 + $0xc0] sm:$0xff] %vm717_vm3, %v670_v10  ;;  %v4281_v10 = vld [vmem:[#allocation19_spill] sm:$0xff] }
 0x13b   : > { %874 = vrot.lane.b32.xlu1 %v780_v18, %s2771_s21  ;;  %v4280_v18 = vld [vmem:[#allocation12_spill] sm:$0xff] }
 0x13c   : > { %1007 = vrot.lane.b32.xlu0 %v2900_v3, %s2772_s22 }
 0x13d   : > { %v662_v20 = vpop.permute.xlu1 %661 }
 0x13e   : > { %738 = vst.msk [vmem:[#allocation3 + $0xa0] sm:$0xff] %vm717_vm3, %v662_v20  ;;  %v666_v63 = vpop.permute.xlu0 %665 }
 0x13f   : > { %740 = vst.msk [vmem:[#allocation3 + $0xb0] sm:$0xff] %vm717_vm3, %v666_v63  ;;  %870 = vrot.lane.b32.xlu2 %v3335_v14, %s2771_s21 }
 0x141   : > { %v676_v44 = vpop.permute.xlu2 %675 }
 0x142   : > { %745 = vst.msk [vmem:[#allocation3 + $0xd8] sm:$0xff] %vm717_vm3, %v676_v44  ;;  %v4282_v44 = vld [vmem:[#allocation11_spill] sm:$0xff] }
 0x143   : > { %1009 = vrot.lane.b32.xlu1 %v2946_v15, %s2772_s22 }
 0x144   : > { %1013 = vrot.lane.b32.xlu0 %v2985_v29, %s2772_s22 }
 0x145   : > { %v668_v3 = vpop.permute.xlu1 %667 }
 0x146   : > { %741 = vst.msk [vmem:[#allocation3 + $0xb8] sm:$0xff] %vm717_vm3, %v668_v3  ;;  %v672_v33 = vpop.permute.xlu0 %671  ;;  %v4283_v3 = vld [vmem:[#allocation15_spill] sm:$0xff] }
 0x147   : > { %743 = vst.msk [vmem:[#allocation3 + $0xc8] sm:$0xff] %vm717_vm3, %v672_v33  ;;  %876 = vrot.lane.b32.xlu2 %v781_v16, %s2771_s21  ;;  %v4284_v33 = vld [vmem:[#allocation22_spill] sm:$0xff]  ;;  %s3935_s21 = scalar_lea.vmem %s4213_s3, %s2722_s18 }
 0x149   : > { %v682_v11 = vpop.permute.xlu2 %681 }
 0x14a   : > { %748 = vst.msk [vmem:[#allocation3 + $0xf0] sm:$0xff] %vm717_vm3, %v682_v11 }
 0x14b   : > { %1015 = vrot.lane.b32.xlu1 %v2952_v17, %s2772_s22 }
 0x14c   : > { %1019 = vrot.lane.b32.xlu0 %v3004_v35, %s2772_s22 }
 0x14d   : > { %v674_v15 = vpop.permute.xlu1 %673 }
 0x14e   : > { %744 = vst.msk [vmem:[#allocation3 + $0xd0] sm:$0xff] %vm717_vm3, %v674_v15  ;;  %v678_v29 = vpop.permute.xlu0 %677 }
 0x14f   : > { %746 = vst.msk [vmem:[#allocation3 + $0xe0] sm:$0xff] %vm717_vm3, %v678_v29  ;;  %1011 = vrot.lane.b32.xlu2 %v2962_v21, %s2772_s22  ;;  %v4285_v29 = vld [vmem:[#allocation14_spill] sm:$0xff] }
 0x151   : > { %v817_v14 = vpop.permute.xlu2 %816 }
 0x152   : > { %912 = vst.msk [vmem:[#allocation3 + $0x8] sm:$0xff] %vm910_vm4, %v817_v14 }
 0x153   : > { %1021 = vrot.lane.b32.xlu1 %v2973_v25, %s2772_s22 }
 0x154   : > { %1025 = vrot.lane.b32.xlu0 %v3022_v41, %s2772_s22 }
 0x155   : > { %v680_v17 = vpop.permute.xlu1 %679 }
 0x156   : > { %747 = vst.msk [vmem:[#allocation3 + $0xe8] sm:$0xff] %vm717_vm3, %v680_v17  ;;  %v684_v35 = vpop.permute.xlu0 %683  ;;  %v4286_v17 = vld [vmem:[#allocation18_spill] sm:$0xff] }
 0x157   : > { %749 = vst.msk [vmem:[#allocation3 + $0xf8] sm:$0xff] %vm717_vm3, %v684_v35  ;;  %1017 = vrot.lane.b32.xlu2 %v2970_v24, %s2772_s22  ;;  %v4287_v35 = vld [vmem:[#allocation25_spill] sm:$0xff] }
 0x159   : > { %v823_v21 = vpop.permute.xlu2 %822 }
 0x15a   : > { %915 = vst.msk [vmem:[#allocation3 + $0x20] sm:$0xff] %vm910_vm4, %v823_v21 }
 0x15b   : > { %1027 = vrot.lane.b32.xlu1 %v2993_v31, %s2772_s22 }
 0x15c   : > { %1031 = vrot.lane.b32.xlu0 %v3039_v46, %s2772_s22 }
 0x15d   : > { %v815_v25 = vpop.permute.xlu1 %814 }
 0x15e   : > { %911 = vst.msk [vmem:[#allocation3] sm:$0xff] %vm910_vm4, %v815_v25  ;;  %v819_v41 = vpop.permute.xlu0 %818 }
 0x15f   : > { %913 = vst.msk [vmem:[#allocation3 + $0x10] sm:$0xff] %vm910_vm4, %v819_v41  ;;  %1023 = vrot.lane.b32.xlu2 %v2991_v30, %s2772_s22  ;;  %v4288_v41 = vld [vmem:[#allocation17_spill] sm:$0xff] }
 0x161   : > { %v829_v32 = vpop.permute.xlu2 %828 }
 0x162   : > { %918 = vst.msk [vmem:[#allocation3 + $0x38] sm:$0xff] %vm910_vm4, %v829_v32 }
 0x163   : > { %1033 = vrot.lane.b32.xlu1 %v3011_v37, %s2772_s22 }
 0x164   : > { %1037 = vrot.lane.b32.xlu0 %v3053_v50, %s2772_s22 }
 0x165   : > { %v821_v24 = vpop.permute.xlu1 %820 }
 0x166   : > { %914 = vst.msk [vmem:[#allocation3 + $0x18] sm:$0xff] %vm910_vm4, %v821_v24  ;;  %v825_v31 = vpop.permute.xlu0 %824  ;;  %v4289_v24 = vld [vmem:[#allocation21_spill] sm:$0xff] }
 0x167   : > { %916 = vst.msk [vmem:[#allocation3 + $0x28] sm:$0xff] %vm910_vm4, %v825_v31  ;;  %1029 = vrot.lane.b32.xlu2 %v3009_v36, %s2772_s22  ;;  %v4290_v31 = vld [vmem:[#allocation28_spill] sm:$0xff] }
 0x169   : > { %v835_v46 = vpop.permute.xlu2 %834 }
 0x16a   : > { %921 = vst.msk [vmem:[#allocation3 + $0x50] sm:$0xff] %vm910_vm4, %v835_v46 }
 0x16b   : > { %1039 = vrot.lane.b32.xlu1 %v3029_v43, %s2772_s22 }
 0x16c   : > { %1043 = vrot.lane.b32.xlu0 %v3067_v54, %s2772_s22 }
 0x16d   : > { %v827_v30 = vpop.permute.xlu1 %826 }
 0x16e   : > { %917 = vst.msk [vmem:[#allocation3 + $0x30] sm:$0xff] %vm910_vm4, %v827_v30  ;;  %v831_v37 = vpop.permute.xlu0 %830 }
 0x16f   : > { %919 = vst.msk [vmem:[#allocation3 + $0x40] sm:$0xff] %vm910_vm4, %v831_v37  ;;  %1035 = vrot.lane.b32.xlu2 %v3027_v42, %s2772_s22  ;;  %v4291_v37 = vld [vmem:[#allocation20_spill] sm:$0xff] }
 0x171   : > { %v841_v50 = vpop.permute.xlu2 %840 }
 0x172   : > { %924 = vst.msk [vmem:[#allocation3 + $0x68] sm:$0xff] %vm910_vm4, %v841_v50 }
 0x173   : > { %1045 = vrot.lane.b32.xlu1 %v3045_v48, %s2772_s22 }
 0x174   : > { %1049 = vrot.lane.b32.xlu0 %v3079_v57, %s2772_s22 }
 0x175   : > { %v833_v36 = vpop.permute.xlu1 %832 }
 0x176   : > { %920 = vst.msk [vmem:[#allocation3 + $0x48] sm:$0xff] %vm910_vm4, %v833_v36  ;;  %v837_v43 = vpop.permute.xlu0 %836  ;;  %v4292_v36 = vld [vmem:[#allocation24_spill] sm:$0xff] }
 0x177   : > { %922 = vst.msk [vmem:[#allocation3 + $0x58] sm:$0xff] %vm910_vm4, %v837_v43  ;;  %1041 = vrot.lane.b32.xlu2 %v3043_v47, %s2772_s22  ;;  %v4293_v43 = vld [vmem:[#allocation30_spill] sm:$0xff] }
 0x179   : > { %v847_v54 = vpop.permute.xlu2 %846 }
 0x17a   : > { %927 = vst.msk [vmem:[#allocation3 + $0x80] sm:$0xff] %vm910_vm4, %v847_v54 }
 0x17b   : > { %1051 = vrot.lane.b32.xlu1 %v3059_v52, %s2772_s22 }
 0x17c   : > { %1055 = vrot.lane.b32.xlu0 %v3091_v60, %s2772_s22  ;;  %v973_v60 = vld [vmem:[#allocation2 + $0x181] sm:$0xff] }
 0x17d   : > { %v839_v42 = vpop.permute.xlu1 %838 }
 0x17e   : > { %923 = vst.msk [vmem:[#allocation3 + $0x60] sm:$0xff] %vm910_vm4, %v839_v42  ;;  %v843_v48 = vpop.permute.xlu0 %842 }
 0x17f   : > { %925 = vst.msk [vmem:[#allocation3 + $0x70] sm:$0xff] %vm910_vm4, %v843_v48  ;;  %1047 = vrot.lane.b32.xlu2 %v3057_v51, %s2772_s22  ;;  %v4294_v48 = vld [vmem:[#allocation23_spill] sm:$0xff] }
 0x181   : > { %v853_v57 = vpop.permute.xlu2 %852 }
 0x182   : > { %930 = vst.msk [vmem:[#allocation3 + $0x98] sm:$0xff] %vm910_vm4, %v853_v57 }
 0x183   : > { %1057 = vrot.lane.b32.xlu1 %v3073_v56, %s2772_s22 }
 0x184   : > { %1061 = vrot.lane.b32.xlu0 %v3101_v1, %s2772_s22 }
 0x185   : > { %v845_v47 = vpop.permute.xlu1 %844 }
 0x186   : > { %926 = vst.msk [vmem:[#allocation3 + $0x78] sm:$0xff] %vm910_vm4, %v845_v47  ;;  %v849_v52 = vpop.permute.xlu0 %848  ;;  %v4295_v47 = vld [vmem:[#allocation27_spill] sm:$0xff] }
 0x187   : > { %928 = vst.msk [vmem:[#allocation3 + $0x88] sm:$0xff] %vm910_vm4, %v849_v52  ;;  %1053 = vrot.lane.b32.xlu2 %v3071_v55, %s2772_s22 }
 0x189   : > { %v859_v51 = vpop.permute.xlu2 %858 }
 0x18a   : > { %933 = vst.msk [vmem:[#allocation3 + $0xb0] sm:$0xff] %vm910_vm4, %v859_v51  ;;  %v4296_v51 = vld [vmem:[#allocation26_spill] sm:$0xff] }
 0x18b   : > { %1063 = vrot.lane.b32.xlu1 %v3085_v59, %s2772_s22  ;;  %v4272_v59 = vld [vmem:[#allocation10_spill] sm:$0xff] }
 0x18c   : > { %1067 = vrot.lane.b32.xlu0 %v973_v60, %s2772_s22 }
 0x18d   : > { %v851_v56 = vpop.permute.xlu1 %850 }
 0x18e   : > { %929 = vst.msk [vmem:[#allocation3 + $0x90] sm:$0xff] %vm910_vm4, %v851_v56  ;;  %v855_v1 = vpop.permute.xlu0 %854 }
 0x18f   : > { %931 = vst.msk [vmem:[#allocation3 + $0xa0] sm:$0xff] %vm910_vm4, %v855_v1  ;;  %1059 = vrot.lane.b32.xlu2 %v4271_v49, %s2772_s22  ;;  %v4297_v49 = vld [vmem:[#allocation29_spill] sm:$0xff] }
 0x191   : > { %v865_v55 = vpop.permute.xlu2 %864 }
 0x192   : > { %936 = vst.msk [vmem:[#allocation3 + $0xc8] sm:$0xff] %vm910_vm4, %v865_v55 }
 0x193   : > { %1069 = vrot.lane.b32.xlu1 %v974_v28, %s2772_s22  ;;  %v1330_v28 = vld [vmem:[#allocation2 + $0x30] sm:$0xff] }
 0x194   : > { %1202 = vrot.lane.b32.xlu0 %v4272_v59, %s2773_s23 }
 0x195   : > { %v857_v19 = vpop.permute.xlu1 %856 }
 0x196   : > { %932 = vst.msk [vmem:[#allocation3 + $0xa8] sm:$0xff] %vm910_vm4, %v857_v19  ;;  %v861_v45 = vpop.permute.xlu0 %860 }
 0x197   : > { %934 = vst.msk [vmem:[#allocation3 + $0xb8] sm:$0xff] %vm910_vm4, %v861_v45  ;;  %1065 = vrot.lane.b32.xlu2 %v4273_v26, %s2772_s22  ;;  %v1716_v45 = vld [vmem:[#allocation2 + $0x32] sm:$0xff] }
 0x199   : > { %v871_v34 = vpop.permute.xlu2 %870 }
 0x19a   : > { %939 = vst.msk [vmem:[#allocation3 + $0xe0] sm:$0xff] %vm910_vm4, %v871_v34 }
 0x19b   : > { %1204 = vrot.lane.b32.xlu1 %v4274_v39, %s2773_s23 }
 0x19c   : > { %1208 = vrot.lane.b32.xlu0 %v4275_v8, %s2773_s23  ;;  %v1331_v8 = vld [vmem:[#allocation2 + $0x38] sm:$0xff] }
 0x19d   : > { %v863_v53 = vpop.permute.xlu1 %862 }
 0x19e   : > { %935 = vst.msk [vmem:[#allocation3 + $0xc0] sm:$0xff] %vm910_vm4, %v863_v53  ;;  %v867_v61 = vpop.permute.xlu0 %866 }
 0x19f   : > { %937 = vst.msk [vmem:[#allocation3 + $0xd0] sm:$0xff] %vm910_vm4, %v867_v61  ;;  %1200 = vrot.lane.b32.xlu2 %v4276_v6, %s2773_s23  ;;  %v1540_v61 = vld [vmem:[#allocation2 + $0xf9] sm:$0xff] }
 0x1a1   : > { %v877_v58 = vpop.permute.xlu2 %876 }
 0x1a2   : > { %942 = vst.msk [vmem:[#allocation3 + $0xf8] sm:$0xff] %vm910_vm4, %v877_v58 }
 0x1a3   : > { %1210 = vrot.lane.b32.xlu1 %v4277_v40, %s2773_s23  ;;  %v1717_v40 = vld [vmem:[#allocation2 + $0x3a] sm:$0xff] }
 0x1a4   : > { %1214 = vrot.lane.b32.xlu0 %v4278_v4, %s2773_s23  ;;  %v1734_v4 = vld [vmem:[#allocation2 + $0x10a] sm:$0xff] }
 0x1a5   : > { %v869_v2 = vpop.permute.xlu1 %868 }
 0x1a6   : > { %938 = vst.msk [vmem:[#allocation3 + $0xd8] sm:$0xff] %vm910_vm4, %v869_v2  ;;  %v873_v0 = vpop.permute.xlu0 %872 }
 0x1a7   : > { %940 = vst.msk [vmem:[#allocation3 + $0xe8] sm:$0xff] %vm910_vm4, %v873_v0  ;;  %1206 = vrot.lane.b32.xlu2 %v4279_v9, %s2773_s23 }
 0x1a9   : > { %v1012_v7 = vpop.permute.xlu2 %1011 }
 0x1aa   : > { %1106 = vst.msk [vmem:[#allocation3 + $0x10] sm:$0xff] %vm1103_vm5, %v1012_v7  ;;  %v1332_v7 = vld [vmem:[#allocation2 + $0x48] sm:$0xff] }
 0x1ab   : > { %1216 = vrot.lane.b32.xlu1 %v4280_v18, %s2773_s23 }
 0x1ac   : > { %1220 = vrot.lane.b32.xlu0 %v4281_v10, %s2773_s23  ;;  %v1541_v10 = vld [vmem:[#allocation2 + $0x109] sm:$0xff] }
 0x1ad   : > { %v875_v20 = vpop.permute.xlu1 %874 }
 0x1ae   : > { %941 = vst.msk [vmem:[#allocation3 + $0xf0] sm:$0xff] %vm910_vm4, %v875_v20  ;;  %v1008_v63 = vpop.permute.xlu0 %1007 }
 0x1af   : > { %1104 = vst.msk [vmem:[#allocation3] sm:$0xff] %vm1103_vm5, %v1008_v63  ;;  %1212 = vrot.lane.b32.xlu2 %v4282_v44, %s2773_s23  ;;  %v1718_v44 = vld [vmem:[#allocation2 + $0x4a] sm:$0xff] }
 0x1b1   : > { %v1018_v16 = vpop.permute.xlu2 %1017 }
 0x1b2   : > { %1109 = vst.msk [vmem:[#allocation3 + $0x28] sm:$0xff] %vm1103_vm5, %v1018_v16  ;;  %v1735_v16 = vld [vmem:[#allocation2 + $0x112] sm:$0xff] }
 0x1b3   : > { %1222 = vrot.lane.b32.xlu1 %v4283_v3, %s2773_s23 }
 0x1b4   : > { %1226 = vrot.lane.b32.xlu0 %v4284_v33, %s2773_s23  ;;  %v1525_v33 = vld [vmem:[#allocation2 + $0x49] sm:$0xff] }
 0x1b5   : > { %v1010_v11 = vpop.permute.xlu1 %1009 }
 0x1b6   : > { %1105 = vst.msk [vmem:[#allocation3 + $0x8] sm:$0xff] %vm1103_vm5, %v1010_v11  ;;  %v1014_v15 = vpop.permute.xlu0 %1013 }
 0x1b7   : > { %1107 = vst.msk [vmem:[#allocation3 + $0x18] sm:$0xff] %vm1103_vm5, %v1014_v15  ;;  %1218 = vrot.lane.b32.xlu2 %v4285_v29, %s2773_s23  ;;  %v1333_v15 = vld [vmem:[#allocation2 + $0x50] sm:$0xff] }
 0x1b9   : > { %v1024_v14 = vpop.permute.xlu2 %1023 }
 0x1ba   : > { %1112 = vst.msk [vmem:[#allocation3 + $0x40] sm:$0xff] %vm1103_vm5, %v1024_v14  ;;  %v1542_v14 = vld [vmem:[#allocation2 + $0x111] sm:$0xff] }
 0x1bb   : > { %1228 = vrot.lane.b32.xlu1 %v4286_v17, %s2773_s23 }
 0x1bc   : > { %1232 = vrot.lane.b32.xlu0 %v4287_v35, %s2773_s23 }
 0x1bd   : > { %v1016_v21 = vpop.permute.xlu1 %1015 }
 0x1be   : > { %1108 = vst.msk [vmem:[#allocation3 + $0x20] sm:$0xff] %vm1103_vm5, %v1016_v21  ;;  %v1020_v25 = vpop.permute.xlu0 %1019  ;;  %v1719_v21 = vld [vmem:[#allocation2 + $0x52] sm:$0xff] }
 0x1bf   : > { %1110 = vst.msk [vmem:[#allocation3 + $0x30] sm:$0xff] %vm1103_vm5, %v1020_v25  ;;  %1224 = vrot.lane.b32.xlu2 %v4288_v41, %s2773_s23  ;;  %v1526_v41 = vld [vmem:[#allocation2 + $0x51] sm:$0xff] }
 0x1c1   : > { %v1030_v32 = vpop.permute.xlu2 %1029 }
 0x1c2   : > { %1115 = vst.msk [vmem:[#allocation3 + $0x58] sm:$0xff] %vm1103_vm5, %v1030_v32 }
 0x1c3   : > { %1234 = vrot.lane.b32.xlu1 %v4289_v24, %s2773_s23  ;;  %v1334_v24 = vld [vmem:[#allocation2 + $0x60] sm:$0xff] }
 0x1c4   : > { %1238 = vrot.lane.b32.xlu0 %v4290_v31, %s2773_s23 }
 0x1c5   : > { %v1022_v46 = vpop.permute.xlu1 %1021 }
 0x1c6   : > { %1111 = vst.msk [vmem:[#allocation3 + $0x38] sm:$0xff] %vm1103_vm5, %v1022_v46  ;;  %v1026_v30 = vpop.permute.xlu0 %1025  ;;  %v1543_v46 = vld [vmem:[#allocation2 + $0x121] sm:$0xff] }
 0x1c7   : > { %1113 = vst.msk [vmem:[#allocation3 + $0x48] sm:$0xff] %vm1103_vm5, %v1026_v30  ;;  %1230 = vrot.lane.b32.xlu2 %v4291_v37, %s2773_s23 }
 0x1c9   : > { %v1036_v50 = vpop.permute.xlu2 %1035 }
 0x1ca   : > { %1118 = vst.msk [vmem:[#allocation3 + $0x70] sm:$0xff] %vm1103_vm5, %v1036_v50  ;;  %v1950_v50 = vld [vmem:[%s4211_s1 + $0x40] sm:$0xff] }
 0x1cb   : > { %1240 = vrot.lane.b32.xlu1 %v4292_v36, %s2773_s23  ;;  %v2654_v36 = vld [vmem:[%s4211_s1 + $0x88] sm:$0xff]  ;;  %2723 = vmatpush.msra.mxu2 %v1950_v50 }
 0x1cc   : > { %1244 = vrot.lane.b32.xlu0 %v4293_v43, %s2773_s23  ;;  %2732 = vmatpush.msra.mxu3 %v2654_v36 }
 0x1cd   : > { %v1028_v54 = vpop.permute.xlu1 %1027  ;;  %2058 = vmatpush.msra.mxu0 %v1950_v50  ;;  %2310 = vmatpush.msra.mxu1 %v2654_v36  ;;  %v1547_v36 = vld [vmem:[#allocation2 + $0x151] sm:$0xff] }
 0x1ce   : > { %1114 = vst.msk [vmem:[#allocation3 + $0x50] sm:$0xff] %vm1103_vm5, %v1028_v54  ;;  %v1032_v42 = vpop.permute.xlu0 %1031  ;;  %v1720_v54 = vld [vmem:[#allocation2 + $0x62] sm:$0xff] }
 0x1cf   : > { %1116 = vst.msk [vmem:[#allocation3 + $0x60] sm:$0xff] %vm1103_vm5, %v1032_v42  ;;  %1236 = vrot.lane.b32.xlu2 %v4294_v48, %s2773_s23  ;;  %v1948_v42 = vld [vmem:[%s4211_s1 + $0x30] sm:$0xff] }
 0x1d1   : > { %v1042_v57 = vpop.permute.xlu2 %1041 }
 0x1d2   : > { %1121 = vst.msk [vmem:[#allocation3 + $0x88] sm:$0xff] %vm1103_vm5, %v1042_v57 }
 0x1d3   : > { %1246 = vrot.lane.b32.xlu1 %v4295_v47, %s2773_s23  ;;  %v2652_v47 = vld [vmem:[%s4211_s1 + $0x78] sm:$0xff] }
 0x1d4   : > { %1250 = vrot.lane.b32.xlu0 %v3347_v12, %s2773_s23 }
 0x1d5   : > { %v1034_v52 = vpop.permute.xlu1 %1033 }
 0x1d6   : > { %1117 = vst.msk [vmem:[#allocation3 + $0x68] sm:$0xff] %vm1103_vm5, %v1034_v52  ;;  %v1038_v60 = vpop.permute.xlu0 %1037  ;;  %v1527_v52 = vld [vmem:[#allocation2 + $0x61] sm:$0xff] }
 0x1d7   : > { %1119 = vst.msk [vmem:[#allocation3 + $0x78] sm:$0xff] %vm1103_vm5, %v1038_v60  ;;  %1242 = vrot.lane.b32.xlu2 %v4296_v51, %s2773_s23  ;;  %v1947_v60 = vld [vmem:[%s4211_s1 + $0x28] sm:$0xff]  ;;  %v2651_v51 = vld [vmem:[%s4211_s1 + $0x70] sm:$0xff] }
 0x1d9   : > { %v1048_v56 = vpop.permute.xlu2 %1047 }
 0x1da   : > { %1124 = vst.msk [vmem:[#allocation3 + $0xa0] sm:$0xff] %vm1103_vm5, %v1048_v56 }
 0x1db   : > { %1426 = vrot.lane.b32.xlu1 %v3250_v27, %s2774_s24  ;;  %v1539_v27 = vld [vmem:[#allocation2 + $0xf1] sm:$0xff] }
 0x1dc   : > { %1812 = vrot.lane.b32.xlu0 %v4294_v48, %s2775_s25  ;;  %v1737_v48 = vld [vmem:[#allocation2 + $0x12a] sm:$0xff] }
 0x1dd   : > { %v1040_v12 = vpop.permute.xlu1 %1039 }
 0x1de   : > { %1120 = vst.msk [vmem:[#allocation3 + $0x80] sm:$0xff] %vm1103_vm5, %v1040_v12  ;;  %v1044_v1 = vpop.permute.xlu0 %1043 }
 0x1df   : > { %1122 = vst.msk [vmem:[#allocation3 + $0x90] sm:$0xff] %vm1103_vm5, %v1044_v1  ;;  %1248 = vrot.lane.b32.xlu2 %v4297_v49, %s2773_s23  ;;  %v1946_v1 = vld [vmem:[%s4211_s1 + $0x20] sm:$0xff]  ;;  %v2650_v49 = vld [vmem:[%s4211_s1 + $0x68] sm:$0xff] }
 0x1e1   : > { %v1054_v55 = vpop.permute.xlu2 %1053 }
 0x1e2   : > { %1127 = vst.msk [vmem:[#allocation3 + $0xb8] sm:$0xff] %vm1103_vm5, %v1054_v55  ;;  %v1945_v55 = vld [vmem:[%s4211_s1 + $0x18] sm:$0xff] }
 0x1e3   : > { %1394 = vrot.lane.b32.xlu1 %v1330_v28, %s2774_s24  ;;  %v1335_v28 = vld [vmem:[#allocation2 + $0x68] sm:$0xff] }
 0x1e4   : > { %1428 = vrot.lane.b32.xlu0 %v3257_v62, %s2774_s24  ;;  %v1523_v62 = vld [vmem:[#allocation2 + $0x31] sm:$0xff] }
 0x1e5   : > { %v1046_v59 = vpop.permute.xlu1 %1045 }
 0x1e6   : > { %1123 = vst.msk [vmem:[#allocation3 + $0x98] sm:$0xff] %vm1103_vm5, %v1046_v59  ;;  %v1050_v19 = vpop.permute.xlu0 %1049 }
 0x1e7   : > { %1125 = vst.msk [vmem:[#allocation3 + $0xa8] sm:$0xff] %vm1103_vm5, %v1050_v19  ;;  %1619 = vrot.lane.b32.xlu2 %v1539_v27, %s2776_s26  ;;  %v2649_v27 = vld [vmem:[%s4211_s1 + $0x60] sm:$0xff]  ;;  %v1944_v19 = vld [vmem:[%s4211_s1 + $0x10] sm:$0xff] }
 0x1e9   : > { %v1060_v26 = vpop.permute.xlu2 %1059 }
 0x1ea   : > { %1130 = vst.msk [vmem:[#allocation3 + $0xd0] sm:$0xff] %vm1103_vm5, %v1060_v26  ;;  %v1544_v26 = vld [vmem:[#allocation2 + $0x129] sm:$0xff] }
 0x1eb   : > { %1780 = vrot.lane.b32.xlu1 %v1716_v45, %s2775_s25  ;;  %v2648_v45 = vld [vmem:[%s4211_s1 + $0x58] sm:$0xff] }
 0x1ec   : > { %1814 = vrot.lane.b32.xlu0 %v4290_v31, %s2775_s25 }
 0x1ed   : > { %v1052_v34 = vpop.permute.xlu1 %1051 }
 0x1ee   : > { %1126 = vst.msk [vmem:[#allocation3 + $0xb0] sm:$0xff] %vm1103_vm5, %v1052_v34  ;;  %v1056_v39 = vpop.permute.xlu0 %1055  ;;  %v2647_v34 = vld [vmem:[%s4211_s1 + $0x50] sm:$0xff] }
 0x1ef   : > { %1128 = vst.msk [vmem:[#allocation3 + $0xc0] sm:$0xff] %vm1103_vm5, %v1056_v39  ;;  %1587 = vrot.lane.b32.xlu2 %v1523_v62, %s2776_s26  ;;  %v1943_v62 = vld [vmem:[%s4211_s1 + $0x8] sm:$0xff] }
 0x1f1   : > { %v1066_v53 = vpop.permute.xlu2 %1065 }
 0x1f2   : > { %1133 = vst.msk [vmem:[#allocation3 + $0xe8] sm:$0xff] %vm1103_vm5, %v1066_v53  ;;  %v2646_v53 = vld [vmem:[%s4211_s1 + $0x48] sm:$0xff] }
 0x1f3   : > { %1396 = vrot.lane.b32.xlu1 %v1331_v8, %s2774_s24 }
 0x1f4   : > { %1430 = vrot.lane.b32.xlu0 %v3281_v22, %s2774_s24  ;;  %v1524_v22 = vld [vmem:[#allocation2 + $0x39] sm:$0xff] }
 0x1f5   : > { %v1058_v6 = vpop.permute.xlu1 %1057 }
 0x1f6   : > { %1129 = vst.msk [vmem:[#allocation3 + $0xc8] sm:$0xff] %vm1103_vm5, %v1058_v6  ;;  %v1062_v58 = vpop.permute.xlu0 %1061  ;;  %v1738_v6 = vld [vmem:[#allocation2 + $0x13a] sm:$0xff] }
 0x1f7   : > { %1131 = vst.msk [vmem:[#allocation3 + $0xd8] sm:$0xff] %vm1103_vm5, %v1062_v58  ;;  %1621 = vrot.lane.b32.xlu2 %v1540_v61, %s2776_s26  ;;  %v1721_v61 = vld [vmem:[#allocation2 + $0x6a] sm:$0xff] }
 0x1f9   : > { %v1201_v2 = vpop.permute.xlu2 %1200 }
 0x1fa   : > { %1297 = vst.msk [vmem:[#allocation3] sm:$0xff] %vm1296_vm6, %v1201_v2 }
 0x1fb   : > { %1782 = vrot.lane.b32.xlu1 %v1717_v40, %s2775_s25  ;;  %v1528_v40 = vld [vmem:[#allocation2 + $0x69] sm:$0xff] }
 0x1fc   : > { %1816 = vrot.lane.b32.xlu0 %v1734_v4, %s2775_s25 }
 0x1fd   : > { %v1064_v0 = vpop.permute.xlu1 %1063 }
 0x1fe   : > { %1132 = vst.msk [vmem:[#allocation3 + $0xe0] sm:$0xff] %vm1103_vm5, %v1064_v0  ;;  %v1068_v9 = vpop.permute.xlu0 %1067  ;;  %v1353_v0 = vld [vmem:[#allocation2 + $0x140] sm:$0xff] }
 0x1ff   : > { %1134 = vst.msk [vmem:[#allocation3 + $0xf0] sm:$0xff] %vm1103_vm5, %v1068_v9  ;;  %1589 = vrot.lane.b32.xlu2 %v1524_v22, %s2776_s26  ;;  %v1336_v22 = vld [vmem:[#allocation2 + $0x78] sm:$0xff] }
 0x201   : > { %v1207_v18 = vpop.permute.xlu2 %1206 }
 0x202   : > { %1300 = vst.msk [vmem:[#allocation3 + $0x18] sm:$0xff] %vm1296_vm6, %v1207_v18 }
 0x203   : > { %1398 = vrot.lane.b32.xlu1 %v1332_v7, %s2774_s24  ;;  %v1545_v7 = vld [vmem:[#allocation2 + $0x139] sm:$0xff] }
 0x204   : > { %1432 = vrot.lane.b32.xlu0 %v3277_v38, %s2774_s24 }
 0x205   : > { %v1070_v20 = vpop.permute.xlu1 %1069 }
 0x206   : > { %1135 = vst.msk [vmem:[#allocation3 + $0xf8] sm:$0xff] %vm1103_vm5, %v1070_v20  ;;  %v1203_v63 = vpop.permute.xlu0 %1202  ;;  %v1722_v20 = vld [vmem:[#allocation2 + $0x7a] sm:$0xff] }
 0x207   : > { %1298 = vst.msk [vmem:[#allocation3 + $0x8] sm:$0xff] %vm1296_vm6, %v1203_v63  ;;  %1623 = vrot.lane.b32.xlu2 %v1541_v10, %s2776_s26  ;;  %v1739_v63 = vld [vmem:[#allocation2 + $0x142] sm:$0xff] }
 0x209   : > { %v1213_v3 = vpop.permute.xlu2 %1212 }
 0x20a   : > { %1303 = vst.msk [vmem:[#allocation3 + $0x30] sm:$0xff] %vm1296_vm6, %v1213_v3 }
 0x20b   : > { %1784 = vrot.lane.b32.xlu1 %v1718_v44, %s2775_s25 }
 0x20c   : > { %1818 = vrot.lane.b32.xlu0 %v1735_v16, %s2775_s25  ;;  %v1529_v16 = vld [vmem:[#allocation2 + $0x79] sm:$0xff] }
 0x20d   : > { %v1205_v38 = vpop.permute.xlu1 %1204 }
 0x20e   : > { %1299 = vst.msk [vmem:[#allocation3 + $0x10] sm:$0xff] %vm1296_vm6, %v1205_v38  ;;  %v1209_v11 = vpop.permute.xlu0 %1208  ;;  %v1337_v38 = vld [vmem:[#allocation2 + $0x80] sm:$0xff] }
 0x20f   : > { %1301 = vst.msk [vmem:[#allocation3 + $0x20] sm:$0xff] %vm1296_vm6, %v1209_v11  ;;  %1591 = vrot.lane.b32.xlu2 %v1525_v33, %s2776_s26  ;;  %v1354_v11 = vld [vmem:[#allocation2 + $0x150] sm:$0xff] }
 0x211   : > { %v1219_v29 = vpop.permute.xlu2 %1218 }
 0x212   : > { %1306 = vst.msk [vmem:[#allocation3 + $0x48] sm:$0xff] %vm1296_vm6, %v1219_v29  ;;  %v1546_v29 = vld [vmem:[#allocation2 + $0x141] sm:$0xff] }
 0x213   : > { %1400 = vrot.lane.b32.xlu1 %v1333_v15, %s2774_s24 }
 0x214   : > { %1434 = vrot.lane.b32.xlu0 %v3284_v5, %s2774_s24 }
 0x215   : > { %v1211_v17 = vpop.permute.xlu1 %1210 }
 0x216   : > { %1302 = vst.msk [vmem:[#allocation3 + $0x28] sm:$0xff] %vm1296_vm6, %v1211_v17  ;;  %v1215_v35 = vpop.permute.xlu0 %1214 }
 0x217   : > { %1304 = vst.msk [vmem:[#allocation3 + $0x38] sm:$0xff] %vm1296_vm6, %v1215_v35  ;;  %1625 = vrot.lane.b32.xlu2 %v1542_v14, %s2776_s26 }
 0x219   : > { %v1225_v25 = vpop.permute.xlu2 %1224 }
 0x21a   : > { %1309 = vst.msk [vmem:[#allocation3 + $0x60] sm:$0xff] %vm1296_vm6, %v1225_v25  ;;  %v3788_v25 = vld [vmem:[#allocation2 + $0x152] sm:$0xff] }
 0x21b   : > { %1786 = vrot.lane.b32.xlu1 %v1719_v21, %s2775_s25  ;;  %v1723_v21 = vld [vmem:[#allocation2 + $0x82] sm:$0xff] }
 0x21c   : > { %1820 = vrot.lane.b32.xlu0 %v4293_v43, %s2775_s25  ;;  %v2653_v43 = vld [vmem:[%s4211_s1 + $0x80] sm:$0xff] }
 0x21d   : > { %v1217_v5 = vpop.permute.xlu1 %1216  ;;  %2733 = vmatpush.msra.mxu3 %v2653_v43  ;;  %2311 = vmatpush.msra.mxu1 %v2653_v43 }
 0x21e   : > { %1305 = vst.msk [vmem:[#allocation3 + $0x40] sm:$0xff] %vm1296_vm6, %v1217_v5  ;;  %v1221_v32 = vpop.permute.xlu0 %1220  ;;  %v1530_v5 = vld [vmem:[#allocation2 + $0x81] sm:$0xff] }
 0x21f   : > { %1307 = vst.msk [vmem:[#allocation3 + $0x50] sm:$0xff] %vm1296_vm6, %v1221_v32  ;;  %1593 = vrot.lane.b32.xlu2 %v1526_v41, %s2776_s26  ;;  %2734 = vmatpush.msra.mxu3 %v2652_v47 }
 0x220   : > { %2312 = vmatpush.msra.mxu1 %v2652_v47  ;;  %v1531_v47 = vld [vmem:[#allocation2 + $0x91] sm:$0xff] }
 0x221   : > { %v1231_v31 = vpop.permute.xlu2 %1230  ;;  %2735 = vmatpush.msra.mxu3 %v2651_v51 }
 0x222   : > { %1312 = vst.msk [vmem:[#allocation3 + $0x78] sm:$0xff] %vm1296_vm6, %v1231_v31  ;;  %2313 = vmatpush.msra.mxu1 %v2651_v51  ;;  %v1338_v31 = vld [vmem:[#allocation2 + $0x90] sm:$0xff]  ;;  %v1532_v51 = vld [vmem:[#allocation2 + $0x99] sm:$0xff] }
 0x223   : > { %1402 = vrot.lane.b32.xlu1 %v1334_v24, %s2774_s24  ;;  %2736 = vmatpush.msra.mxu3 %v2650_v49 }
 0x224   : > { %1436 = vrot.lane.b32.xlu0 %v3308_v13, %s2774_s24  ;;  %v1949_v13 = vld [vmem:[%s4211_s1 + $0x38] sm:$0xff]  ;;  %2314 = vmatpush.msra.mxu1 %v2650_v49 }
 0x225   : > { %v1223_v30 = vpop.permute.xlu1 %1222  ;;  %2724 = vmatpush.msra.mxu2 %v1949_v13  ;;  %2059 = vmatpush.msra.mxu0 %v1949_v13  ;;  %v1548_v49 = vld [vmem:[#allocation2 + $0x159] sm:$0xff] }
 0x226   : > { %1308 = vst.msk [vmem:[#allocation3 + $0x58] sm:$0xff] %vm1296_vm6, %v1223_v30  ;;  %v1227_v37 = vpop.permute.xlu0 %1226  ;;  %2737 = vmatpush.msra.mxu3 %v2649_v27  ;;  %2315 = vmatpush.msra.mxu1 %v2649_v27  ;;  %v1356_v27 = vld [vmem:[#allocation2 + $0x168] sm:$0xff] }
 0x227   : > { %1310 = vst.msk [vmem:[#allocation3 + $0x68] sm:$0xff] %vm1296_vm6, %v1227_v37  ;;  %1627 = vrot.lane.b32.xlu2 %v1543_v46, %s2776_s26  ;;  %2725 = vmatpush.msra.mxu2 %v1948_v42  ;;  %v1355_v46 = vld [vmem:[#allocation2 + $0x158] sm:$0xff] }
 0x228   : > { %2060 = vmatpush.msra.mxu0 %v1948_v42  ;;  %2738 = vmatpush.msra.mxu3 %v2648_v45  ;;  %v1741_v42 = vld [vmem:[#allocation2 + $0x15a] sm:$0xff] }
 0x229   : > { %v1237_v57 = vpop.permute.xlu2 %1236  ;;  %2726 = vmatpush.msra.mxu2 %v1947_v60  ;;  %2316 = vmatpush.msra.mxu1 %v2648_v45 }
 0x22a   : > { %1315 = vst.msk [vmem:[#allocation3 + $0x90] sm:$0xff] %vm1296_vm6, %v1237_v57  ;;  %2061 = vmatpush.msra.mxu0 %v1947_v60  ;;  %2739 = vmatpush.msra.mxu3 %v2647_v34  ;;  %v1339_v60 = vld [vmem:[#allocation2 + $0x98] sm:$0xff] }
 0x22b   : > { %1788 = vrot.lane.b32.xlu1 %v1720_v54, %s2775_s25  ;;  %2727 = vmatpush.msra.mxu2 %v1946_v1  ;;  %v1724_v54 = vld [vmem:[#allocation2 + $0x92] sm:$0xff] }
 0x22c   : > { %1822 = vrot.lane.b32.xlu0 %v1737_v48, %s2775_s25  ;;  %2062 = vmatpush.msra.mxu0 %v1946_v1 }
 0x22d   : > { %v1229_v56 = vpop.permute.xlu1 %1228  ;;  %2728 = vmatpush.msra.mxu2 %v1945_v55  ;;  %2740 = vmatpush.msra.mxu3 %v2646_v53 }
 0x22e   : > { %1311 = vst.msk [vmem:[#allocation3 + $0x70] sm:$0xff] %vm1296_vm6, %v1229_v56  ;;  %v1233_v12 = vpop.permute.xlu0 %1232  ;;  %2063 = vmatpush.msra.mxu0 %v1945_v55  ;;  %2317 = vmatpush.msra.mxu1 %v2647_v34 }
 0x22f   : > { %1313 = vst.msk [vmem:[#allocation3 + $0x80] sm:$0xff] %vm1296_vm6, %v1233_v12  ;;  %1595 = vrot.lane.b32.xlu2 %v1527_v52, %s2776_s26  ;;  %2729 = vmatpush.msra.mxu2 %v1944_v19 }
 0x230   : > { %2064 = vmatpush.msra.mxu0 %v1944_v19  ;;  %2318 = vmatpush.msra.mxu1 %v2646_v53 }
 0x231   : > { %v1243_v59 = vpop.permute.xlu2 %1242  ;;  %2730 = vmatpush.msra.mxu2 %v1943_v62 }
 0x232   : > { %1318 = vst.msk [vmem:[#allocation3 + $0xa8] sm:$0xff] %vm1296_vm6, %v1243_v59  ;;  %2065 = vmatpush.msra.mxu0 %v1943_v62  ;;  %v1549_v59 = vld [vmem:[#allocation2 + $0x169] sm:$0xff] }
 0x233   : > { %1404 = vrot.lane.b32.xlu1 %v1335_v28, %s2774_s24  ;;  %v1742_v62 = vld [vmem:[#allocation2 + $0x16a] sm:$0xff] }
 0x234   : > { %1438 = vrot.lane.b32.xlu0 %v3304_v23, %s2774_s24  ;;  %v1942_v23 = vld [vmem:[%s4211_s1] sm:$0xff] }
 0x235   : > { %v1235_v39 = vpop.permute.xlu1 %1234  ;;  %2731 = vmatpush.msra.mxu2 %v1942_v23  ;;  %2066 = vmatpush.msra.mxu0 %v1942_v23  ;;  %v1725_v23 = vld [vmem:[#allocation2 + $0x9a] sm:$0xff] }
 0x236   : > { %1314 = vst.msk [vmem:[#allocation3 + $0x88] sm:$0xff] %vm1296_vm6, %v1235_v39  ;;  %v1239_v8 = vpop.permute.xlu0 %1238 }
 0x237   : > { %1316 = vst.msk [vmem:[#allocation3 + $0x98] sm:$0xff] %vm1296_vm6, %v1239_v8  ;;  %1629 = vrot.lane.b32.xlu2 %v1544_v26, %s2776_s26 }
 0x239   : > { %v1249_v58 = vpop.permute.xlu2 %1248 }
 0x23a   : > { %1321 = vst.msk [vmem:[#allocation3 + $0xc0] sm:$0xff] %vm1296_vm6, %v1249_v58  ;;  %v1726_v58 = vld [vmem:[#allocation2 + $0xaa] sm:$0xff] }
 0x23b   : > { %1790 = vrot.lane.b32.xlu1 %v1721_v61, %s2775_s25 }
 0x23c   : > { %1824 = vrot.lane.b32.xlu0 %v1738_v6, %s2775_s25  ;;  %v1533_v6 = vld [vmem:[#allocation2 + $0xa9] sm:$0xff] }
 0x23d   : > { %v1241_v4 = vpop.permute.xlu1 %1240 }
 0x23e   : > { %1317 = vst.msk [vmem:[#allocation3 + $0xa0] sm:$0xff] %vm1296_vm6, %v1241_v4  ;;  %v1245_v2 = vpop.permute.xlu0 %1244 }
 0x23f   : > { %1319 = vst.msk [vmem:[#allocation3 + $0xb0] sm:$0xff] %vm1296_vm6, %v1245_v2  ;;  %1597 = vrot.lane.b32.xlu2 %v1528_v40, %s2776_s26  ;;  %v1340_v2 = vld [vmem:[#allocation2 + $0xa8] sm:$0xff] }
 0x241   : > { %v1620_v9 = vpop.permute.xlu2 %1619 }
 0x243   : > { %1406 = vrot.lane.b32.xlu1 %v1336_v22, %s2774_s24 }
 0x244   : > { %1440 = vrot.lane.b32.xlu0 %v1353_v0, %s2774_s24  ;;  %v1550_v0 = vld [vmem:[#allocation2 + $0x171] sm:$0xff] }
 0x245   : > { %v1247_v18 = vpop.permute.xlu1 %1246 }
 0x246   : > { %1320 = vst.msk [vmem:[#allocation3 + $0xb8] sm:$0xff] %vm1296_vm6, %v1247_v18  ;;  %v1251_v10 = vpop.permute.xlu0 %1250 }
 0x247   : > { %1322 = vst.msk [vmem:[#allocation3 + $0xc8] sm:$0xff] %vm1296_vm6, %v1251_v10  ;;  %1631 = vrot.lane.b32.xlu2 %v1545_v7, %s2776_s26 }
 0x249   : > { %v1588_v44 = vpop.permute.xlu2 %1587 }
 0x24b   : > { %1792 = vrot.lane.b32.xlu1 %v1722_v20, %s2775_s25  ;;  %v1357_v20 = vld [vmem:[#allocation2 + $0x170] sm:$0xff] }
 0x24c   : > { %1826 = vrot.lane.b32.xlu0 %v1739_v63, %s2775_s25 }
 0x24d   : > { %v1427_v3 = vpop.permute.xlu1 %1426 }
 0x24e   : > { %1507 = vst.msk [vmem:[#allocation3 + $0x80] sm:$0xff] %vm1490_vm7, %v1427_v3  ;;  %v1813_v33 = vpop.permute.xlu0 %1812 }
 0x24f   : > { %1700 = vst.msk [vmem:[#allocation3 + $0x80] sm:$0xff] %vm1683_vm8, %v1620_v9  ;;  %1599 = vrot.lane.b32.xlu2 %v1529_v16, %s2776_s26  ;;  %v1341_v9 = vld [vmem:[#allocation2 + $0xb0] sm:$0xff]  ;;  %v1358_v16 = vld [vmem:[#allocation2 + $0x180] sm:$0xff] }
 0x250   : > { %1893 = vst.msk [vmem:[#allocation3 + $0x80] sm:$0xff] %vm1876_vm9, %v1813_v33 }
 0x251   : > { %v1622_v15 = vpop.permute.xlu2 %1621 }
 0x253   : > { %1408 = vrot.lane.b32.xlu1 %v1337_v38, %s2774_s24  ;;  %v1743_v38 = vld [vmem:[#allocation2 + $0x172] sm:$0xff] }
 0x254   : > { %1442 = vrot.lane.b32.xlu0 %v1354_v11, %s2774_s24 }
 0x255   : > { %v1395_v14 = vpop.permute.xlu1 %1394 }
 0x256   : > { %1491 = vst.msk [vmem:[#allocation3] sm:$0xff] %vm1490_vm7, %v1395_v14  ;;  %v1429_v17 = vpop.permute.xlu0 %1428 }
 0x257   : > { %1684 = vst.msk [vmem:[#allocation3] sm:$0xff] %vm1683_vm8, %v1588_v44  ;;  %v1925_v35 = vld [vmem:[#allocation3 + $0x80] sm:$0xff]  ;;  %1633 = vrot.lane.b32.xlu2 %v1546_v29, %s2776_s26  ;;  %v1744_v29 = vld [vmem:[#allocation2 + $0x182] sm:$0xff] }
 0x258   : > { %1508 = vst.msk [vmem:[#allocation3 + $0x88] sm:$0xff] %vm1490_vm7, %v1429_v17  ;;  %2630 = vmatmul.msk.f32.vlgmr.msra.gmra.mxu2 %vm1954_vm10, %v1925_v35  ;;  %2671 = vmatmul.msk.f32.vlgmr.msra.gmra.mxu3 %vm1954_vm10, %v1925_v35 }
 0x259   : > { %1701 = vst.msk [vmem:[#allocation3 + $0x88] sm:$0xff] %vm1683_vm8, %v1622_v15  ;;  %v1590_v41 = vpop.permute.xlu2 %1589  ;;  %v1727_v15 = vld [vmem:[#allocation2 + $0xb2] sm:$0xff] }
 0x25b   : > { %1794 = vrot.lane.b32.xlu1 %v1723_v21, %s2775_s25  ;;  %v1534_v21 = vld [vmem:[#allocation2 + $0xb1] sm:$0xff] }
 0x25c   : > { %1828 = vrot.lane.b32.xlu0 %v3788_v25, %s2775_s25 }
 0x25d   : > { %v1781_v32 = vpop.permute.xlu1 %1780 }
 0x25e   : > { %1877 = vst.msk [vmem:[#allocation3] sm:$0xff] %vm1876_vm9, %v1781_v32  ;;  %v1815_v24 = vpop.permute.xlu0 %1814  ;;  %v1535_v32 = vld [vmem:[#allocation2 + $0xc1] sm:$0xff] }
 0x25f   : > { %1894 = vst.msk [vmem:[#allocation3 + $0x88] sm:$0xff] %vm1876_vm9, %v1815_v24  ;;  %1601 = vrot.lane.b32.xlu2 %v1530_v5, %s2776_s26  ;;  %v1342_v5 = vld [vmem:[#allocation2 + $0xc0] sm:$0xff] }
 0x261   : > { %v1624_v30 = vpop.permute.xlu2 %1623 }
 0x263   : > { %1410 = vrot.lane.b32.xlu1 %v1338_v31, %s2774_s24 }
 0x264   : > { %1444 = vrot.lane.b32.xlu0 %v1355_v46, %s2774_s24  ;;  %v1551_v46 = vld [vmem:[#allocation2 + $0x181] sm:$0xff] }
 0x265   : > { %v1397_v37 = vpop.permute.xlu1 %1396  ;;  %v1909_v50 = vld [vmem:[#allocation3] sm:$0xff] }
 0x266   : > { %1492 = vst.msk [vmem:[#allocation3 + $0x8] sm:$0xff] %vm1490_vm7, %v1397_v37  ;;  %v1431_v13 = vpop.permute.xlu0 %1430  ;;  %2614 = vmatmul.msk.f32.vlgmr.msra.gmra.mxu0 %vm1954_vm10, %v1909_v50  ;;  %2655 = vmatmul.msk.f32.vlgmr.msra.gmra.mxu1 %vm1954_vm10, %v1909_v50  ;;  %v1926_v43 = vld [vmem:[#allocation3 + $0x88] sm:$0xff]  ;;  %v1359_v37 = vld [vmem:[#allocation2 + $0x188] sm:$0xff] }
 0x267   : > { %1685 = vst.msk [vmem:[#allocation3 + $0x8] sm:$0xff] %vm1683_vm8, %v1590_v41  ;;  %2631 = vmatmul.msk.f32.gmra.mxu2 %vm1954_vm10, %v1926_v43  ;;  %2672 = vmatmul.msk.f32.gmra.mxu3 %vm1954_vm10, %v1926_v43  ;;  %v1552_v50 = vld [vmem:[#allocation2 + $0x189] sm:$0xff] }
 0x268   : > { %1509 = vst.msk [vmem:[#allocation3 + $0x90] sm:$0xff] %vm1490_vm7, %v1431_v13  ;;  %1635 = vrot.lane.b32.xlu2 %v1547_v36, %s2776_s26 }
 0x269   : > { %1702 = vst.msk [vmem:[#allocation3 + $0x90] sm:$0xff] %vm1683_vm8, %v1624_v30  ;;  %v1592_v48 = vpop.permute.xlu2 %1591 }
 0x26b   : > { %1796 = vrot.lane.b32.xlu1 %v1724_v54, %s2775_s25 }
 0x26c   : > { %1830 = vrot.lane.b32.xlu0 %v1741_v42, %s2775_s25 }
 0x26d   : > { %v1783_v57 = vpop.permute.xlu1 %1782 }
 0x26e   : > { %1878 = vst.msk [vmem:[#allocation3 + $0x8] sm:$0xff] %vm1876_vm9, %v1783_v57  ;;  %v1817_v52 = vpop.permute.xlu0 %1816 }
 0x26f   : > { %1895 = vst.msk [vmem:[#allocation3 + $0x90] sm:$0xff] %vm1876_vm9, %v1817_v52  ;;  %v1728_v52 = vld [vmem:[#allocation2 + $0xc2] sm:$0xff] }
 0x270   : > { %1603 = vrot.lane.b32.xlu2 %v1531_v47, %s2776_s26 }
 0x271   : > { %v1626_v56 = vpop.permute.xlu2 %1625 }
 0x273   : > { %1412 = vrot.lane.b32.xlu1 %v1339_v60, %s2774_s24 }
 0x274   : > { %1605 = vrot.lane.b32.xlu0 %v1532_v51, %s2776_s26  ;;  %v1536_v51 = vld [vmem:[#allocation2 + $0xc9] sm:$0xff] }
 0x275   : > { %v1399_v12 = vpop.permute.xlu1 %1398  ;;  %v1910_v1 = vld [vmem:[#allocation3 + $0x8] sm:$0xff] }
 0x276   : > { %1493 = vst.msk [vmem:[#allocation3 + $0x10] sm:$0xff] %vm1490_vm7, %v1399_v12  ;;  %v1433_v28 = vpop.permute.xlu0 %1432  ;;  %2615 = vmatmul.msk.f32.gmra.mxu0 %vm1954_vm10, %v1910_v1  ;;  %2656 = vmatmul.msk.f32.gmra.mxu1 %vm1954_vm10, %v1910_v1  ;;  %v1927_v55 = vld [vmem:[#allocation3 + $0x90] sm:$0xff] }
 0x277   : > { %1686 = vst.msk [vmem:[#allocation3 + $0x10] sm:$0xff] %vm1683_vm8, %v1592_v48  ;;  %2632 = vmatmul.msk.f32.gmra.mxu2 %vm1954_vm10, %v1927_v55  ;;  %2673 = vmatmul.msk.f32.gmra.mxu3 %vm1954_vm10, %v1927_v55  ;;  %v1745_v48 = vld [vmem:[#allocation2 + $0x18a] sm:$0xff] }
 0x278   : > { %1510 = vst.msk [vmem:[#allocation3 + $0x98] sm:$0xff] %vm1490_vm7, %v1433_v28  ;;  %1637 = vrot.lane.b32.xlu2 %v1548_v49, %s2776_s26  ;;  %v1343_v28 = vld [vmem:[#allocation2 + $0xc8] sm:$0xff] }
 0x279   : > { %1703 = vst.msk [vmem:[#allocation3 + $0x98] sm:$0xff] %vm1683_vm8, %v1626_v56  ;;  %v1594_v19 = vpop.permute.xlu2 %1593  ;;  %v1729_v56 = vld [vmem:[#allocation2 + $0xca] sm:$0xff] }
 0x27b   : > { %1446 = vrot.lane.b32.xlu1 %v1356_v27, %s2774_s24 }
 0x27c   : > { %1639 = vrot.lane.b32.xlu0 %v1549_v59, %s2776_s26  ;;  %v1553_v59 = vld [vmem:[#allocation2 + $0x199] sm:$0xff] }
 0x27d   : > { %v1785_v45 = vpop.permute.xlu1 %1784 }
 0x27e   : > { %1879 = vst.msk [vmem:[#allocation3 + $0x10] sm:$0xff] %vm1876_vm9, %v1785_v45  ;;  %v1819_v26 = vpop.permute.xlu0 %1818 }
 0x27f   : > { %1896 = vst.msk [vmem:[#allocation3 + $0x98] sm:$0xff] %vm1876_vm9, %v1819_v26 }
 0x280   : > { %1252 = vrot.lane.b32.xlu2 %v3788_v25, %s2773_s23 }
 0x281   : > { %v1628_v34 = vpop.permute.xlu2 %1627 }
 0x283   : > { %1832 = vrot.lane.b32.xlu1 %v1742_v62, %s2775_s25 }
 0x284   : > { %1254 = vrot.lane.b32.xlu0 %v1741_v42, %s2773_s23 }
 0x285   : > { %v1401_v39 = vpop.permute.xlu1 %1400  ;;  %v1911_v8 = vld [vmem:[#allocation3 + $0x10] sm:$0xff] }
 0x286   : > { %1494 = vst.msk [vmem:[#allocation3 + $0x18] sm:$0xff] %vm1490_vm7, %v1401_v39  ;;  %v1435_v53 = vpop.permute.xlu0 %1434  ;;  %2616 = vmatmul.msk.f32.gmra.mxu0 %vm1954_vm10, %v1911_v8  ;;  %2657 = vmatmul.msk.f32.gmra.mxu1 %vm1954_vm10, %v1911_v8  ;;  %v1928_v61 = vld [vmem:[#allocation3 + $0x98] sm:$0xff]  ;;  %v1361_v39 = vld [vmem:[#allocation2 + $0x1a0] sm:$0xff] }
 0x287   : > { %1687 = vst.msk [vmem:[#allocation3 + $0x18] sm:$0xff] %vm1683_vm8, %v1594_v19  ;;  %2633 = vmatmul.msk.f32.gmra.mxu2 %vm1954_vm10, %v1928_v61  ;;  %2674 = vmatmul.msk.f32.gmra.mxu3 %vm1954_vm10, %v1928_v61  ;;  %v1344_v19 = vld [vmem:[#allocation2 + $0xd8] sm:$0xff] }
 0x288   : > { %1511 = vst.msk [vmem:[#allocation3 + $0xa0] sm:$0xff] %vm1490_vm7, %v1435_v53  ;;  %1798 = vrot.lane.b32.xlu2 %v1725_v23, %s2775_s25  ;;  %v1746_v61 = vld [vmem:[#allocation2 + $0x19a] sm:$0xff] }
 0x289   : > { %1704 = vst.msk [vmem:[#allocation3 + $0xa0] sm:$0xff] %vm1683_vm8, %v1628_v34  ;;  %v1596_v40 = vpop.permute.xlu2 %1595 }
 0x28b   : > { %1607 = vrot.lane.b32.xlu1 %v1533_v6, %s2776_s26 }
 0x28c   : > { %1800 = vrot.lane.b32.xlu0 %v1726_v58, %s2775_s25 }
 0x28d   : > { %v1787_v4 = vpop.permute.xlu1 %1786 }
 0x28e   : > { %1880 = vst.msk [vmem:[#allocation3 + $0x18] sm:$0xff] %vm1876_vm9, %v1787_v4  ;;  %v1821_v22 = vpop.permute.xlu0 %1820  ;;  %v3922_v4 = vld [vmem:[%s4212_s2] ss:$0 sm:$0xff] }
 0x28f   : > { %1897 = vst.msk [vmem:[#allocation3 + $0xa0] sm:$0xff] %vm1876_vm9, %v1821_v22 }
 0x290   : > { %1414 = vrot.lane.b32.xlu2 %v1340_v2, %s2774_s24  ;;  %v1747_v2 = vld [vmem:[#allocation2 + $0x1a2] sm:$0xff] }
 0x291   : > { %v1630_v7 = vpop.permute.xlu2 %1629 }
 0x293   : > { %1641 = vrot.lane.b32.xlu1 %v1550_v0, %s2776_s26 }
 0x294   : > { %1416 = vrot.lane.b32.xlu0 %v1341_v9, %s2774_s24 }
 0x295   : > { %v1403_v18 = vpop.permute.xlu1 %1402  ;;  %v1912_v10 = vld [vmem:[#allocation3 + $0x18] sm:$0xff] }
 0x296   : > { %1495 = vst.msk [vmem:[#allocation3 + $0x20] sm:$0xff] %vm1490_vm7, %v1403_v18  ;;  %v1437_v63 = vpop.permute.xlu0 %1436  ;;  %2617 = vmatmul.msk.f32.gmra.mxu0 %vm1954_vm10, %v1912_v10  ;;  %2658 = vmatmul.msk.f32.gmra.mxu1 %vm1954_vm10, %v1912_v10  ;;  %v1929_v44 = vld [vmem:[#allocation3 + $0xa0] sm:$0xff] }
 0x297   : > { %1688 = vst.msk [vmem:[#allocation3 + $0x20] sm:$0xff] %vm1683_vm8, %v1596_v40  ;;  %2634 = vmatmul.msk.f32.gmra.mxu2 %vm1954_vm10, %v1929_v44  ;;  %2675 = vmatmul.msk.f32.gmra.mxu3 %vm1954_vm10, %v1929_v44  ;;  %v1730_v40 = vld [vmem:[#allocation2 + $0xda] sm:$0xff] }
 0x298   : > { %1512 = vst.msk [vmem:[#allocation3 + $0xa8] sm:$0xff] %vm1490_vm7, %v1437_v63  ;;  %1448 = vrot.lane.b32.xlu2 %v1357_v20, %s2774_s24  ;;  %v1537_v20 = vld [vmem:[#allocation2 + $0xd9] sm:$0xff] }
 0x299   : > { %1705 = vst.msk [vmem:[#allocation3 + $0xa8] sm:$0xff] %vm1683_vm8, %v1630_v7  ;;  %v1598_v3 = vpop.permute.xlu2 %1597 }
 0x29b   : > { %1256 = vrot.lane.b32.xlu1 %v1742_v62, %s2773_s23  ;;  %v1360_v62 = vld [vmem:[#allocation2 + $0x198] sm:$0xff] }
 0x29c   : > { %1450 = vrot.lane.b32.xlu0 %v1358_v16, %s2774_s24 }
 0x29d   : > { %v1789_v33 = vpop.permute.xlu1 %1788 }
 0x29e   : > { %1881 = vst.msk [vmem:[#allocation3 + $0x20] sm:$0xff] %vm1876_vm9, %v1789_v33  ;;  %v1823_v11 = vpop.permute.xlu0 %1822 }
 0x29f   : > { %1898 = vst.msk [vmem:[#allocation3 + $0xa8] sm:$0xff] %vm1876_vm9, %v1823_v11  ;;  %v1731_v11 = vld [vmem:[#allocation2 + $0xe2] sm:$0xff] }
 0x2a0   : > { %1834 = vrot.lane.b32.xlu2 %v1743_v38, %s2775_s25 }
 0x2a1   : > { %v1632_v14 = vpop.permute.xlu2 %1631 }
 0x2a3   : > { %1802 = vrot.lane.b32.xlu1 %v1727_v15, %s2775_s25 }
 0x2a4   : > { %1836 = vrot.lane.b32.xlu0 %v1744_v29, %s2775_s25 }
 0x2a5   : > { %v1405_v17 = vpop.permute.xlu1 %1404  ;;  %v1913_v35 = vld [vmem:[#allocation3 + $0x20] sm:$0xff] }
 0x2a6   : > { %1496 = vst.msk [vmem:[#allocation3 + $0x28] sm:$0xff] %vm1490_vm7, %v1405_v17  ;;  %v1439_v25 = vpop.permute.xlu0 %1438  ;;  %2618 = vmatmul.msk.f32.gmra.mxu0 %vm1954_vm10, %v1913_v35  ;;  %2659 = vmatmul.msk.f32.gmra.mxu1 %vm1954_vm10, %v1913_v35  ;;  %v1930_v41 = vld [vmem:[#allocation3 + $0xa8] sm:$0xff] }
 0x2a7   : > { %1689 = vst.msk [vmem:[#allocation3 + $0x28] sm:$0xff] %vm1683_vm8, %v1598_v3  ;;  %2635 = vmatmul.msk.f32.gmra.mxu2 %vm1954_vm10, %v1930_v41  ;;  %2676 = vmatmul.msk.f32.gmra.mxu3 %vm1954_vm10, %v1930_v41 }
 0x2a8   : > { %1513 = vst.msk [vmem:[#allocation3 + $0xb0] sm:$0xff] %vm1490_vm7, %v1439_v25  ;;  %1609 = vrot.lane.b32.xlu2 %v1534_v21, %s2776_s26 }
 0x2a9   : > { %1706 = vst.msk [vmem:[#allocation3 + $0xb0] sm:$0xff] %vm1683_vm8, %v1632_v14  ;;  %v1600_v24 = vpop.permute.xlu2 %1599 }
 0x2ab   : > { %1418 = vrot.lane.b32.xlu1 %v1342_v5, %s2774_s24 }
 0x2ac   : > { %1611 = vrot.lane.b32.xlu0 %v1535_v32, %s2776_s26 }
 0x2ad   : > { %v1791_v31 = vpop.permute.xlu1 %1790 }
 0x2ae   : > { %1882 = vst.msk [vmem:[#allocation3 + $0x28] sm:$0xff] %vm1876_vm9, %v1791_v31  ;;  %v1825_v30 = vpop.permute.xlu0 %1824  ;;  %v1554_v31 = vld [vmem:[#allocation2 + $0x1a1] sm:$0xff] }
 0x2af   : > { %1899 = vst.msk [vmem:[#allocation3 + $0xb0] sm:$0xff] %vm1876_vm9, %v1825_v30 }
 0x2b0   : > { %1643 = vrot.lane.b32.xlu2 %v1551_v46, %s2776_s26 }
 0x2b1   : > { %v1634_v36 = vpop.permute.xlu2 %1633 }
 0x2b3   : > { %1452 = vrot.lane.b32.xlu1 %v1359_v37, %s2774_s24 }
 0x2b4   : > { %1645 = vrot.lane.b32.xlu0 %v1552_v50, %s2776_s26 }
 0x2b5   : > { %v1407_v13 = vpop.permute.xlu1 %1406  ;;  %v1914_v43 = vld [vmem:[#allocation3 + $0x28] sm:$0xff] }
 0x2b6   : > { %1497 = vst.msk [vmem:[#allocation3 + $0x30] sm:$0xff] %vm1490_vm7, %v1407_v13  ;;  %v1441_v54 = vpop.permute.xlu0 %1440  ;;  %2619 = vmatmul.msk.f32.gmra.mxu0 %vm1954_vm10, %v1914_v43  ;;  %2660 = vmatmul.msk.f32.gmra.mxu1 %vm1954_vm10, %v1914_v43  ;;  %v1931_v42 = vld [vmem:[#allocation3 + $0xb0] sm:$0xff] }
 0x2b7   : > { %1690 = vst.msk [vmem:[#allocation3 + $0x30] sm:$0xff] %vm1683_vm8, %v1600_v24  ;;  %2636 = vmatmul.msk.f32.gmra.mxu2 %vm1954_vm10, %v1931_v42  ;;  %2677 = vmatmul.msk.f32.gmra.mxu3 %vm1954_vm10, %v1931_v42 }
 0x2b8   : > { %1514 = vst.msk [vmem:[#allocation3 + $0xb8] sm:$0xff] %vm1490_vm7, %v1441_v54  ;;  %1258 = vrot.lane.b32.xlu2 %v1743_v38, %s2773_s23  ;;  %v1345_v38 = vld [vmem:[#allocation2 + $0xe0] sm:$0xff] }
 0x2b9   : > { %1707 = vst.msk [vmem:[#allocation3 + $0xb8] sm:$0xff] %vm1683_vm8, %v1634_v36  ;;  %v1602_v57 = vpop.permute.xlu2 %1601 }
 0x2bb   : > { %1838 = vrot.lane.b32.xlu1 %v1745_v48, %s2775_s25 }
 0x2bc   : > { %1260 = vrot.lane.b32.xlu0 %v1744_v29, %s2773_s23 }
 0x2bd   : > { %v1793_v47 = vpop.permute.xlu1 %1792 }
 0x2be   : > { %1883 = vst.msk [vmem:[#allocation3 + $0x30] sm:$0xff] %vm1876_vm9, %v1793_v47  ;;  %v1827_v60 = vpop.permute.xlu0 %1826 }
 0x2bf   : > { %1900 = vst.msk [vmem:[#allocation3 + $0xb8] sm:$0xff] %vm1876_vm9, %v1827_v60  ;;  %v1538_v60 = vld [vmem:[#allocation2 + $0xe1] sm:$0xff] }
 0x2c0   : > { %1804 = vrot.lane.b32.xlu2 %v1728_v52, %s2775_s25 }
 0x2c2   : > { %v1636_v12 = vpop.permute.xlu2 %1635 }
 0x2c3   : > { %1613 = vrot.lane.b32.xlu1 %v1536_v51, %s2776_s26 }
 0x2c4   : > { %1806 = vrot.lane.b32.xlu0 %v1729_v56, %s2775_s25 }
 0x2c5   : > { %v1409_v1 = vpop.permute.xlu1 %1408  ;;  %v1915_v49 = vld [vmem:[#allocation3 + $0x30] sm:$0xff] }
 0x2c6   : > { %1498 = vst.msk [vmem:[#allocation3 + $0x38] sm:$0xff] %vm1490_vm7, %v1409_v1  ;;  %v1443_v55 = vpop.permute.xlu0 %1442  ;;  %2620 = vmatmul.msk.f32.gmra.mxu0 %vm1954_vm10, %v1915_v49  ;;  %2661 = vmatmul.msk.f32.gmra.mxu1 %vm1954_vm10, %v1915_v49  ;;  %v1932_v27 = vld [vmem:[#allocation3 + $0xb8] sm:$0xff] }
 0x2c7   : > { %1691 = vst.msk [vmem:[#allocation3 + $0x38] sm:$0xff] %vm1683_vm8, %v1602_v57  ;;  %2637 = vmatmul.msk.f32.gmra.mxu2 %vm1954_vm10, %v1932_v27  ;;  %2678 = vmatmul.msk.f32.gmra.mxu3 %vm1954_vm10, %v1932_v27 }
 0x2c8   : > { %1515 = vst.msk [vmem:[#allocation3 + $0xc0] sm:$0xff] %vm1490_vm7, %v1443_v55  ;;  %1420 = vrot.lane.b32.xlu2 %v1343_v28, %s2774_s24 }
 0x2c9   : > { %1708 = vst.msk [vmem:[#allocation3 + $0xc0] sm:$0xff] %vm1683_vm8, %v1636_v12 }
 0x2ca   : > { %v1604_v45 = vpop.permute.xlu2 %1603 }
 0x2cb   : > { %1647 = vrot.lane.b32.xlu1 %v1553_v59, %s2776_s26 }
 0x2cc   : > { %1422 = vrot.lane.b32.xlu0 %v1344_v19, %s2774_s24 }
 0x2cd   : > { %v1795_v26 = vpop.permute.xlu1 %1794 }
 0x2ce   : > { %1884 = vst.msk [vmem:[#allocation3 + $0x38] sm:$0xff] %vm1876_vm9, %v1795_v26  ;;  %v1829_v34 = vpop.permute.xlu0 %1828 }
 0x2cf   : > { %1901 = vst.msk [vmem:[#allocation3 + $0xc0] sm:$0xff] %vm1876_vm9, %v1829_v34 }
 0x2d0   : > { %1454 = vrot.lane.b32.xlu2 %v1360_v62, %s2774_s24 }
 0x2d2   : > { %v1638_v8 = vpop.permute.xlu2 %1637 }
 0x2d3   : > { %1262 = vrot.lane.b32.xlu1 %v1745_v48, %s2773_s23 }
 0x2d4   : > { %1456 = vrot.lane.b32.xlu0 %v1361_v39, %s2774_s24 }
 0x2d5   : > { %v1411_v23 = vpop.permute.xlu1 %1410  ;;  %v1916_v53 = vld [vmem:[#allocation3 + $0x38] sm:$0xff] }
 0x2d6   : > { %1499 = vst.msk [vmem:[#allocation3 + $0x40] sm:$0xff] %vm1490_vm7, %v1411_v23  ;;  %v1445_v6 = vpop.permute.xlu0 %1444  ;;  %2621 = vmatmul.msk.f32.gmra.mxu0 %vm1954_vm10, %v1916_v53  ;;  %2662 = vmatmul.msk.f32.gmra.mxu1 %vm1954_vm10, %v1916_v53  ;;  %v1933_v58 = vld [vmem:[#allocation3 + $0xc0] sm:$0xff] }
 0x2d7   : > { %1692 = vst.msk [vmem:[#allocation3 + $0x40] sm:$0xff] %vm1683_vm8, %v1604_v45  ;;  %2638 = vmatmul.msk.f32.gmra.mxu2 %vm1954_vm10, %v1933_v58  ;;  %2679 = vmatmul.msk.f32.gmra.mxu3 %vm1954_vm10, %v1933_v58 }
 0x2d8   : > { %1516 = vst.msk [vmem:[#allocation3 + $0xc8] sm:$0xff] %vm1490_vm7, %v1445_v6  ;;  %1840 = vrot.lane.b32.xlu2 %v1746_v61, %s2775_s25 }
 0x2d9   : > { %1709 = vst.msk [vmem:[#allocation3 + $0xc8] sm:$0xff] %vm1683_vm8, %v1638_v8 }
 0x2da   : > { %v1253_v22 = vpop.permute.xlu2 %1252 }
 0x2db   : > { %1808 = vrot.lane.b32.xlu1 %v1730_v40, %s2775_s25  ;;  %v2116_v0 = vpop.f32.mrf.mxu2  ;;  %v2368_v9 = vpop.f32.mrf.mxu3  ;;  %1323 = vst.msk [vmem:[#allocation3 + $0xd0] sm:$0xff] %vm1296_vm6, %v1253_v22 }
 0x2dc   : > { %v2117_v7 = vadd.f32 %v3922_v4, %v2116_v0  ;;  %v2369_v18 = vadd.f32 %v3922_v4, %v2368_v9  ;;  %1842 = vrot.lane.b32.xlu0 %v1747_v2, %s2775_s25 }
 0x2dd   : > { %v1797_v10 = vpop.permute.xlu1 %1796 }
 0x2de   : > { %vm2180_vm12 = vcmp.ge.f32.partialorder %v2117_v7, 0.0  ;;  %v2212_v63 = vmul.f32 0.2, %v2117_v7  ;;  %vm2432_vm13 = vcmp.ge.f32.partialorder %v2369_v18, 0.0  ;;  %v2464_v44 = vmul.f32 0.2, %v2369_v18  ;;  %v1831_v16 = vpop.permute.xlu0 %1830 }
 0x2df   : > { %1885 = vst.msk [vmem:[#allocation3 + $0x40] sm:$0xff] %vm1876_vm9, %v1797_v10 }
 0x2e0   : > { %v2244_v3 = vsel %vm2180_vm12, %v2117_v7, %v2212_v63  ;;  %v2496_v33 = vsel %vm2432_vm13, %v2369_v18, %v2464_v44  ;;  %1902 = vst.msk [vmem:[#allocation3 + $0xc8] sm:$0xff] %vm1876_vm9, %v1831_v16  ;;  %1615 = vrot.lane.b32.xlu2 %v1537_v20, %s2776_s26 }
 0x2e1   : > { %2277 = vst.msk [vmem:[%s3935_s21 + $0x100] sm:$0xff] %vm2260_vm11, %v2244_v3 }
 0x2e2   : > { %2703 = vst.msk [vmem:[%s3935_s21 + $0x110] sm:$0xff] %vm2260_vm11, %v2496_v33  ;;  %v1799_v15 = vpop.permute.xlu2 %1798 }
 0x2e3   : > { %1424 = vrot.lane.b32.xlu1 %v1345_v38, %s2774_s24  ;;  %v2068_v29 = vpop.f32.mrf.mxu0  ;;  %v2320_v14 = vpop.f32.mrf.mxu1 }
 0x2e4   : > { %v2069_v17 = vadd.f32 %v3922_v4, %v2068_v29  ;;  %v2321_v35 = vadd.f32 %v3922_v4, %v2320_v14  ;;  %1810 = vrot.lane.b32.xlu0 %v1731_v11, %s2775_s25 }
 0x2e5   : > { %v1413_v21 = vpop.permute.xlu1 %1412 }
 0x2e6   : > { %vm2164_vm14 = vcmp.ge.f32.partialorder %v2069_v17, 0.0  ;;  %v2196_v25 = vmul.f32 0.2, %v2069_v17  ;;  %vm2416_vm15 = vcmp.ge.f32.partialorder %v2321_v35, 0.0  ;;  %v2448_v41 = vmul.f32 0.2, %v2321_v35  ;;  %v1606_v5 = vpop.permute.xlu0 %1605 }
 0x2e7   : > { %1500 = vst.msk [vmem:[#allocation3 + $0x48] sm:$0xff] %vm1490_vm7, %v1413_v21  ;;  %v1917_v32 = vld [vmem:[#allocation3 + $0x40] sm:$0xff]  ;;  %v1934_v24 = vld [vmem:[#allocation3 + $0xc8] sm:$0xff] }
 0x2e8   : > { %v2228_v46 = vsel %vm2164_vm14, %v2069_v17, %v2196_v25  ;;  %v2480_v30 = vsel %vm2416_vm15, %v2321_v35, %v2448_v41  ;;  %1693 = vst.msk [vmem:[#allocation3 + $0x48] sm:$0xff] %vm1683_vm8, %v1606_v5  ;;  %2622 = vmatmul.msk.f32.gmra.mxu0 %vm1954_vm10, %v1917_v32  ;;  %2663 = vmatmul.msk.f32.gmra.mxu1 %vm1954_vm10, %v1917_v32 }
 0x2e9   : > { %2261 = vst.msk [vmem:[%s3935_s21] sm:$0xff] %vm2260_vm11, %v2228_v46  ;;  %2639 = vmatmul.msk.f32.gmra.mxu2 %vm1954_vm10, %v1934_v24  ;;  %2680 = vmatmul.msk.f32.gmra.mxu3 %vm1954_vm10, %v1934_v24 }
 0x2ea   : > { %2687 = vst.msk [vmem:[%s3935_s21 + $0x10] sm:$0xff] %vm2260_vm11, %v2480_v30  ;;  %v2119_v37 = vpop.f32.mrf.mxu2  ;;  %v2371_v50 = vpop.f32.mrf.mxu3  ;;  %1649 = vrot.lane.b32.xlu2 %v1554_v31, %s2776_s26 }
 0x2eb   : > { %v2120_v36 = vadd.f32 %v3922_v4, %v2119_v37  ;;  %v2372_v13 = vadd.f32 %v3922_v4, %v2371_v50  ;;  %1886 = vst.msk [vmem:[#allocation3 + $0x48] sm:$0xff] %vm1876_vm9, %v1799_v15  ;;  %v1415_v43 = vpop.permute.xlu2 %1414 }
 0x2ec   : > { %1501 = vst.msk [vmem:[#allocation3 + $0x50] sm:$0xff] %vm1490_vm7, %v1415_v43 }
 0x2ed   : > { %vm2181_vm0 = vcmp.ge.f32.partialorder %v2120_v36, 0.0  ;;  %v2213_v54 = vmul.f32 0.2, %v2120_v36  ;;  %vm2433_vm1 = vcmp.ge.f32.partialorder %v2372_v13, 0.0  ;;  %v2465_v42 = vmul.f32 0.2, %v2372_v13  ;;  %v1447_v48 = vpop.permute.xlu1 %1446 }
 0x2ee   : > { %1517 = vst.msk [vmem:[#allocation3 + $0xd0] sm:$0xff] %vm1490_vm7, %v1447_v48  ;;  %v1640_v57 = vpop.permute.xlu0 %1639 }
 0x2ef   : > { %v2245_v47 = vsel %vm2181_vm0, %v2120_v36, %v2213_v54  ;;  %v2497_v52 = vsel %vm2433_vm1, %v2372_v13, %v2465_v42  ;;  %1710 = vst.msk [vmem:[#allocation3 + $0xd0] sm:$0xff] %vm1683_vm8, %v1640_v57 }
 0x2f0   : > { %2278 = vst.msk [vmem:[%s3935_s21 + $0x108] sm:$0xff] %vm2260_vm11, %v2245_v47 }
 0x2f1   : > { %2704 = vst.msk [vmem:[%s3935_s21 + $0x118] sm:$0xff] %vm2260_vm11, %v2497_v52 }
 0x2f2   : > { %v1918_v51 = vld [vmem:[#allocation3 + $0x48] sm:$0xff]  ;;  %1617 = vrot.lane.b32.xlu2 %v1538_v60, %s2776_s26 }
 0x2f3   : > { %v2071_v56 = vpop.f32.mrf.mxu0  ;;  %v2323_v12 = vpop.f32.mrf.mxu1  ;;  %2623 = vmatmul.msk.f32.gmra.mxu0 %vm1954_vm10, %v1918_v51  ;;  %2664 = vmatmul.msk.f32.gmra.mxu1 %vm1954_vm10, %v1918_v51 }
 0x2f4   : > { %v2072_v1 = vadd.f32 %v3922_v4, %v2071_v56  ;;  %v2324_v49 = vadd.f32 %v3922_v4, %v2323_v12  ;;  %v1449_v28 = vpop.permute.xlu2 %1448 }
 0x2f5   : > { %v1833_v55 = vpop.permute.xlu1 %1832 }
 0x2f6   : > { %vm2165_vm2 = vcmp.ge.f32.partialorder %v2072_v1, 0.0  ;;  %v2197_v27 = vmul.f32 0.2, %v2072_v1  ;;  %vm2417_vm3 = vcmp.ge.f32.partialorder %v2324_v49, 0.0  ;;  %v2449_v59 = vmul.f32 0.2, %v2324_v49  ;;  %v1255_v19 = vpop.permute.xlu0 %1254 }
 0x2f7   : > { %1903 = vst.msk [vmem:[#allocation3 + $0xd0] sm:$0xff] %vm1876_vm9, %v1833_v55 }
 0x2f8   : > { %v2229_v45 = vsel %vm2165_vm2, %v2072_v1, %v2197_v27  ;;  %v2481_v26 = vsel %vm2417_vm3, %v2324_v49, %v2449_v59  ;;  %1324 = vst.msk [vmem:[#allocation3 + $0xd8] sm:$0xff] %vm1296_vm6, %v1255_v19 }
 0x2f9   : > { %2262 = vst.msk [vmem:[%s3935_s21 + $0x8] sm:$0xff] %vm2260_vm11, %v2229_v45 }
 0x2fa   : > { %2688 = vst.msk [vmem:[%s3935_s21 + $0x18] sm:$0xff] %vm2260_vm11, %v2481_v26  ;;  %v2122_v62 = vpop.f32.mrf.mxu2  ;;  %v2374_v34 = vpop.f32.mrf.mxu3 }
 0x2fb   : > { %v2123_v39 = vadd.f32 %v3922_v4, %v2122_v62  ;;  %v2375_v8 = vadd.f32 %v3922_v4, %v2374_v34  ;;  %1518 = vst.msk [vmem:[#allocation3 + $0xd8] sm:$0xff] %vm1490_vm7, %v1449_v28 }
 0x2fc   : > { %v1835_v23 = vpop.permute.xlu2 %1834 }
 0x2fd   : > { %vm2182_vm4 = vcmp.ge.f32.partialorder %v2123_v39, 0.0  ;;  %v2214_v53 = vmul.f32 0.2, %v2123_v39  ;;  %vm2434_vm5 = vcmp.ge.f32.partialorder %v2375_v8, 0.0  ;;  %v2466_v61 = vmul.f32 0.2, %v2375_v8  ;;  %v1608_v6 = vpop.permute.xlu1 %1607 }
 0x2fe   : > { %1694 = vst.msk [vmem:[#allocation3 + $0x50] sm:$0xff] %vm1683_vm8, %v1608_v6  ;;  %v1801_v58 = vpop.permute.xlu0 %1800  ;;  %v1935_v40 = vld [vmem:[#allocation3 + $0xd0] sm:$0xff] }
 0x2ff   : > { %v2246_v2 = vsel %vm2182_vm4, %v2123_v39, %v2214_v53  ;;  %v2498_v22 = vsel %vm2434_vm5, %v2375_v8, %v2466_v61  ;;  %1887 = vst.msk [vmem:[#allocation3 + $0x50] sm:$0xff] %vm1876_vm9, %v1801_v58  ;;  %2640 = vmatmul.msk.f32.gmra.mxu2 %vm1954_vm10, %v1935_v40  ;;  %2681 = vmatmul.msk.f32.gmra.mxu3 %vm1954_vm10, %v1935_v40 }
 0x300   : > { %2279 = vst.msk [vmem:[%s3935_s21 + $0x120] sm:$0xff] %vm2260_vm11, %v2246_v2 }
 0x301   : > { %2705 = vst.msk [vmem:[%s3935_s21 + $0x130] sm:$0xff] %vm2260_vm11, %v2498_v22 }
 0x303   : > { %v2074_v0 = vpop.f32.mrf.mxu0  ;;  %v2326_v9 = vpop.f32.mrf.mxu1 }
 0x304   : > { %v2075_v7 = vadd.f32 %v3922_v4, %v2074_v0  ;;  %v2327_v18 = vadd.f32 %v3922_v4, %v2326_v9  ;;  %v1610_v10 = vpop.permute.xlu2 %1609 }
 0x305   : > { %v1642_v20 = vpop.permute.xlu1 %1641 }
 0x306   : > { %vm2166_vm12 = vcmp.ge.f32.partialorder %v2075_v7, 0.0  ;;  %v2198_v63 = vmul.f32 0.2, %v2075_v7  ;;  %vm2418_vm13 = vcmp.ge.f32.partialorder %v2327_v18, 0.0  ;;  %v2450_v44 = vmul.f32 0.2, %v2327_v18  ;;  %v1417_v16 = vpop.permute.xlu0 %1416 }
 0x307   : > { %1711 = vst.msk [vmem:[#allocation3 + $0xd8] sm:$0xff] %vm1683_vm8, %v1642_v20  ;;  %v1919_v3 = vld [vmem:[#allocation3 + $0x50] sm:$0xff] }
 0x308   : > { %v2230_v33 = vsel %vm2166_vm12, %v2075_v7, %v2198_v63  ;;  %v2482_v38 = vsel %vm2418_vm13, %v2327_v18, %v2450_v44  ;;  %1904 = vst.msk [vmem:[#allocation3 + $0xd8] sm:$0xff] %vm1876_vm9, %v1835_v23  ;;  %2624 = vmatmul.msk.f32.gmra.mxu0 %vm1954_vm10, %v1919_v3  ;;  %2665 = vmatmul.msk.f32.gmra.mxu1 %vm1954_vm10, %v1919_v3 }
 0x309   : > { %2263 = vst.msk [vmem:[%s3935_s21 + $0x20] sm:$0xff] %vm2260_vm11, %v2230_v33 }
 0x30a   : > { %2689 = vst.msk [vmem:[%s3935_s21 + $0x30] sm:$0xff] %vm2260_vm11, %v2482_v38  ;;  %v2125_v11 = vpop.f32.mrf.mxu2  ;;  %v2377_v15 = vpop.f32.mrf.mxu3 }
 0x30b   : > { %1502 = vst.msk [vmem:[#allocation3 + $0x58] sm:$0xff] %vm1490_vm7, %v1417_v16  ;;  %v2126_v29 = vadd.f32 %v3922_v4, %v2125_v11  ;;  %v2378_v14 = vadd.f32 %v3922_v4, %v2377_v15 }
 0x30c   : > { %1695 = vst.msk [vmem:[#allocation3 + $0x58] sm:$0xff] %vm1683_vm8, %v1610_v10  ;;  %v1644_v17 = vpop.permute.xlu2 %1643 }
 0x30d   : > { %vm2183_vm14 = vcmp.ge.f32.partialorder %v2126_v29, 0.0  ;;  %v2215_v35 = vmul.f32 0.2, %v2126_v29  ;;  %vm2435_vm15 = vcmp.ge.f32.partialorder %v2378_v14, 0.0  ;;  %v2467_v21 = vmul.f32 0.2, %v2378_v14  ;;  %v1257_v25 = vpop.permute.xlu1 %1256 }
 0x30e   : > { %1325 = vst.msk [vmem:[#allocation3 + $0xe0] sm:$0xff] %vm1296_vm6, %v1257_v25  ;;  %v1451_v41 = vpop.permute.xlu0 %1450 }
 0x30f   : > { %v2247_v5 = vsel %vm2183_vm14, %v2126_v29, %v2215_v35  ;;  %v2499_v32 = vsel %vm2435_vm15, %v2378_v14, %v2467_v21  ;;  %1519 = vst.msk [vmem:[#allocation3 + $0xe0] sm:$0xff] %vm1490_vm7, %v1451_v41  ;;  %v1936_v24 = vld [vmem:[#allocation3 + $0xd8] sm:$0xff] }
 0x310   : > { %2280 = vst.msk [vmem:[%s3935_s21 + $0x128] sm:$0xff] %vm2260_vm11, %v2247_v5  ;;  %2641 = vmatmul.msk.f32.gmra.mxu2 %vm1954_vm10, %v1936_v24  ;;  %2682 = vmatmul.msk.f32.gmra.mxu3 %vm1954_vm10, %v1936_v24 }
 0x311   : > { %2706 = vst.msk [vmem:[%s3935_s21 + $0x138] sm:$0xff] %vm2260_vm11, %v2499_v32 }
 0x312   : > { %1712 = vst.msk [vmem:[#allocation3 + $0xe0] sm:$0xff] %vm1683_vm8, %v1644_v17 }
 0x313   : > { %v2077_v31 = vpop.f32.mrf.mxu0  ;;  %v2329_v46 = vpop.f32.mrf.mxu1 }
 0x314   : > { %v2078_v30 = vadd.f32 %v3922_v4, %v2077_v31  ;;  %v2330_v37 = vadd.f32 %v3922_v4, %v2329_v46  ;;  %v1259_v50 = vpop.permute.xlu2 %1258 }
 0x315   : > { %v1803_v36 = vpop.permute.xlu1 %1802  ;;  %1326 = vst.msk [vmem:[#allocation3 + $0xe8] sm:$0xff] %vm1296_vm6, %v1259_v50 }
 0x316   : > { %vm2167_vm0 = vcmp.ge.f32.partialorder %v2078_v30, 0.0  ;;  %v2199_v13 = vmul.f32 0.2, %v2078_v30  ;;  %vm2419_vm1 = vcmp.ge.f32.partialorder %v2330_v37, 0.0  ;;  %v2451_v43 = vmul.f32 0.2, %v2330_v37  ;;  %v1837_v54 = vpop.permute.xlu0 %1836 }
 0x317   : > { %1888 = vst.msk [vmem:[#allocation3 + $0x58] sm:$0xff] %vm1876_vm9, %v1803_v36 }
 0x318   : > { %v2231_v42 = vsel %vm2167_vm0, %v2078_v30, %v2199_v13  ;;  %v2483_v48 = vsel %vm2419_vm1, %v2330_v37, %v2451_v43  ;;  %1905 = vst.msk [vmem:[#allocation3 + $0xe0] sm:$0xff] %vm1876_vm9, %v1837_v54 }
 0x319   : > { %2264 = vst.msk [vmem:[%s3935_s21 + $0x28] sm:$0xff] %vm2260_vm11, %v2231_v42 }
 0x31a   : > { %2690 = vst.msk [vmem:[%s3935_s21 + $0x38] sm:$0xff] %vm2260_vm11, %v2483_v48  ;;  %v2128_v57 = vpop.f32.mrf.mxu2  ;;  %v2380_v47 = vpop.f32.mrf.mxu3 }
 0x31b   : > { %v2129_v52 = vadd.f32 %v3922_v4, %v2128_v57  ;;  %v2381_v60 = vadd.f32 %v3922_v4, %v2380_v47 }
 0x31c   : > { %v1805_v51 = vpop.permute.xlu2 %1804 }
 0x31d   : > { %vm2184_vm2 = vcmp.ge.f32.partialorder %v2129_v52, 0.0  ;;  %v2216_v56 = vmul.f32 0.2, %v2129_v52  ;;  %vm2436_vm3 = vcmp.ge.f32.partialorder %v2381_v60, 0.0  ;;  %v2468_v12 = vmul.f32 0.2, %v2381_v60  ;;  %v1419_v1 = vpop.permute.xlu1 %1418 }
 0x31e   : > { %1503 = vst.msk [vmem:[#allocation3 + $0x60] sm:$0xff] %vm1490_vm7, %v1419_v1  ;;  %v1612_v49 = vpop.permute.xlu0 %1611  ;;  %v1920_v28 = vld [vmem:[#allocation3 + $0x58] sm:$0xff] }
 0x31f   : > { %v2248_v55 = vsel %vm2184_vm2, %v2129_v52, %v2216_v56  ;;  %v2500_v27 = vsel %vm2436_vm3, %v2381_v60, %v2468_v12  ;;  %1696 = vst.msk [vmem:[#allocation3 + $0x60] sm:$0xff] %vm1683_vm8, %v1612_v49  ;;  %2625 = vmatmul.msk.f32.gmra.mxu0 %vm1954_vm10, %v1920_v28  ;;  %2666 = vmatmul.msk.f32.gmra.mxu1 %vm1954_vm10, %v1920_v28  ;;  %v1937_v59 = vld [vmem:[#allocation3 + $0xe0] sm:$0xff] }
 0x320   : > { %2281 = vst.msk [vmem:[%s3935_s21 + $0x140] sm:$0xff] %vm2260_vm11, %v2248_v55  ;;  %2642 = vmatmul.msk.f32.gmra.mxu2 %vm1954_vm10, %v1937_v59  ;;  %2683 = vmatmul.msk.f32.gmra.mxu3 %vm1954_vm10, %v1937_v59 }
 0x321   : > { %2707 = vst.msk [vmem:[%s3935_s21 + $0x150] sm:$0xff] %vm2260_vm11, %v2500_v27 }
 0x322   : > { %1889 = vst.msk [vmem:[#allocation3 + $0x60] sm:$0xff] %vm1876_vm9, %v1805_v51 }
 0x323   : > { %v2080_v19 = vpop.f32.mrf.mxu0  ;;  %v2332_v45 = vpop.f32.mrf.mxu1 }
 0x324   : > { %v2081_v26 = vadd.f32 %v3922_v4, %v2080_v19  ;;  %v2333_v62 = vadd.f32 %v3922_v4, %v2332_v45  ;;  %v1421_v34 = vpop.permute.xlu2 %1420 }
 0x325   : > { %v1453_v39 = vpop.permute.xlu1 %1452  ;;  %1504 = vst.msk [vmem:[#allocation3 + $0x68] sm:$0xff] %vm1490_vm7, %v1421_v34 }
 0x326   : > { %vm2168_vm4 = vcmp.ge.f32.partialorder %v2081_v26, 0.0  ;;  %v2200_v8 = vmul.f32 0.2, %v2081_v26  ;;  %vm2420_vm5 = vcmp.ge.f32.partialorder %v2333_v62, 0.0  ;;  %v2452_v23 = vmul.f32 0.2, %v2333_v62  ;;  %v1646_v53 = vpop.permute.xlu0 %1645 }
 0x327   : > { %1520 = vst.msk [vmem:[#allocation3 + $0xe8] sm:$0xff] %vm1490_vm7, %v1453_v39 }
 0x328   : > { %v2232_v61 = vsel %vm2168_vm4, %v2081_v26, %v2200_v8  ;;  %v2484_v6 = vsel %vm2420_vm5, %v2333_v62, %v2452_v23  ;;  %1713 = vst.msk [vmem:[#allocation3 + $0xe8] sm:$0xff] %vm1683_vm8, %v1646_v53 }
 0x329   : > { %2265 = vst.msk [vmem:[%s3935_s21 + $0x40] sm:$0xff] %vm2260_vm11, %v2232_v61  ;;  %v1921_v58 = vld [vmem:[#allocation3 + $0x60] sm:$0xff] }
 0x32a   : > { %2691 = vst.msk [vmem:[%s3935_s21 + $0x50] sm:$0xff] %vm2260_vm11, %v2484_v6  ;;  %v2131_v40 = vpop.f32.mrf.mxu2  ;;  %v2383_v2 = vpop.f32.mrf.mxu3  ;;  %2626 = vmatmul.msk.f32.gmra.mxu0 %vm1954_vm10, %v1921_v58  ;;  %2667 = vmatmul.msk.f32.gmra.mxu1 %vm1954_vm10, %v1921_v58 }
 0x32b   : > { %v2132_v22 = vadd.f32 %v3922_v4, %v2131_v40  ;;  %v2384_v0 = vadd.f32 %v3922_v4, %v2383_v2 }
 0x32c   : > { %v1455_v9 = vpop.permute.xlu2 %1454 }
 0x32d   : > { %vm2185_vm12 = vcmp.ge.f32.partialorder %v2132_v22, 0.0  ;;  %v2217_v7 = vmul.f32 0.2, %v2132_v22  ;;  %vm2437_vm13 = vcmp.ge.f32.partialorder %v2384_v0, 0.0  ;;  %v2469_v18 = vmul.f32 0.2, %v2384_v0  ;;  %v1839_v10 = vpop.permute.xlu1 %1838 }
 0x32e   : > { %1906 = vst.msk [vmem:[#allocation3 + $0xe8] sm:$0xff] %vm1876_vm9, %v1839_v10  ;;  %v1261_v20 = vpop.permute.xlu0 %1260 }
 0x32f   : > { %v2249_v63 = vsel %vm2185_vm12, %v2132_v22, %v2217_v7  ;;  %v2501_v44 = vsel %vm2437_vm13, %v2384_v0, %v2469_v18  ;;  %1327 = vst.msk [vmem:[#allocation3 + $0xf0] sm:$0xff] %vm1296_vm6, %v1261_v20 }
 0x330   : > { %2282 = vst.msk [vmem:[%s3935_s21 + $0x148] sm:$0xff] %vm2260_vm11, %v2249_v63 }
 0x331   : > { %2708 = vst.msk [vmem:[%s3935_s21 + $0x158] sm:$0xff] %vm2260_vm11, %v2501_v44 }
 0x332   : > { %1521 = vst.msk [vmem:[#allocation3 + $0xf0] sm:$0xff] %vm1490_vm7, %v1455_v9 }
 0x333   : > { %v2083_v16 = vpop.f32.mrf.mxu0  ;;  %v2335_v3 = vpop.f32.mrf.mxu1 }
 0x334   : > { %v2084_v33 = vadd.f32 %v3922_v4, %v2083_v16  ;;  %v2336_v38 = vadd.f32 %v3922_v4, %v2335_v3  ;;  %v1841_v11 = vpop.permute.xlu2 %1840 }
 0x335   : > { %v1614_v15 = vpop.permute.xlu1 %1613  ;;  %v1938_v29 = vld [vmem:[#allocation3 + $0xe8] sm:$0xff] }
 0x336   : > { %vm2169_vm14 = vcmp.ge.f32.partialorder %v2084_v33, 0.0  ;;  %v2201_v14 = vmul.f32 0.2, %v2084_v33  ;;  %vm2421_vm15 = vcmp.ge.f32.partialorder %v2336_v38, 0.0  ;;  %v2453_v17 = vmul.f32 0.2, %v2336_v38  ;;  %v1807_v35 = vpop.permute.xlu0 %1806  ;;  %2643 = vmatmul.msk.f32.gmra.mxu2 %vm1954_vm10, %v1938_v29  ;;  %2684 = vmatmul.msk.f32.gmra.mxu3 %vm1954_vm10, %v1938_v29 }
 0x337   : > { %1697 = vst.msk [vmem:[#allocation3 + $0x68] sm:$0xff] %vm1683_vm8, %v1614_v15 }
 0x338   : > { %v2233_v21 = vsel %vm2169_vm14, %v2084_v33, %v2201_v14  ;;  %v2485_v25 = vsel %vm2421_vm15, %v2336_v38, %v2453_v17  ;;  %1890 = vst.msk [vmem:[#allocation3 + $0x68] sm:$0xff] %vm1876_vm9, %v1807_v35 }
 0x339   : > { %2266 = vst.msk [vmem:[%s3935_s21 + $0x48] sm:$0xff] %vm2260_vm11, %v2233_v21 }
 0x33a   : > { %2692 = vst.msk [vmem:[%s3935_s21 + $0x58] sm:$0xff] %vm2260_vm11, %v2485_v25  ;;  %v2134_v41 = vpop.f32.mrf.mxu2  ;;  %v2386_v5 = vpop.f32.mrf.mxu3 }
 0x33b   : > { %v2135_v32 = vadd.f32 %v3922_v4, %v2134_v41  ;;  %v2387_v24 = vadd.f32 %v3922_v4, %v2386_v5 }
 0x33c   : > { %v1616_v50 = vpop.permute.xlu2 %1615 }
 0x33d   : > { %vm2186_vm0 = vcmp.ge.f32.partialorder %v2135_v32, 0.0  ;;  %v2218_v31 = vmul.f32 0.2, %v2135_v32  ;;  %vm2438_vm1 = vcmp.ge.f32.partialorder %v2387_v24, 0.0  ;;  %v2470_v46 = vmul.f32 0.2, %v2387_v24  ;;  %v1648_v30 = vpop.permute.xlu1 %1647 }
 0x33e   : > { %1714 = vst.msk [vmem:[#allocation3 + $0xf0] sm:$0xff] %vm1683_vm8, %v1648_v30  ;;  %v1423_v37 = vpop.permute.xlu0 %1422 }
 0x33f   : > { %v2250_v36 = vsel %vm2186_vm0, %v2135_v32, %v2218_v31  ;;  %v2502_v13 = vsel %vm2438_vm1, %v2387_v24, %v2470_v46  ;;  %1907 = vst.msk [vmem:[#allocation3 + $0xf0] sm:$0xff] %vm1876_vm9, %v1841_v11  ;;  %v1922_v43 = vld [vmem:[#allocation3 + $0x68] sm:$0xff] }
 0x340   : > { %2283 = vst.msk [vmem:[%s3935_s21 + $0x160] sm:$0xff] %vm2260_vm11, %v2250_v36  ;;  %2627 = vmatmul.msk.f32.gmra.mxu0 %vm1954_vm10, %v1922_v43  ;;  %2668 = vmatmul.msk.f32.gmra.mxu1 %vm1954_vm10, %v1922_v43 }
 0x341   : > { %2709 = vst.msk [vmem:[%s3935_s21 + $0x170] sm:$0xff] %vm2260_vm11, %v2502_v13 }
 0x342   : > { %1505 = vst.msk [vmem:[#allocation3 + $0x70] sm:$0xff] %vm1490_vm7, %v1423_v37 }
 0x343   : > { %v2086_v54 = vpop.f32.mrf.mxu0  ;;  %v2338_v42 = vpop.f32.mrf.mxu1  ;;  %1698 = vst.msk [vmem:[#allocation3 + $0x70] sm:$0xff] %vm1683_vm8, %v1616_v50 }
 0x344   : > { %v2087_v48 = vadd.f32 %v3922_v4, %v2086_v54  ;;  %v2339_v57 = vadd.f32 %v3922_v4, %v2338_v42  ;;  %v1650_v49 = vpop.permute.xlu2 %1649 }
 0x345   : > { %v1263_v47 = vpop.permute.xlu1 %1262 }
 0x346   : > { %vm2170_vm2 = vcmp.ge.f32.partialorder %v2087_v48, 0.0  ;;  %v2202_v52 = vmul.f32 0.2, %v2087_v48  ;;  %vm2422_vm3 = vcmp.ge.f32.partialorder %v2339_v57, 0.0  ;;  %v2454_v60 = vmul.f32 0.2, %v2339_v57  ;;  %v1457_v51 = vpop.permute.xlu0 %1456 }
 0x347   : > { %1328 = vst.msk [vmem:[#allocation3 + $0xf8] sm:$0xff] %vm1296_vm6, %v1263_v47  ;;  %v1939_v56 = vld [vmem:[#allocation3 + $0xf0] sm:$0xff] }
 0x348   : > { %v2234_v12 = vsel %vm2170_vm2, %v2087_v48, %v2202_v52  ;;  %v2486_v1 = vsel %vm2422_vm3, %v2339_v57, %v2454_v60  ;;  %1522 = vst.msk [vmem:[#allocation3 + $0xf8] sm:$0xff] %vm1490_vm7, %v1457_v51  ;;  %2644 = vmatmul.msk.f32.gmra.mxu2 %vm1954_vm10, %v1939_v56  ;;  %2685 = vmatmul.msk.f32.gmra.mxu3 %vm1954_vm10, %v1939_v56 }
 0x349   : > { %2267 = vst.msk [vmem:[%s3935_s21 + $0x60] sm:$0xff] %vm2260_vm11, %v2234_v12 }
 0x34a   : > { %2693 = vst.msk [vmem:[%s3935_s21 + $0x70] sm:$0xff] %vm2260_vm11, %v2486_v1  ;;  %v2137_v28 = vpop.f32.mrf.mxu2  ;;  %v2389_v55 = vpop.f32.mrf.mxu3 }
 0x34b   : > { %v2138_v27 = vadd.f32 %v3922_v4, %v2137_v28  ;;  %v2390_v59 = vadd.f32 %v3922_v4, %v2389_v55  ;;  %1715 = vst.msk [vmem:[#allocation3 + $0xf8] sm:$0xff] %vm1683_vm8, %v1650_v49 }
 0x34c   : > { %v1618_v58 = vpop.permute.xlu2 %1617 }
 0x34d   : > { %vm2187_vm6 = vcmp.ge.f32.partialorder %v2138_v27, 0.0  ;;  %v2219_v19 = vmul.f32 0.2, %v2138_v27  ;;  %vm2439_vm4 = vcmp.ge.f32.partialorder %v2390_v59, 0.0  ;;  %v2471_v45 = vmul.f32 0.2, %v2390_v59  ;;  %v1809_v26 = vpop.permute.xlu1 %1808 }
 0x34e   : > { %1891 = vst.msk [vmem:[#allocation3 + $0x70] sm:$0xff] %vm1876_vm9, %v1809_v26  ;;  %v1843_v62 = vpop.permute.xlu0 %1842 }
 0x34f   : > { %v2251_v34 = vsel %vm2187_vm6, %v2138_v27, %v2219_v19  ;;  %v2503_v39 = vsel %vm2439_vm4, %v2390_v59, %v2471_v45  ;;  %1908 = vst.msk [vmem:[#allocation3 + $0xf8] sm:$0xff] %vm1876_vm9, %v1843_v62 }
 0x350   : > { %2284 = vst.msk [vmem:[%s3935_s21 + $0x168] sm:$0xff] %vm2260_vm11, %v2251_v34 }
 0x351   : > { %2710 = vst.msk [vmem:[%s3935_s21 + $0x178] sm:$0xff] %vm2260_vm11, %v2503_v39 }
 0x353   : > { %v2089_v8 = vpop.f32.mrf.mxu0  ;;  %v2341_v23 = vpop.f32.mrf.mxu1 }
 0x354   : > { %v2090_v53 = vadd.f32 %v3922_v4, %v2089_v8  ;;  %v2342_v61 = vadd.f32 %v3922_v4, %v2341_v23 }
 0x355   : > { %v1425_v6 = vpop.permute.xlu1 %1424  ;;  %v1923_v40 = vld [vmem:[#allocation3 + $0x70] sm:$0xff] }
 0x356   : > { %vm2171_vm5 = vcmp.ge.f32.partialorder %v2090_v53, 0.0  ;;  %v2203_v2 = vmul.f32 0.2, %v2090_v53  ;;  %vm2423_vm12 = vcmp.ge.f32.partialorder %v2342_v61, 0.0  ;;  %v2455_v22 = vmul.f32 0.2, %v2342_v61  ;;  %2628 = vmatmul.msk.f32.gmra.mxu0 %vm1954_vm10, %v1923_v40  ;;  %2669 = vmatmul.msk.f32.gmra.mxu1 %vm1954_vm10, %v1923_v40  ;;  %v1811_v18 = vpop.permute.xlu0 %1810 }
 0x357   : > { %1506 = vst.msk [vmem:[#allocation3 + $0x78] sm:$0xff] %vm1490_vm7, %v1425_v6  ;;  %v1940_v0 = vld [vmem:[#allocation3 + $0xf8] sm:$0xff] }
 0x358   : > { %v2235_v9 = vsel %vm2171_vm5, %v2090_v53, %v2203_v2  ;;  %v2487_v7 = vsel %vm2423_vm12, %v2342_v61, %v2455_v22  ;;  %1699 = vst.msk [vmem:[#allocation3 + $0x78] sm:$0xff] %vm1683_vm8, %v1618_v58  ;;  %2645 = vmatmul.msk.f32.gmra.mxu2 %vm1954_vm10, %v1940_v0  ;;  %2686 = vmatmul.msk.f32.gmra.mxu3 %vm1954_vm10, %v1940_v0 }
 0x359   : > { %2268 = vst.msk [vmem:[%s3935_s21 + $0x68] sm:$0xff] %vm2260_vm11, %v2235_v9 }
 0x35a   : > { %2694 = vst.msk [vmem:[%s3935_s21 + $0x78] sm:$0xff] %vm2260_vm11, %v2487_v7  ;;  %v2140_v10 = vpop.f32.mrf.mxu2  ;;  %v2392_v20 = vpop.f32.mrf.mxu3 }
 0x35b   : > { %1892 = vst.msk [vmem:[#allocation3 + $0x78] sm:$0xff] %vm1876_vm9, %v1811_v18  ;;  %v2141_v63 = vadd.f32 %v3922_v4, %v2140_v10  ;;  %v2393_v44 = vadd.f32 %v3922_v4, %v2392_v20 }
 0x35d   : > { %vm2188_vm7 = vcmp.ge.f32.partialorder %v2141_v63, 0.0  ;;  %v2220_v16 = vmul.f32 0.2, %v2141_v63  ;;  %vm2440_vm8 = vcmp.ge.f32.partialorder %v2393_v44, 0.0  ;;  %v2472_v3 = vmul.f32 0.2, %v2393_v44 }
 0x35f   : > { %v2252_v33 = vsel %vm2188_vm7, %v2141_v63, %v2220_v16  ;;  %v2504_v38 = vsel %vm2440_vm8, %v2393_v44, %v2472_v3 }
 0x360   : > { %2285 = vst.msk [vmem:[%s3935_s21 + $0x180] sm:$0xff] %vm2260_vm11, %v2252_v33 }
 0x361   : > { %2711 = vst.msk [vmem:[%s3935_s21 + $0x190] sm:$0xff] %vm2260_vm11, %v2504_v38 }
 0x362   : > { %v1924_v11 = vld [vmem:[#allocation3 + $0x78] sm:$0xff] }
 0x363   : > { %2629 = vmatmul.msk.f32.gmra.mxu0 %vm1954_vm10, %v1924_v11  ;;  %2670 = vmatmul.msk.f32.gmra.mxu1 %vm1954_vm10, %v1924_v11 }
 0x365   : > { %v2092_v15 = vpop.f32.mrf.mxu0  ;;  %v2344_v29 = vpop.f32.mrf.mxu1 }
 0x366   : > { %v2093_v14 = vadd.f32 %v3922_v4, %v2092_v15  ;;  %v2345_v17 = vadd.f32 %v3922_v4, %v2344_v29 }
 0x368   : > { %vm2172_vm9 = vcmp.ge.f32.partialorder %v2093_v14, 0.0  ;;  %v2204_v35 = vmul.f32 0.2, %v2093_v14  ;;  %vm2424_vm13 = vcmp.ge.f32.partialorder %v2345_v17, 0.0  ;;  %v2456_v21 = vmul.f32 0.2, %v2345_v17 }
 0x36a   : > { %v2236_v25 = vsel %vm2172_vm9, %v2093_v14, %v2204_v35  ;;  %v2488_v41 = vsel %vm2424_vm13, %v2345_v17, %v2456_v21 }
 0x36b   : > { %2269 = vst.msk [vmem:[%s3935_s21 + $0x80] sm:$0xff] %vm2260_vm11, %v2236_v25 }
 0x36c   : > { %2695 = vst.msk [vmem:[%s3935_s21 + $0x90] sm:$0xff] %vm2260_vm11, %v2488_v41  ;;  %v2143_v5 = vpop.f32.mrf.mxu2  ;;  %v2395_v32 = vpop.f32.mrf.mxu3 }
 0x36d   : > { %v2144_v24 = vadd.f32 %v3922_v4, %v2143_v5  ;;  %v2396_v31 = vadd.f32 %v3922_v4, %v2395_v32 }
 0x36f   : > { %vm2189_vm10 = vcmp.ge.f32.partialorder %v2144_v24, 0.0  ;;  %v2221_v46 = vmul.f32 0.2, %v2144_v24  ;;  %vm2441_vm14 = vcmp.ge.f32.partialorder %v2396_v31, 0.0  ;;  %v2473_v30 = vmul.f32 0.2, %v2396_v31 }
 0x370   : > { %v2095_v37 = vpop.f32.mrf.mxu0  ;;  %v2347_v50 = vpop.f32.mrf.mxu1 }
 0x371   : > { %v2253_v36 = vsel %vm2189_vm10, %v2144_v24, %v2221_v46  ;;  %v2505_v13 = vsel %vm2441_vm14, %v2396_v31, %v2473_v30  ;;  %v2096_v43 = vadd.f32 %v3922_v4, %v2095_v37  ;;  %v2348_v54 = vadd.f32 %v3922_v4, %v2347_v50 }
 0x372   : > { %2286 = vst.msk [vmem:[%s3935_s21 + $0x188] sm:$0xff] %vm2260_vm11, %v2253_v36 }
 0x373   : > { %2712 = vst.msk [vmem:[%s3935_s21 + $0x198] sm:$0xff] %vm2260_vm11, %v2505_v13  ;;  %vm2173_vm15 = vcmp.ge.f32.partialorder %v2096_v43, 0.0  ;;  %v2205_v42 = vmul.f32 0.2, %v2096_v43  ;;  %vm2425_vm0 = vcmp.ge.f32.partialorder %v2348_v54, 0.0 }
 0x374   : > { %v2457_v48 = vmul.f32 0.2, %v2348_v54 }
 0x375   : > { %v2237_v57 = vsel %vm2173_vm15, %v2096_v43, %v2205_v42 }
 0x376   : > { %2270 = vst.msk [vmem:[%s3935_s21 + $0x88] sm:$0xff] %vm2260_vm11, %v2237_v57  ;;  %v2489_v47 = vsel %vm2425_vm0, %v2348_v54, %v2457_v48 }
 0x377   : > { %2696 = vst.msk [vmem:[%s3935_s21 + $0x98] sm:$0xff] %vm2260_vm11, %v2489_v47 }
 0x382   : > { %v2146_v52 = vpop.f32.mrf.mxu2  ;;  %v2398_v60 = vpop.f32.mrf.mxu3 }
 0x383   : > { %v2147_v51 = vadd.f32 %v3922_v4, %v2146_v52  ;;  %v2399_v56 = vadd.f32 %v3922_v4, %v2398_v60 }
 0x385   : > { %vm2190_vm1 = vcmp.ge.f32.partialorder %v2147_v51, 0.0  ;;  %v2222_v12 = vmul.f32 0.2, %v2147_v51  ;;  %vm2442_vm2 = vcmp.ge.f32.partialorder %v2399_v56, 0.0  ;;  %v2474_v1 = vmul.f32 0.2, %v2399_v56  ;;  %v2098_v49 = vpop.f32.mrf.mxu0  ;;  %v2350_v28 = vpop.f32.mrf.mxu1 }
 0x386   : > { %v2099_v55 = vadd.f32 %v3922_v4, %v2098_v49  ;;  %v2351_v27 = vadd.f32 %v3922_v4, %v2350_v28 }
 0x387   : > { %v2254_v59 = vsel %vm2190_vm1, %v2147_v51, %v2222_v12  ;;  %v2506_v19 = vsel %vm2442_vm2, %v2399_v56, %v2474_v1 }
 0x388   : > { %2287 = vst.msk [vmem:[%s3935_s21 + $0x1a0] sm:$0xff] %vm2260_vm11, %v2254_v59  ;;  %vm2174_vm3 = vcmp.ge.f32.partialorder %v2099_v55, 0.0  ;;  %v2206_v45 = vmul.f32 0.2, %v2099_v55  ;;  %vm2426_vm6 = vcmp.ge.f32.partialorder %v2351_v27, 0.0 }
 0x389   : > { %2713 = vst.msk [vmem:[%s3935_s21 + $0x1b0] sm:$0xff] %vm2260_vm11, %v2506_v19  ;;  %v2458_v26 = vmul.f32 0.2, %v2351_v27 }
 0x38a   : > { %v2238_v62 = vsel %vm2174_vm3, %v2099_v55, %v2206_v45 }
 0x38b   : > { %2271 = vst.msk [vmem:[%s3935_s21 + $0xa0] sm:$0xff] %vm2260_vm11, %v2238_v62  ;;  %v2490_v34 = vsel %vm2426_vm6, %v2351_v27, %v2458_v26 }
 0x38c   : > { %2697 = vst.msk [vmem:[%s3935_s21 + $0xb0] sm:$0xff] %vm2260_vm11, %v2490_v34 }
 0x393   : > { %v2149_v39 = vpop.f32.mrf.mxu2  ;;  %v2401_v8 = vpop.f32.mrf.mxu3 }
 0x394   : > { %v2150_v23 = vadd.f32 %v3922_v4, %v2149_v39  ;;  %v2402_v53 = vadd.f32 %v3922_v4, %v2401_v8 }
 0x396   : > { %vm2191_vm4 = vcmp.ge.f32.partialorder %v2150_v23, 0.0  ;;  %v2223_v61 = vmul.f32 0.2, %v2150_v23  ;;  %vm2443_vm5 = vcmp.ge.f32.partialorder %v2402_v53, 0.0  ;;  %v2475_v6 = vmul.f32 0.2, %v2402_v53 }
 0x398   : > { %v2255_v58 = vsel %vm2191_vm4, %v2150_v23, %v2223_v61  ;;  %v2507_v40 = vsel %vm2443_vm5, %v2402_v53, %v2475_v6  ;;  %v2759_v53 = vld [vmem:[%s4212_s2] ss:$0 sm:$0xff] }
 0x399   : > { %2288 = vst.msk [vmem:[%s3935_s21 + $0x1a8] sm:$0xff] %vm2260_vm11, %v2255_v58 }
 0x39a   : > { %2714 = vst.msk [vmem:[%s3935_s21 + $0x1b8] sm:$0xff] %vm2260_vm11, %v2507_v40 }
 0x39c   : > { %v2101_v2 = vpop.f32.mrf.mxu0  ;;  %v2353_v22 = vpop.f32.mrf.mxu1 }
 0x39d   : > { %v2102_v0 = vadd.f32 %v3922_v4, %v2101_v2  ;;  %v2354_v9 = vadd.f32 %v3922_v4, %v2353_v22 }
 0x39f   : > { %vm2175_vm12 = vcmp.ge.f32.partialorder %v2102_v0, 0.0  ;;  %v2207_v7 = vmul.f32 0.2, %v2102_v0  ;;  %vm2427_vm7 = vcmp.ge.f32.partialorder %v2354_v9, 0.0  ;;  %v2459_v18 = vmul.f32 0.2, %v2354_v9 }
 0x3a1   : > { %v2239_v10 = vsel %vm2175_vm12, %v2102_v0, %v2207_v7  ;;  %v2491_v20 = vsel %vm2427_vm7, %v2354_v9, %v2459_v18 }
 0x3a2   : > { %2272 = vst.msk [vmem:[%s3935_s21 + $0xa8] sm:$0xff] %vm2260_vm11, %v2239_v10 }
 0x3a3   : > { %2698 = vst.msk [vmem:[%s3935_s21 + $0xb8] sm:$0xff] %vm2260_vm11, %v2491_v20  ;;  %v2152_v63 = vpop.f32.mrf.mxu2  ;;  %v2404_v44 = vpop.f32.mrf.mxu3 }
 0x3a4   : > { %v2153_v16 = vadd.f32 %v3922_v4, %v2152_v63  ;;  %v2405_v3 = vadd.f32 %v3922_v4, %v2404_v44 }
 0x3a6   : > { %vm2192_vm8 = vcmp.ge.f32.partialorder %v2153_v16, 0.0  ;;  %v2224_v33 = vmul.f32 0.2, %v2153_v16  ;;  %vm2444_vm9 = vcmp.ge.f32.partialorder %v2405_v3, 0.0  ;;  %v2476_v38 = vmul.f32 0.2, %v2405_v3 }
 0x3a7   : > { %v2104_v11 = vpop.f32.mrf.mxu0  ;;  %v2356_v15 = vpop.f32.mrf.mxu1 }
 0x3a8   : > { %v2256_v29 = vsel %vm2192_vm8, %v2153_v16, %v2224_v33  ;;  %v2508_v14 = vsel %vm2444_vm9, %v2405_v3, %v2476_v38  ;;  %v2105_v17 = vadd.f32 %v3922_v4, %v2104_v11  ;;  %v2357_v35 = vadd.f32 %v3922_v4, %v2356_v15 }
 0x3a9   : > { %2289 = vst.msk [vmem:[%s3935_s21 + $0x1c0] sm:$0xff] %vm2260_vm11, %v2256_v29 }
 0x3aa   : > { %2715 = vst.msk [vmem:[%s3935_s21 + $0x1d0] sm:$0xff] %vm2260_vm11, %v2508_v14  ;;  %vm2176_vm13 = vcmp.ge.f32.partialorder %v2105_v17, 0.0  ;;  %v2208_v21 = vmul.f32 0.2, %v2105_v17  ;;  %vm2428_vm10 = vcmp.ge.f32.partialorder %v2357_v35, 0.0 }
 0x3ab   : > { %v2460_v25 = vmul.f32 0.2, %v2357_v35 }
 0x3ac   : > { %v2240_v41 = vsel %vm2176_vm13, %v2105_v17, %v2208_v21 }
 0x3ad   : > { %2273 = vst.msk [vmem:[%s3935_s21 + $0xc0] sm:$0xff] %vm2260_vm11, %v2240_v41  ;;  %v2492_v5 = vsel %vm2428_vm10, %v2357_v35, %v2460_v25 }
 0x3ae   : > { %2699 = vst.msk [vmem:[%s3935_s21 + $0xd0] sm:$0xff] %vm2260_vm11, %v2492_v5 }
 0x3b9   : > { %v2155_v32 = vpop.f32.mrf.mxu2  ;;  %v2407_v24 = vpop.f32.mrf.mxu3 }
 0x3ba   : > { %v2156_v31 = vadd.f32 %v3922_v4, %v2155_v32  ;;  %v2408_v46 = vadd.f32 %v3922_v4, %v2407_v24 }
 0x3bc   : > { %vm2193_vm14 = vcmp.ge.f32.partialorder %v2156_v31, 0.0  ;;  %v2225_v30 = vmul.f32 0.2, %v2156_v31  ;;  %vm2445_vm15 = vcmp.ge.f32.partialorder %v2408_v46, 0.0  ;;  %v2477_v37 = vmul.f32 0.2, %v2408_v46 }
 0x3bd   : > { %v2107_v50 = vpop.f32.mrf.mxu0  ;;  %v2359_v36 = vpop.f32.mrf.mxu1 }
 0x3be   : > { %v2257_v13 = vsel %vm2193_vm14, %v2156_v31, %v2225_v30  ;;  %v2509_v43 = vsel %vm2445_vm15, %v2408_v46, %v2477_v37  ;;  %v2108_v54 = vadd.f32 %v3922_v4, %v2107_v50  ;;  %v2360_v42 = vadd.f32 %v3922_v4, %v2359_v36 }
 0x3bf   : > { %2290 = vst.msk [vmem:[%s3935_s21 + $0x1c8] sm:$0xff] %vm2260_vm11, %v2257_v13 }
 0x3c0   : > { %2716 = vst.msk [vmem:[%s3935_s21 + $0x1d8] sm:$0xff] %vm2260_vm11, %v2509_v43  ;;  %vm2177_vm0 = vcmp.ge.f32.partialorder %v2108_v54, 0.0  ;;  %v2209_v48 = vmul.f32 0.2, %v2108_v54  ;;  %vm2429_vm1 = vcmp.ge.f32.partialorder %v2360_v42, 0.0 }
 0x3c1   : > { %v2461_v57 = vmul.f32 0.2, %v2360_v42 }
 0x3c2   : > { %v2241_v47 = vsel %vm2177_vm0, %v2108_v54, %v2209_v48 }
 0x3c3   : > { %2274 = vst.msk [vmem:[%s3935_s21 + $0xc8] sm:$0xff] %vm2260_vm11, %v2241_v47  ;;  %v2493_v52 = vsel %vm2429_vm1, %v2360_v42, %v2461_v57 }
 0x3c4   : > { %2700 = vst.msk [vmem:[%s3935_s21 + $0xd8] sm:$0xff] %vm2260_vm11, %v2493_v52 }
 0x3cb   : > { %v2158_v60 = vpop.f32.mrf.mxu2  ;;  %v2410_v51 = vpop.f32.mrf.mxu3 }
 0x3cc   : > { %v2159_v56 = vadd.f32 %v3922_v4, %v2158_v60  ;;  %v2411_v12 = vadd.f32 %v3922_v4, %v2410_v51 }
 0x3ce   : > { %vm2194_vm2 = vcmp.ge.f32.partialorder %v2159_v56, 0.0  ;;  %v2226_v1 = vmul.f32 0.2, %v2159_v56  ;;  %vm2446_vm3 = vcmp.ge.f32.partialorder %v2411_v12, 0.0  ;;  %v2478_v49 = vmul.f32 0.2, %v2411_v12 }
 0x3d0   : > { %v2258_v28 = vsel %vm2194_vm2, %v2159_v56, %v2226_v1  ;;  %v2510_v55 = vsel %vm2446_vm3, %v2411_v12, %v2478_v49 }
 0x3d1   : > { %2291 = vst.msk [vmem:[%s3935_s21 + $0x1e0] sm:$0xff] %vm2260_vm11, %v2258_v28 }
 0x3d2   : > { %2717 = vst.msk [vmem:[%s3935_s21 + $0x1f0] sm:$0xff] %vm2260_vm11, %v2510_v55 }
 0x3d3   : > { %v2110_v27 = vpop.f32.mrf.mxu0  ;;  %v2362_v59 = vpop.f32.mrf.mxu1 }
 0x3d4   : > { %v2111_v19 = vadd.f32 %v3922_v4, %v2110_v27  ;;  %v2363_v45 = vadd.f32 %v3922_v4, %v2362_v59 }
 0x3d6   : > { %vm2178_vm6 = vcmp.ge.f32.partialorder %v2111_v19, 0.0  ;;  %v2210_v26 = vmul.f32 0.2, %v2111_v19  ;;  %vm2430_vm4 = vcmp.ge.f32.partialorder %v2363_v45, 0.0  ;;  %v2462_v62 = vmul.f32 0.2, %v2363_v45 }
 0x3d8   : > { %v2242_v34 = vsel %vm2178_vm6, %v2111_v19, %v2210_v26  ;;  %v2494_v39 = vsel %vm2430_vm4, %v2363_v45, %v2462_v62 }
 0x3d9   : > { %2275 = vst.msk [vmem:[%s3935_s21 + $0xe0] sm:$0xff] %vm2260_vm11, %v2242_v34 }
 0x3da   : > { %2701 = vst.msk [vmem:[%s3935_s21 + $0xf0] sm:$0xff] %vm2260_vm11, %v2494_v39 }
 0x3db   : > { %v2161_v8 = vpop.f32.mrf.mxu2  ;;  %v2413_v23 = vpop.f32.mrf.mxu3 }
 0x3dc   : > { %v2162_v61 = vadd.f32 %v2759_v53, %v2161_v8  ;;  %v2414_v4 = vadd.f32 %v2759_v53, %v2413_v23 }
 0x3de   : > { %vm2195_vm5 = vcmp.ge.f32.partialorder %v2162_v61, 0.0  ;;  %v2227_v6 = vmul.f32 0.2, %v2162_v61  ;;  %vm2447_vm12 = vcmp.ge.f32.partialorder %v2414_v4, 0.0  ;;  %v2479_v58 = vmul.f32 0.2, %v2414_v4 }
 0x3e0   : > { %v2259_v40 = vsel %vm2195_vm5, %v2162_v61, %v2227_v6  ;;  %v2511_v2 = vsel %vm2447_vm12, %v2414_v4, %v2479_v58  ;;  %v2113_v22 = vpop.f32.mrf.mxu0  ;;  %v2365_v0 = vpop.f32.mrf.mxu1 }
 0x3e1   : > { %2292 = vst.msk [vmem:[%s3935_s21 + $0x1e8] sm:$0xff] %vm2260_vm11, %v2259_v40  ;;  %v2114_v9 = vadd.f32 %v2759_v53, %v2113_v22  ;;  %v2366_v7 = vadd.f32 %v2759_v53, %v2365_v0 }
 0x3e2   : > { %2718 = vst.msk [vmem:[%s3935_s21 + $0x1f8] sm:$0xff] %vm2260_vm11, %v2511_v2 }
 0x3e3   : > { %vm2179_vm7 = vcmp.ge.f32.partialorder %v2114_v9, 0.0  ;;  %v2211_v18 = vmul.f32 0.2, %v2114_v9  ;;  %vm2431_vm8 = vcmp.ge.f32.partialorder %v2366_v7, 0.0  ;;  %v2463_v10 = vmul.f32 0.2, %v2366_v7 }
 0x3e5   : > { %v2243_v20 = vsel %vm2179_vm7, %v2114_v9, %v2211_v18  ;;  %v2495_v63 = vsel %vm2431_vm8, %v2366_v7, %v2463_v10 }
 0x3e6   : > { %2276 = vst.msk [vmem:[%s3935_s21 + $0xe8] sm:$0xff] %vm2260_vm11, %v2243_v20 }
 0x3e7   : > { %2702 = vst.msk [vmem:[%s3935_s21 + $0xf8] sm:$0xff] %vm2260_vm11, %v2495_v63 }
 0x3e8 PF: > { %s13_s12 = sadd.s32 1, %s2766_s12  }
 0x3e9   : > { %p10_p4 = scmp.ge.s32.totalorder %s13_s12, 4  }
 0x3eb   :  { %12 = sbr.rel (!%p10_p4) target bundleno = 1 (0x1), region = 66 }

</bundles_post_ra>
